<compile_context>
chip_gen: v7x
topology: tpu7x:2x2x1
jax: 0.10.0
libtpu: 0.0.40
codegen_flags: <defaults>
</compile_context>

<pallas_src>
import math

import jax
import jax.numpy as jnp
from jax.experimental import pallas as pl
from jax.experimental.pallas import tpu as pltpu

# ---- small, module-consistent config (d_model lane-aligned) ----
B = 2            # batch
S = 8            # sequence length
D_MODEL = 128    # embedding_dim (768 in the original module)
N_HEADS = 4      # n_heads (12 in the original module)
HEAD_DIM = D_MODEL // N_HEADS
FF_DIM = 256     # dim_feedforward (2048 default in nn.TransformerEncoderLayer)
NUM_LAYERS = 2   # transformer_layers
LN_EPS = 1e-5
BF16 = jnp.bfloat16

# packed weight-slab column offsets (all multiples of 128 -> cheap lane slices)
_QKV_OFF = 0
_WO_OFF = 3 * D_MODEL                 # 384
_W1_OFF = 4 * D_MODEL                 # 512
_W_COLS = 4 * D_MODEL + FF_DIM        # 768

# bias / LayerNorm slab rows (per layer); outer-FFN biases live at layer index NUM_LAYERS
_R_BQKV, _R_BO, _R_B1, _R_B2, _R_G1, _R_BE1, _R_G2, _R_BE2 = range(8)
_R_FB1, _R_FB2 = 0, 1
_VEC_COLS = 3 * D_MODEL               # 384 = max(3D, FF)


def _layer_norm(x, gamma, beta, eps=LN_EPS):
    mu = jnp.mean(x, axis=-1, keepdims=True)
    var = jnp.mean((x - mu) ** 2, axis=-1, keepdims=True)
    return (x - mu) * jax.lax.rsqrt(var + eps) * gamma + beta


def single_para_encoder_kernel(
    x_ref,      # (B, S, D)            f32  BERT last_hidden_state
    w_ref,      # (L, D, 3D+D+FF)      bf16 wqkv | wo | w1 (pre-transposed)
    w2_ref,     # (L, FF, D)           bf16 linear2 (pre-transposed)
    fw_ref,     # (D, 2D)              bf16 outer ffn w1 | w2 (pre-transposed)
    vec_ref,    # (L+1, 8, 3D)         f32  biases + LN params (+ outer biases)
    out_ref,    # (B, D)               f32  pooled output
):
    scale = 1.0 / math.sqrt(HEAD_DIM)
    # All batch rows at once: (B*S, D) f32 working activation.
    x = x_ref[...].astype(jnp.float32).reshape(B * S, D_MODEL)

    for l in range(NUM_LAYERS):                      # static unroll over layers
        # ---- QKV projection for every row of every batch element (one MXU pass) ----
        qkv = (jnp.dot(x.astype(BF16), w_ref[l, :, _QKV_OFF:_WO_OFF],
                       preferred_element_type=jnp.float32)
               + vec_ref[l, _R_BQKV:_R_BQKV + 1, :])            # (B*S, 3D) f32
        qkv_b = qkv.astype(BF16).reshape(B, S, 3 * D_MODEL)     # free reshape

        # ---- multi-head self-attention: batch handled by single-batch-dim
        #      einsums; heads merged via per-head out-proj accumulation
        #      (no concatenates / lane stitching, no per-batch loop) ----
        attn = jnp.zeros((B * S, D_MODEL), jnp.float32)
        for h in range(N_HEADS):                     # static, 4 iterations
            lo = h * HEAD_DIM
            q_h = qkv_b[:, :, lo:lo + HEAD_DIM]
            k_h = qkv_b[:, :, D_MODEL + lo:D_MODEL + lo + HEAD_DIM]
            v_h = qkv_b[:, :, 2 * D_MODEL + lo:2 * D_MODEL + lo + HEAD_DIM]

            s = jnp.einsum('bqd,bkd->bqk', q_h, k_h,
                           preferred_element_type=jnp.float32) * scale  # (B,S,S)
            s = s - jnp.max(s, axis=-1, keepdims=True)
            p = jnp.exp(s)
            p = p * pl.reciprocal(jnp.sum(p, axis=-1, keepdims=True), approx=True)
            ctx_h = jnp.einsum('bqk,bkd->bqd', p.astype(BF16), v_h,
                               preferred_element_type=jnp.float32)       # (B,S,Hd)
            # ctx @ Wo == sum_h ctx_h @ Wo[h*Hd:(h+1)*Hd, :]
            attn = attn + jnp.dot(
                ctx_h.reshape(B * S, HEAD_DIM).astype(BF16),
                w_ref[l, lo:lo + HEAD_DIM, _WO_OFF:_W1_OFF],
                preferred_element_type=jnp.float32)

        attn = attn + vec_ref[l, _R_BO:_R_BO + 1, 0:D_MODEL]
        x = _layer_norm(x + attn,
                        vec_ref[l, _R_G1:_R_G1 + 1, 0:D_MODEL],
                        vec_ref[l, _R_BE1:_R_BE1 + 1, 0:D_MODEL])        # post-LN, f32

        # ---- feed-forward block inside the transformer layer ----
        h1 = jnp.maximum(
            jnp.dot(x.astype(BF16), w_ref[l, :, _W1_OFF:_W_COLS],
                    preferred_element_type=jnp.float32)
            + vec_ref[l, _R_B1:_R_B1 + 1, 0:FF_DIM], 0.0)
        ff = (jnp.dot(h1.astype(BF16), w2_ref[l],
                      preferred_element_type=jnp.float32)
              + vec_ref[l, _R_B2:_R_B2 + 1, 0:D_MODEL])
        x = _layer_norm(x + ff,
                        vec_ref[l, _R_G2:_R_G2 + 1, 0:D_MODEL],
                        vec_ref[l, _R_BE2:_R_BE2 + 1, 0:D_MODEL])

    # ---- outer FFN: Linear -> ReLU -> (mean-pool) -> Linear ----
    # AdaptiveAvgPool1d(1) over S commutes with the final affine layer, so pool
    # first and run the second Linear on only (B, D) rows.
    y = jnp.maximum(
        jnp.dot(x.astype(BF16), fw_ref[:, 0:D_MODEL],
                preferred_element_type=jnp.float32)
        + vec_ref[NUM_LAYERS, _R_FB1:_R_FB1 + 1, 0:D_MODEL], 0.0)        # (B*S, D)
    ym = jnp.mean(y.reshape(B, S, D_MODEL), axis=1)                      # (B, D)
    out = (jnp.dot(ym.astype(BF16), fw_ref[:, D_MODEL:2 * D_MODEL],
                   preferred_element_type=jnp.float32)
           + vec_ref[NUM_LAYERS, _R_FB2:_R_FB2 + 1, 0:D_MODEL])
    out_ref[...] = out


# ---- static cost estimate (advisory; lets XLA overlap neighbours) ----
_FLOPS = (NUM_LAYERS * (2 * B * S * D_MODEL * 3 * D_MODEL          # qkv
                        + 2 * 2 * B * N_HEADS * S * S * HEAD_DIM   # scores + ctx
                        + 2 * B * S * D_MODEL * D_MODEL            # out proj
                        + 2 * 2 * B * S * D_MODEL * FF_DIM)        # ffn
          + 2 * B * S * D_MODEL * D_MODEL                          # outer linear1
          + 2 * B * D_MODEL * D_MODEL)                             # outer linear2
_TRANSCENDENTALS = (NUM_LAYERS * N_HEADS * B * S * S               # exp
                    + NUM_LAYERS * N_HEADS * B * S                 # reciprocal
                    + 4 * B * S)                                   # rsqrt (LN)
_BYTES_ACCESSED = (B * S * D_MODEL * 4
                   + NUM_LAYERS * D_MODEL * _W_COLS * 2
                   + NUM_LAYERS * FF_DIM * D_MODEL * 2
                   + D_MODEL * 2 * D_MODEL * 2
                   + (NUM_LAYERS + 1) * 8 * _VEC_COLS * 4
                   + B * D_MODEL * 4)


def _vmem_spec():
    return pl.BlockSpec(memory_space=pltpu.MemorySpace.VMEM)


@jax.jit
def single_para_encoder(x, w_slab, w2_slab, fw_slab, vec_slab):
    """x: (B, S, D) float32 'BERT last_hidden_state'. Returns (B, D)."""
    return pl.pallas_call(
        single_para_encoder_kernel,
        out_shape=jax.ShapeDtypeStruct((B, D_MODEL), jnp.float32),
        in_specs=[_vmem_spec()] * 5,
        out_specs=_vmem_spec(),
        cost_estimate=pl.CostEstimate(
            flops=_FLOPS,
            transcendentals=_TRANSCENDENTALS,
            bytes_accessed=_BYTES_ACCESSED),
    )(x, w_slab, w2_slab, fw_slab, vec_slab)


def init_params(key):
    """Deterministic synthetic weights with PyTorch-module shapes (stacked over layers)."""
    def nrm(k, shape, scl=0.02):
        return (jax.random.normal(k, shape, jnp.float32) * scl).astype(BF16)

    ks = jax.random.split(key, 8)
    L, D, FF = NUM_LAYERS, D_MODEL, FF_DIM
    return {
        # nn.MultiheadAttention in_proj (3D, D) stored pre-transposed as (L, D, 3D)
        "wqkv_t": nrm(ks[0], (L, D, 3 * D)),
        "bqkv":   jnp.zeros((L, 1, 3 * D), jnp.float32),
        "wo_t":   nrm(ks[1], (L, D, D)),
        "bo":     jnp.zeros((L, 1, D), jnp.float32),
        # transformer-layer FFN
        "w1_t":   nrm(ks[2], (L, D, FF)),
        "b1":     jnp.zeros((L, 1, FF), jnp.float32),
        "w2_t":   nrm(ks[3], (L, FF, D)),
        "b2":     jnp.zeros((L, 1, D), jnp.float32),
        # layer norms
        "g1":  jnp.ones((L, 1, D), jnp.float32),
        "be1": jnp.zeros((L, 1, D), jnp.float32),
        "g2":  jnp.ones((L, 1, D), jnp.float32),
        "be2": jnp.zeros((L, 1, D), jnp.float32),
        # outer ffn: Linear(D,D) -> ReLU -> Linear(D,D)
        "fw1_t": nrm(ks[4], (D, D)),
        "fb1":   jax.random.normal(ks[5], (1, D), jnp.float32) * 0.02,
        "fw2_t": nrm(ks[6], (D, D)),
        "fb2":   jax.random.normal(ks[7], (1, D), jnp.float32) * 0.02,
    }


def pack_params(p):
    """Pack the 16 parameter tensors into 4 kernel slabs (fewer, larger DMAs)."""
    w_slab = jnp.concatenate([p["wqkv_t"], p["wo_t"], p["w1_t"]], axis=-1)   # (L, D, 768) bf16
    w2_slab = p["w2_t"]                                                      # (L, FF, D) bf16
    fw_slab = jnp.concatenate([p["fw1_t"], p["fw2_t"]], axis=-1)             # (D, 2D) bf16

    def pad(v):
        return jnp.pad(v, ((0, 0), (0, 0), (0, _VEC_COLS - v.shape[-1])))

    per_layer = jnp.concatenate([
        pad(p["bqkv"]), pad(p["bo"]), pad(p["b1"]), pad(p["b2"]),
        pad(p["g1"]), pad(p["be1"]), pad(p["g2"]), pad(p["be2"]),
    ], axis=1)                                                               # (L, 8, 384)
    outer = jnp.zeros((1, 8, _VEC_COLS), jnp.float32)
    outer = outer.at[0, _R_FB1, 0:D_MODEL].set(p["fb1"][0])
    outer = outer.at[0, _R_FB2, 0:D_MODEL].set(p["fb2"][0])
    vec_slab = jnp.concatenate([per_layer, outer], axis=0)                   # (L+1, 8, 384)
    return w_slab, w2_slab, fw_slab, vec_slab


def reference(x, p):
    """Pure-JAX f32 reference with module-faithful ordering (post-LN, FFN then pool)."""
    scale = 1.0 / math.sqrt(HEAD_DIM)
    f32 = lambda a: a.astype(jnp.float32)
    out = []
    for b in range(B):
        h = x[b].astype(jnp.float32)                     # (S, D)
        for l in range(NUM_LAYERS):
            qkv = h @ f32(p["wqkv_t"][l]) + p["bqkv"][l]
            q, k, v = (qkv[:, 0:D_MODEL], qkv[:, D_MODEL:2 * D_MODEL],
                       qkv[:, 2 * D_MODEL:])
            heads = []
            for hh in range(N_HEADS):
                sl = slice(hh * HEAD_DIM, (hh + 1) * HEAD_DIM)
                s = (q[:, sl] @ k[:, sl].T) * scale
                heads.append(jax.nn.softmax(s, axis=-1) @ v[:, sl])
            ctx = jnp.concatenate(heads, axis=-1)
            attn = ctx @ f32(p["wo_t"][l]) + p["bo"][l]
            h = _layer_norm(h + attn, p["g1"][l], p["be1"][l])
            ff = (jnp.maximum(h @ f32(p["w1_t"][l]) + p["b1"][l], 0.0)
                  @ f32(p["w2_t"][l]) + p["b2"][l])
            h = _layer_norm(h + ff, p["g2"][l], p["be2"][l])
        y = (jnp.maximum(h @ f32(p["fw1_t"]) + p["fb1"], 0.0)
             @ f32(p["fw2_t"]) + p["fb2"])
        out.append(jnp.mean(y, axis=0))
    return jnp.stack(out)


if __name__ == "__main__":
    key = jax.random.PRNGKey(0)
    k_x, k_p = jax.random.split(key)
    x = jax.random.normal(k_x, (B, S, D_MODEL), jnp.float32)   # BERT last_hidden_state stand-in
    params = init_params(k_p)
    slabs = pack_params(params)

    out = jax.block_until_ready(single_para_encoder(x, *slabs))
    ref = reference(x, params)

    assert out.shape == (B, D_MODEL), out.shape
    assert bool(jnp.all(jnp.isfinite(out)))
    max_err = float(jnp.max(jnp.abs(out - ref)))
    assert max_err < 5e-2, max_err
    print("KERNEL_OK")
</pallas_src>

<mosaic_0001>
module attributes {stable_mosaic.version = 11 : i64} {
  func.func @single_para_encoder_kernel(%arg0: memref<2x8x128xf32, #tpu.memory_space<vmem>>, %arg1: memref<2x128x768xbf16, #tpu.memory_space<vmem>>, %arg2: memref<2x256x128xbf16, #tpu.memory_space<vmem>>, %arg3: memref<128x256xbf16, #tpu.memory_space<vmem>>, %arg4: memref<3x8x384xf32, #tpu.memory_space<vmem>>, %arg5: memref<2x128xf32, #tpu.memory_space<vmem>>) attributes {dimension_semantics = [], scalar_prefetch = 0 : i64, scratch_operands = 0 : i64, tpu.core_type = #tpu.core_type<tc>} {
    %c0 = arith.constant 0 : index
    %c0_0 = arith.constant 0 : index
    %c0_1 = arith.constant 0 : index
    %0 = vector.load %arg0[%c0, %c0_0, %c0_1] : memref<2x8x128xf32, #tpu.memory_space<vmem>>, vector<2x8x128xf32>
    %1 = vector.shape_cast %0 : vector<2x8x128xf32> to vector<16x128xf32>
    %2 = arith.truncf %1 : vector<16x128xf32> to vector<16x128xbf16>
    %c0_2 = arith.constant 0 : index
    %c0_3 = arith.constant 0 : index
    %c0_4 = arith.constant 0 : index
    %3 = vector.load %arg1[%c0_2, %c0_3, %c0_4] : memref<2x128x768xbf16, #tpu.memory_space<vmem>>, vector<1x128x384xbf16>
    %4 = vector.shape_cast %3 : vector<1x128x384xbf16> to vector<128x384xbf16>
    %cst = arith.constant dense<0.000000e+00> : vector<16x384xf32>
    %5 = tpu.matmul %2, %4, %cst {dimension_numbers = #tpu.dot_dimension_numbers<[1], [0], [0], [1], [0, 0, 1, 1], [], []>} : vector<16x128xbf16>, vector<128x384xbf16>, vector<16x384xf32> -> vector<16x384xf32>
    %c0_5 = arith.constant 0 : index
    %c0_6 = arith.constant 0 : index
    %c0_7 = arith.constant 0 : index
    %6 = vector.load %arg4[%c0_5, %c0_6, %c0_7] : memref<3x8x384xf32, #tpu.memory_space<vmem>>, vector<1x1x384xf32>
    %7 = vector.shape_cast %6 : vector<1x1x384xf32> to vector<1x384xf32>
    %8 = vector.broadcast %7 : vector<1x384xf32> to vector<16x384xf32>
    %9 = arith.addf %5, %8 : vector<16x384xf32>
    %10 = arith.truncf %9 : vector<16x384xf32> to vector<16x384xbf16>
    %11 = vector.shape_cast %10 : vector<16x384xbf16> to vector<2x8x384xbf16>
    %cst_8 = arith.constant 0.000000e+00 : f32
    %12 = vector.broadcast %cst_8 : f32 to vector<16x128xf32>
    %13 = vector.extract_strided_slice %11 {offsets = [0, 0, 0], sizes = [2, 8, 32], strides = [1, 1, 1]} : vector<2x8x384xbf16> to vector<2x8x32xbf16>
    %14 = vector.extract_strided_slice %11 {offsets = [0, 0, 128], sizes = [2, 8, 32], strides = [1, 1, 1]} : vector<2x8x384xbf16> to vector<2x8x32xbf16>
    %15 = vector.extract_strided_slice %11 {offsets = [0, 0, 256], sizes = [2, 8, 32], strides = [1, 1, 1]} : vector<2x8x384xbf16> to vector<2x8x32xbf16>
    "tpu.trace_start"() <{level = 10 : i32, message = "bqd,bkd->bqk"}> : () -> ()
    %cst_9 = arith.constant dense<0.000000e+00> : vector<2x8x8xf32>
    %16 = tpu.matmul %13, %14, %cst_9 {dimension_numbers = #tpu.dot_dimension_numbers<[2], [2], [1], [1], [0, 0, 0, 1, 1, 1], [0], [0]>} : vector<2x8x32xbf16>, vector<2x8x32xbf16>, vector<2x8x8xf32> -> vector<2x8x8xf32>
    "tpu.trace_stop"() : () -> ()
    %cst_10 = arith.constant 0.176776692 : f32
    %17 = vector.broadcast %cst_10 : f32 to vector<2x8x8xf32>
    %18 = arith.mulf %16, %17 : vector<2x8x8xf32>
    %cst_11 = arith.constant dense<0xFF800000> : vector<2x8xf32>
    %19 = vector.multi_reduction <maximumf>, %18, %cst_11 [2] : vector<2x8x8xf32> to vector<2x8xf32>
    %20 = vector.shape_cast %19 : vector<2x8xf32> to vector<2x8x1xf32>
    %21 = vector.broadcast %20 : vector<2x8x1xf32> to vector<2x8x8xf32>
    %22 = arith.subf %18, %21 : vector<2x8x8xf32>
    %23 = math.exp %22 : vector<2x8x8xf32>
    %cst_12 = arith.constant dense<0.000000e+00> : vector<2x8xf32>
    %24 = vector.multi_reduction <add>, %23, %cst_12 [2] : vector<2x8x8xf32> to vector<2x8xf32>
    %25 = vector.shape_cast %24 : vector<2x8xf32> to vector<2x8x1xf32>
    %26 = tpu.reciprocal %25 {approx = true} : vector<2x8x1xf32> -> vector<2x8x1xf32>
    %27 = vector.broadcast %26 : vector<2x8x1xf32> to vector<2x8x8xf32>
    %28 = arith.mulf %23, %27 : vector<2x8x8xf32>
    %29 = arith.truncf %28 : vector<2x8x8xf32> to vector<2x8x8xbf16>
    "tpu.trace_start"() <{level = 10 : i32, message = "bqk,bkd->bqd"}> : () -> ()
    %cst_13 = arith.constant dense<0.000000e+00> : vector<2x8x32xf32>
    %30 = tpu.matmul %29, %15, %cst_13 {dimension_numbers = #tpu.dot_dimension_numbers<[2], [1], [1], [2], [0, 0, 0, 1, 1, 2], [0], [0]>} : vector<2x8x8xbf16>, vector<2x8x32xbf16>, vector<2x8x32xf32> -> vector<2x8x32xf32>
    "tpu.trace_stop"() : () -> ()
    %31 = vector.shape_cast %30 : vector<2x8x32xf32> to vector<16x32xf32>
    %32 = arith.truncf %31 : vector<16x32xf32> to vector<16x32xbf16>
    %c0_14 = arith.constant 0 : index
    %c0_15 = arith.constant 0 : index
    %c384 = arith.constant 384 : index
    %33 = vector.load %arg1[%c0_14, %c0_15, %c384] : memref<2x128x768xbf16, #tpu.memory_space<vmem>>, vector<1x32x128xbf16>
    %34 = vector.shape_cast %33 : vector<1x32x128xbf16> to vector<32x128xbf16>
    %cst_16 = arith.constant dense<0.000000e+00> : vector<16x128xf32>
    %35 = tpu.matmul %32, %34, %cst_16 {dimension_numbers = #tpu.dot_dimension_numbers<[1], [0], [0], [1], [0, 0, 1, 1], [], []>} : vector<16x32xbf16>, vector<32x128xbf16>, vector<16x128xf32> -> vector<16x128xf32>
    %36 = arith.addf %12, %35 : vector<16x128xf32>
    %37 = vector.extract_strided_slice %11 {offsets = [0, 0, 32], sizes = [2, 8, 32], strides = [1, 1, 1]} : vector<2x8x384xbf16> to vector<2x8x32xbf16>
    %38 = vector.extract_strided_slice %11 {offsets = [0, 0, 160], sizes = [2, 8, 32], strides = [1, 1, 1]} : vector<2x8x384xbf16> to vector<2x8x32xbf16>
    %39 = vector.extract_strided_slice %11 {offsets = [0, 0, 288], sizes = [2, 8, 32], strides = [1, 1, 1]} : vector<2x8x384xbf16> to vector<2x8x32xbf16>
    "tpu.trace_start"() <{level = 10 : i32, message = "bqd,bkd->bqk"}> : () -> ()
    %cst_17 = arith.constant dense<0.000000e+00> : vector<2x8x8xf32>
    %40 = tpu.matmul %37, %38, %cst_17 {dimension_numbers = #tpu.dot_dimension_numbers<[2], [2], [1], [1], [0, 0, 0, 1, 1, 1], [0], [0]>} : vector<2x8x32xbf16>, vector<2x8x32xbf16>, vector<2x8x8xf32> -> vector<2x8x8xf32>
    "tpu.trace_stop"() : () -> ()
    %cst_18 = arith.constant 0.176776692 : f32
    %41 = vector.broadcast %cst_18 : f32 to vector<2x8x8xf32>
    %42 = arith.mulf %40, %41 : vector<2x8x8xf32>
    %cst_19 = arith.constant dense<0xFF800000> : vector<2x8xf32>
    %43 = vector.multi_reduction <maximumf>, %42, %cst_19 [2] : vector<2x8x8xf32> to vector<2x8xf32>
    %44 = vector.shape_cast %43 : vector<2x8xf32> to vector<2x8x1xf32>
    %45 = vector.broadcast %44 : vector<2x8x1xf32> to vector<2x8x8xf32>
    %46 = arith.subf %42, %45 : vector<2x8x8xf32>
    %47 = math.exp %46 : vector<2x8x8xf32>
    %cst_20 = arith.constant dense<0.000000e+00> : vector<2x8xf32>
    %48 = vector.multi_reduction <add>, %47, %cst_20 [2] : vector<2x8x8xf32> to vector<2x8xf32>
    %49 = vector.shape_cast %48 : vector<2x8xf32> to vector<2x8x1xf32>
    %50 = tpu.reciprocal %49 {approx = true} : vector<2x8x1xf32> -> vector<2x8x1xf32>
    %51 = vector.broadcast %50 : vector<2x8x1xf32> to vector<2x8x8xf32>
    %52 = arith.mulf %47, %51 : vector<2x8x8xf32>
    %53 = arith.truncf %52 : vector<2x8x8xf32> to vector<2x8x8xbf16>
    "tpu.trace_start"() <{level = 10 : i32, message = "bqk,bkd->bqd"}> : () -> ()
    %cst_21 = arith.constant dense<0.000000e+00> : vector<2x8x32xf32>
    %54 = tpu.matmul %53, %39, %cst_21 {dimension_numbers = #tpu.dot_dimension_numbers<[2], [1], [1], [2], [0, 0, 0, 1, 1, 2], [0], [0]>} : vector<2x8x8xbf16>, vector<2x8x32xbf16>, vector<2x8x32xf32> -> vector<2x8x32xf32>
    "tpu.trace_stop"() : () -> ()
    %55 = vector.shape_cast %54 : vector<2x8x32xf32> to vector<16x32xf32>
    %56 = arith.truncf %55 : vector<16x32xf32> to vector<16x32xbf16>
    %c0_22 = arith.constant 0 : index
    %c32 = arith.constant 32 : index
    %c384_23 = arith.constant 384 : index
    %57 = vector.load %arg1[%c0_22, %c32, %c384_23] : memref<2x128x768xbf16, #tpu.memory_space<vmem>>, vector<1x32x128xbf16>
    %58 = vector.shape_cast %57 : vector<1x32x128xbf16> to vector<32x128xbf16>
    %cst_24 = arith.constant dense<0.000000e+00> : vector<16x128xf32>
    %59 = tpu.matmul %56, %58, %cst_24 {dimension_numbers = #tpu.dot_dimension_numbers<[1], [0], [0], [1], [0, 0, 1, 1], [], []>} : vector<16x32xbf16>, vector<32x128xbf16>, vector<16x128xf32> -> vector<16x128xf32>
    %60 = arith.addf %36, %59 : vector<16x128xf32>
    %61 = vector.extract_strided_slice %11 {offsets = [0, 0, 64], sizes = [2, 8, 32], strides = [1, 1, 1]} : vector<2x8x384xbf16> to vector<2x8x32xbf16>
    %62 = vector.extract_strided_slice %11 {offsets = [0, 0, 192], sizes = [2, 8, 32], strides = [1, 1, 1]} : vector<2x8x384xbf16> to vector<2x8x32xbf16>
    %63 = vector.extract_strided_slice %11 {offsets = [0, 0, 320], sizes = [2, 8, 32], strides = [1, 1, 1]} : vector<2x8x384xbf16> to vector<2x8x32xbf16>
    "tpu.trace_start"() <{level = 10 : i32, message = "bqd,bkd->bqk"}> : () -> ()
    %cst_25 = arith.constant dense<0.000000e+00> : vector<2x8x8xf32>
    %64 = tpu.matmul %61, %62, %cst_25 {dimension_numbers = #tpu.dot_dimension_numbers<[2], [2], [1], [1], [0, 0, 0, 1, 1, 1], [0], [0]>} : vector<2x8x32xbf16>, vector<2x8x32xbf16>, vector<2x8x8xf32> -> vector<2x8x8xf32>
    "tpu.trace_stop"() : () -> ()
    %cst_26 = arith.constant 0.176776692 : f32
    %65 = vector.broadcast %cst_26 : f32 to vector<2x8x8xf32>
    %66 = arith.mulf %64, %65 : vector<2x8x8xf32>
    %cst_27 = arith.constant dense<0xFF800000> : vector<2x8xf32>
    %67 = vector.multi_reduction <maximumf>, %66, %cst_27 [2] : vector<2x8x8xf32> to vector<2x8xf32>
    %68 = vector.shape_cast %67 : vector<2x8xf32> to vector<2x8x1xf32>
    %69 = vector.broadcast %68 : vector<2x8x1xf32> to vector<2x8x8xf32>
    %70 = arith.subf %66, %69 : vector<2x8x8xf32>
    %71 = math.exp %70 : vector<2x8x8xf32>
    %cst_28 = arith.constant dense<0.000000e+00> : vector<2x8xf32>
    %72 = vector.multi_reduction <add>, %71, %cst_28 [2] : vector<2x8x8xf32> to vector<2x8xf32>
    %73 = vector.shape_cast %72 : vector<2x8xf32> to vector<2x8x1xf32>
    %74 = tpu.reciprocal %73 {approx = true} : vector<2x8x1xf32> -> vector<2x8x1xf32>
    %75 = vector.broadcast %74 : vector<2x8x1xf32> to vector<2x8x8xf32>
    %76 = arith.mulf %71, %75 : vector<2x8x8xf32>
    %77 = arith.truncf %76 : vector<2x8x8xf32> to vector<2x8x8xbf16>
    "tpu.trace_start"() <{level = 10 : i32, message = "bqk,bkd->bqd"}> : () -> ()
    %cst_29 = arith.constant dense<0.000000e+00> : vector<2x8x32xf32>
    %78 = tpu.matmul %77, %63, %cst_29 {dimension_numbers = #tpu.dot_dimension_numbers<[2], [1], [1], [2], [0, 0, 0, 1, 1, 2], [0], [0]>} : vector<2x8x8xbf16>, vector<2x8x32xbf16>, vector<2x8x32xf32> -> vector<2x8x32xf32>
    "tpu.trace_stop"() : () -> ()
    %79 = vector.shape_cast %78 : vector<2x8x32xf32> to vector<16x32xf32>
    %80 = arith.truncf %79 : vector<16x32xf32> to vector<16x32xbf16>
    %c0_30 = arith.constant 0 : index
    %c64 = arith.constant 64 : index
    %c384_31 = arith.constant 384 : index
    %81 = vector.load %arg1[%c0_30, %c64, %c384_31] : memref<2x128x768xbf16, #tpu.memory_space<vmem>>, vector<1x32x128xbf16>
    %82 = vector.shape_cast %81 : vector<1x32x128xbf16> to vector<32x128xbf16>
    %cst_32 = arith.constant dense<0.000000e+00> : vector<16x128xf32>
    %83 = tpu.matmul %80, %82, %cst_32 {dimension_numbers = #tpu.dot_dimension_numbers<[1], [0], [0], [1], [0, 0, 1, 1], [], []>} : vector<16x32xbf16>, vector<32x128xbf16>, vector<16x128xf32> -> vector<16x128xf32>
    %84 = arith.addf %60, %83 : vector<16x128xf32>
    %85 = vector.extract_strided_slice %11 {offsets = [0, 0, 96], sizes = [2, 8, 32], strides = [1, 1, 1]} : vector<2x8x384xbf16> to vector<2x8x32xbf16>
    %86 = vector.extract_strided_slice %11 {offsets = [0, 0, 224], sizes = [2, 8, 32], strides = [1, 1, 1]} : vector<2x8x384xbf16> to vector<2x8x32xbf16>
    %87 = vector.extract_strided_slice %11 {offsets = [0, 0, 352], sizes = [2, 8, 32], strides = [1, 1, 1]} : vector<2x8x384xbf16> to vector<2x8x32xbf16>
    "tpu.trace_start"() <{level = 10 : i32, message = "bqd,bkd->bqk"}> : () -> ()
    %cst_33 = arith.constant dense<0.000000e+00> : vector<2x8x8xf32>
    %88 = tpu.matmul %85, %86, %cst_33 {dimension_numbers = #tpu.dot_dimension_numbers<[2], [2], [1], [1], [0, 0, 0, 1, 1, 1], [0], [0]>} : vector<2x8x32xbf16>, vector<2x8x32xbf16>, vector<2x8x8xf32> -> vector<2x8x8xf32>
    "tpu.trace_stop"() : () -> ()
    %cst_34 = arith.constant 0.176776692 : f32
    %89 = vector.broadcast %cst_34 : f32 to vector<2x8x8xf32>
    %90 = arith.mulf %88, %89 : vector<2x8x8xf32>
    %cst_35 = arith.constant dense<0xFF800000> : vector<2x8xf32>
    %91 = vector.multi_reduction <maximumf>, %90, %cst_35 [2] : vector<2x8x8xf32> to vector<2x8xf32>
    %92 = vector.shape_cast %91 : vector<2x8xf32> to vector<2x8x1xf32>
    %93 = vector.broadcast %92 : vector<2x8x1xf32> to vector<2x8x8xf32>
    %94 = arith.subf %90, %93 : vector<2x8x8xf32>
    %95 = math.exp %94 : vector<2x8x8xf32>
    %cst_36 = arith.constant dense<0.000000e+00> : vector<2x8xf32>
    %96 = vector.multi_reduction <add>, %95, %cst_36 [2] : vector<2x8x8xf32> to vector<2x8xf32>
    %97 = vector.shape_cast %96 : vector<2x8xf32> to vector<2x8x1xf32>
    %98 = tpu.reciprocal %97 {approx = true} : vector<2x8x1xf32> -> vector<2x8x1xf32>
    %99 = vector.broadcast %98 : vector<2x8x1xf32> to vector<2x8x8xf32>
    %100 = arith.mulf %95, %99 : vector<2x8x8xf32>
    %101 = arith.truncf %100 : vector<2x8x8xf32> to vector<2x8x8xbf16>
    "tpu.trace_start"() <{level = 10 : i32, message = "bqk,bkd->bqd"}> : () -> ()
    %cst_37 = arith.constant dense<0.000000e+00> : vector<2x8x32xf32>
    %102 = tpu.matmul %101, %87, %cst_37 {dimension_numbers = #tpu.dot_dimension_numbers<[2], [1], [1], [2], [0, 0, 0, 1, 1, 2], [0], [0]>} : vector<2x8x8xbf16>, vector<2x8x32xbf16>, vector<2x8x32xf32> -> vector<2x8x32xf32>
    "tpu.trace_stop"() : () -> ()
    %103 = vector.shape_cast %102 : vector<2x8x32xf32> to vector<16x32xf32>
    %104 = arith.truncf %103 : vector<16x32xf32> to vector<16x32xbf16>
    %c0_38 = arith.constant 0 : index
    %c96 = arith.constant 96 : index
    %c384_39 = arith.constant 384 : index
    %105 = vector.load %arg1[%c0_38, %c96, %c384_39] : memref<2x128x768xbf16, #tpu.memory_space<vmem>>, vector<1x32x128xbf16>
    %106 = vector.shape_cast %105 : vector<1x32x128xbf16> to vector<32x128xbf16>
    %cst_40 = arith.constant dense<0.000000e+00> : vector<16x128xf32>
    %107 = tpu.matmul %104, %106, %cst_40 {dimension_numbers = #tpu.dot_dimension_numbers<[1], [0], [0], [1], [0, 0, 1, 1], [], []>} : vector<16x32xbf16>, vector<32x128xbf16>, vector<16x128xf32> -> vector<16x128xf32>
    %108 = arith.addf %84, %107 : vector<16x128xf32>
    %c0_41 = arith.constant 0 : index
    %c1 = arith.constant 1 : index
    %c0_42 = arith.constant 0 : index
    %109 = vector.load %arg4[%c0_41, %c1, %c0_42] : memref<3x8x384xf32, #tpu.memory_space<vmem>>, vector<1x1x128xf32>
    %110 = vector.shape_cast %109 : vector<1x1x128xf32> to vector<1x128xf32>
    %111 = vector.broadcast %110 : vector<1x128xf32> to vector<16x128xf32>
    %112 = arith.addf %108, %111 : vector<16x128xf32>
    %113 = arith.addf %1, %112 : vector<16x128xf32>
    %c0_43 = arith.constant 0 : index
    %c4 = arith.constant 4 : index
    %c0_44 = arith.constant 0 : index
    %114 = vector.load %arg4[%c0_43, %c4, %c0_44] : memref<3x8x384xf32, #tpu.memory_space<vmem>>, vector<1x1x128xf32>
    %115 = vector.shape_cast %114 : vector<1x1x128xf32> to vector<1x128xf32>
    %c0_45 = arith.constant 0 : index
    %c5 = arith.constant 5 : index
    %c0_46 = arith.constant 0 : index
    %116 = vector.load %arg4[%c0_45, %c5, %c0_46] : memref<3x8x384xf32, #tpu.memory_space<vmem>>, vector<1x1x128xf32>
    %117 = vector.shape_cast %116 : vector<1x1x128xf32> to vector<1x128xf32>
    %cst_47 = arith.constant dense<0.000000e+00> : vector<16xf32>
    %118 = vector.multi_reduction <add>, %113, %cst_47 [1] : vector<16x128xf32> to vector<16xf32>
    %119 = vector.shape_cast %118 : vector<16xf32> to vector<16x1xf32>
    %cst_48 = arith.constant 1.280000e+02 : f32
    %120 = vector.broadcast %cst_48 : f32 to vector<16x1xf32>
    %121 = arith.divf %119, %120 : vector<16x1xf32>
    %122 = vector.broadcast %121 : vector<16x1xf32> to vector<16x128xf32>
    %123 = arith.subf %113, %122 : vector<16x128xf32>
    %124 = arith.mulf %123, %123 : vector<16x128xf32>
    %cst_49 = arith.constant dense<0.000000e+00> : vector<16xf32>
    %125 = vector.multi_reduction <add>, %124, %cst_49 [1] : vector<16x128xf32> to vector<16xf32>
    %126 = vector.shape_cast %125 : vector<16xf32> to vector<16x1xf32>
    %cst_50 = arith.constant 1.280000e+02 : f32
    %127 = vector.broadcast %cst_50 : f32 to vector<16x1xf32>
    %128 = arith.divf %126, %127 : vector<16x1xf32>
    %129 = vector.broadcast %121 : vector<16x1xf32> to vector<16x128xf32>
    %130 = arith.subf %113, %129 : vector<16x128xf32>
    %cst_51 = arith.constant 9.99999974E-6 : f32
    %131 = vector.broadcast %cst_51 : f32 to vector<16x1xf32>
    %132 = arith.addf %128, %131 : vector<16x1xf32>
    %133 = math.rsqrt %132 : vector<16x1xf32>
    %134 = vector.broadcast %133 : vector<16x1xf32> to vector<16x128xf32>
    %135 = arith.mulf %130, %134 : vector<16x128xf32>
    %136 = vector.broadcast %115 : vector<1x128xf32> to vector<16x128xf32>
    %137 = arith.mulf %135, %136 : vector<16x128xf32>
    %138 = vector.broadcast %117 : vector<1x128xf32> to vector<16x128xf32>
    %139 = arith.addf %137, %138 : vector<16x128xf32>
    %140 = arith.truncf %139 : vector<16x128xf32> to vector<16x128xbf16>
    %c0_52 = arith.constant 0 : index
    %c0_53 = arith.constant 0 : index
    %c512 = arith.constant 512 : index
    %141 = vector.load %arg1[%c0_52, %c0_53, %c512] : memref<2x128x768xbf16, #tpu.memory_space<vmem>>, vector<1x128x256xbf16>
    %142 = vector.shape_cast %141 : vector<1x128x256xbf16> to vector<128x256xbf16>
    %cst_54 = arith.constant dense<0.000000e+00> : vector<16x256xf32>
    %143 = tpu.matmul %140, %142, %cst_54 {dimension_numbers = #tpu.dot_dimension_numbers<[1], [0], [0], [1], [0, 0, 1, 1], [], []>} : vector<16x128xbf16>, vector<128x256xbf16>, vector<16x256xf32> -> vector<16x256xf32>
    %c0_55 = arith.constant 0 : index
    %c2 = arith.constant 2 : index
    %c0_56 = arith.constant 0 : index
    %144 = vector.load %arg4[%c0_55, %c2, %c0_56] : memref<3x8x384xf32, #tpu.memory_space<vmem>>, vector<1x1x256xf32>
    %145 = vector.shape_cast %144 : vector<1x1x256xf32> to vector<1x256xf32>
    %146 = vector.broadcast %145 : vector<1x256xf32> to vector<16x256xf32>
    %147 = arith.addf %143, %146 : vector<16x256xf32>
    %cst_57 = arith.constant 0.000000e+00 : f32
    %148 = vector.broadcast %cst_57 : f32 to vector<16x256xf32>
    %149 = arith.maximumf %147, %148 : vector<16x256xf32>
    %150 = arith.truncf %149 : vector<16x256xf32> to vector<16x256xbf16>
    %c0_58 = arith.constant 0 : index
    %c0_59 = arith.constant 0 : index
    %c0_60 = arith.constant 0 : index
    %151 = vector.load %arg2[%c0_58, %c0_59, %c0_60] : memref<2x256x128xbf16, #tpu.memory_space<vmem>>, vector<1x256x128xbf16>
    %152 = vector.shape_cast %151 : vector<1x256x128xbf16> to vector<256x128xbf16>
    %cst_61 = arith.constant dense<0.000000e+00> : vector<16x128xf32>
    %153 = tpu.matmul %150, %152, %cst_61 {dimension_numbers = #tpu.dot_dimension_numbers<[1], [0], [0], [1], [0, 0, 1, 1], [], []>} : vector<16x256xbf16>, vector<256x128xbf16>, vector<16x128xf32> -> vector<16x128xf32>
    %c0_62 = arith.constant 0 : index
    %c3 = arith.constant 3 : index
    %c0_63 = arith.constant 0 : index
    %154 = vector.load %arg4[%c0_62, %c3, %c0_63] : memref<3x8x384xf32, #tpu.memory_space<vmem>>, vector<1x1x128xf32>
    %155 = vector.shape_cast %154 : vector<1x1x128xf32> to vector<1x128xf32>
    %156 = vector.broadcast %155 : vector<1x128xf32> to vector<16x128xf32>
    %157 = arith.addf %153, %156 : vector<16x128xf32>
    %158 = arith.addf %139, %157 : vector<16x128xf32>
    %c0_64 = arith.constant 0 : index
    %c6 = arith.constant 6 : index
    %c0_65 = arith.constant 0 : index
    %159 = vector.load %arg4[%c0_64, %c6, %c0_65] : memref<3x8x384xf32, #tpu.memory_space<vmem>>, vector<1x1x128xf32>
    %160 = vector.shape_cast %159 : vector<1x1x128xf32> to vector<1x128xf32>
    %c0_66 = arith.constant 0 : index
    %c7 = arith.constant 7 : index
    %c0_67 = arith.constant 0 : index
    %161 = vector.load %arg4[%c0_66, %c7, %c0_67] : memref<3x8x384xf32, #tpu.memory_space<vmem>>, vector<1x1x128xf32>
    %162 = vector.shape_cast %161 : vector<1x1x128xf32> to vector<1x128xf32>
    %cst_68 = arith.constant dense<0.000000e+00> : vector<16xf32>
    %163 = vector.multi_reduction <add>, %158, %cst_68 [1] : vector<16x128xf32> to vector<16xf32>
    %164 = vector.shape_cast %163 : vector<16xf32> to vector<16x1xf32>
    %cst_69 = arith.constant 1.280000e+02 : f32
    %165 = vector.broadcast %cst_69 : f32 to vector<16x1xf32>
    %166 = arith.divf %164, %165 : vector<16x1xf32>
    %167 = vector.broadcast %166 : vector<16x1xf32> to vector<16x128xf32>
    %168 = arith.subf %158, %167 : vector<16x128xf32>
    %169 = arith.mulf %168, %168 : vector<16x128xf32>
    %cst_70 = arith.constant dense<0.000000e+00> : vector<16xf32>
    %170 = vector.multi_reduction <add>, %169, %cst_70 [1] : vector<16x128xf32> to vector<16xf32>
    %171 = vector.shape_cast %170 : vector<16xf32> to vector<16x1xf32>
    %cst_71 = arith.constant 1.280000e+02 : f32
    %172 = vector.broadcast %cst_71 : f32 to vector<16x1xf32>
    %173 = arith.divf %171, %172 : vector<16x1xf32>
    %174 = vector.broadcast %166 : vector<16x1xf32> to vector<16x128xf32>
    %175 = arith.subf %158, %174 : vector<16x128xf32>
    %cst_72 = arith.constant 9.99999974E-6 : f32
    %176 = vector.broadcast %cst_72 : f32 to vector<16x1xf32>
    %177 = arith.addf %173, %176 : vector<16x1xf32>
    %178 = math.rsqrt %177 : vector<16x1xf32>
    %179 = vector.broadcast %178 : vector<16x1xf32> to vector<16x128xf32>
    %180 = arith.mulf %175, %179 : vector<16x128xf32>
    %181 = vector.broadcast %160 : vector<1x128xf32> to vector<16x128xf32>
    %182 = arith.mulf %180, %181 : vector<16x128xf32>
    %183 = vector.broadcast %162 : vector<1x128xf32> to vector<16x128xf32>
    %184 = arith.addf %182, %183 : vector<16x128xf32>
    %185 = arith.truncf %184 : vector<16x128xf32> to vector<16x128xbf16>
    %c1_73 = arith.constant 1 : index
    %c0_74 = arith.constant 0 : index
    %c0_75 = arith.constant 0 : index
    %186 = vector.load %arg1[%c1_73, %c0_74, %c0_75] : memref<2x128x768xbf16, #tpu.memory_space<vmem>>, vector<1x128x384xbf16>
    %187 = vector.shape_cast %186 : vector<1x128x384xbf16> to vector<128x384xbf16>
    %cst_76 = arith.constant dense<0.000000e+00> : vector<16x384xf32>
    %188 = tpu.matmul %185, %187, %cst_76 {dimension_numbers = #tpu.dot_dimension_numbers<[1], [0], [0], [1], [0, 0, 1, 1], [], []>} : vector<16x128xbf16>, vector<128x384xbf16>, vector<16x384xf32> -> vector<16x384xf32>
    %c1_77 = arith.constant 1 : index
    %c0_78 = arith.constant 0 : index
    %c0_79 = arith.constant 0 : index
    %189 = vector.load %arg4[%c1_77, %c0_78, %c0_79] : memref<3x8x384xf32, #tpu.memory_space<vmem>>, vector<1x1x384xf32>
    %190 = vector.shape_cast %189 : vector<1x1x384xf32> to vector<1x384xf32>
    %191 = vector.broadcast %190 : vector<1x384xf32> to vector<16x384xf32>
    %192 = arith.addf %188, %191 : vector<16x384xf32>
    %193 = arith.truncf %192 : vector<16x384xf32> to vector<16x384xbf16>
    %194 = vector.shape_cast %193 : vector<16x384xbf16> to vector<2x8x384xbf16>
    %cst_80 = arith.constant 0.000000e+00 : f32
    %195 = vector.broadcast %cst_80 : f32 to vector<16x128xf32>
    %196 = vector.extract_strided_slice %194 {offsets = [0, 0, 0], sizes = [2, 8, 32], strides = [1, 1, 1]} : vector<2x8x384xbf16> to vector<2x8x32xbf16>
    %197 = vector.extract_strided_slice %194 {offsets = [0, 0, 128], sizes = [2, 8, 32], strides = [1, 1, 1]} : vector<2x8x384xbf16> to vector<2x8x32xbf16>
    %198 = vector.extract_strided_slice %194 {offsets = [0, 0, 256], sizes = [2, 8, 32], strides = [1, 1, 1]} : vector<2x8x384xbf16> to vector<2x8x32xbf16>
    "tpu.trace_start"() <{level = 10 : i32, message = "bqd,bkd->bqk"}> : () -> ()
    %cst_81 = arith.constant dense<0.000000e+00> : vector<2x8x8xf32>
    %199 = tpu.matmul %196, %197, %cst_81 {dimension_numbers = #tpu.dot_dimension_numbers<[2], [2], [1], [1], [0, 0, 0, 1, 1, 1], [0], [0]>} : vector<2x8x32xbf16>, vector<2x8x32xbf16>, vector<2x8x8xf32> -> vector<2x8x8xf32>
    "tpu.trace_stop"() : () -> ()
    %cst_82 = arith.constant 0.176776692 : f32
    %200 = vector.broadcast %cst_82 : f32 to vector<2x8x8xf32>
    %201 = arith.mulf %199, %200 : vector<2x8x8xf32>
    %cst_83 = arith.constant dense<0xFF800000> : vector<2x8xf32>
    %202 = vector.multi_reduction <maximumf>, %201, %cst_83 [2] : vector<2x8x8xf32> to vector<2x8xf32>
    %203 = vector.shape_cast %202 : vector<2x8xf32> to vector<2x8x1xf32>
    %204 = vector.broadcast %203 : vector<2x8x1xf32> to vector<2x8x8xf32>
    %205 = arith.subf %201, %204 : vector<2x8x8xf32>
    %206 = math.exp %205 : vector<2x8x8xf32>
    %cst_84 = arith.constant dense<0.000000e+00> : vector<2x8xf32>
    %207 = vector.multi_reduction <add>, %206, %cst_84 [2] : vector<2x8x8xf32> to vector<2x8xf32>
    %208 = vector.shape_cast %207 : vector<2x8xf32> to vector<2x8x1xf32>
    %209 = tpu.reciprocal %208 {approx = true} : vector<2x8x1xf32> -> vector<2x8x1xf32>
    %210 = vector.broadcast %209 : vector<2x8x1xf32> to vector<2x8x8xf32>
    %211 = arith.mulf %206, %210 : vector<2x8x8xf32>
    %212 = arith.truncf %211 : vector<2x8x8xf32> to vector<2x8x8xbf16>
    "tpu.trace_start"() <{level = 10 : i32, message = "bqk,bkd->bqd"}> : () -> ()
    %cst_85 = arith.constant dense<0.000000e+00> : vector<2x8x32xf32>
    %213 = tpu.matmul %212, %198, %cst_85 {dimension_numbers = #tpu.dot_dimension_numbers<[2], [1], [1], [2], [0, 0, 0, 1, 1, 2], [0], [0]>} : vector<2x8x8xbf16>, vector<2x8x32xbf16>, vector<2x8x32xf32> -> vector<2x8x32xf32>
    "tpu.trace_stop"() : () -> ()
    %214 = vector.shape_cast %213 : vector<2x8x32xf32> to vector<16x32xf32>
    %215 = arith.truncf %214 : vector<16x32xf32> to vector<16x32xbf16>
    %c1_86 = arith.constant 1 : index
    %c0_87 = arith.constant 0 : index
    %c384_88 = arith.constant 384 : index
    %216 = vector.load %arg1[%c1_86, %c0_87, %c384_88] : memref<2x128x768xbf16, #tpu.memory_space<vmem>>, vector<1x32x128xbf16>
    %217 = vector.shape_cast %216 : vector<1x32x128xbf16> to vector<32x128xbf16>
    %cst_89 = arith.constant dense<0.000000e+00> : vector<16x128xf32>
    %218 = tpu.matmul %215, %217, %cst_89 {dimension_numbers = #tpu.dot_dimension_numbers<[1], [0], [0], [1], [0, 0, 1, 1], [], []>} : vector<16x32xbf16>, vector<32x128xbf16>, vector<16x128xf32> -> vector<16x128xf32>
    %219 = arith.addf %195, %218 : vector<16x128xf32>
    %220 = vector.extract_strided_slice %194 {offsets = [0, 0, 32], sizes = [2, 8, 32], strides = [1, 1, 1]} : vector<2x8x384xbf16> to vector<2x8x32xbf16>
    %221 = vector.extract_strided_slice %194 {offsets = [0, 0, 160], sizes = [2, 8, 32], strides = [1, 1, 1]} : vector<2x8x384xbf16> to vector<2x8x32xbf16>
    %222 = vector.extract_strided_slice %194 {offsets = [0, 0, 288], sizes = [2, 8, 32], strides = [1, 1, 1]} : vector<2x8x384xbf16> to vector<2x8x32xbf16>
    "tpu.trace_start"() <{level = 10 : i32, message = "bqd,bkd->bqk"}> : () -> ()
    %cst_90 = arith.constant dense<0.000000e+00> : vector<2x8x8xf32>
    %223 = tpu.matmul %220, %221, %cst_90 {dimension_numbers = #tpu.dot_dimension_numbers<[2], [2], [1], [1], [0, 0, 0, 1, 1, 1], [0], [0]>} : vector<2x8x32xbf16>, vector<2x8x32xbf16>, vector<2x8x8xf32> -> vector<2x8x8xf32>
    "tpu.trace_stop"() : () -> ()
    %cst_91 = arith.constant 0.176776692 : f32
    %224 = vector.broadcast %cst_91 : f32 to vector<2x8x8xf32>
    %225 = arith.mulf %223, %224 : vector<2x8x8xf32>
    %cst_92 = arith.constant dense<0xFF800000> : vector<2x8xf32>
    %226 = vector.multi_reduction <maximumf>, %225, %cst_92 [2] : vector<2x8x8xf32> to vector<2x8xf32>
    %227 = vector.shape_cast %226 : vector<2x8xf32> to vector<2x8x1xf32>
    %228 = vector.broadcast %227 : vector<2x8x1xf32> to vector<2x8x8xf32>
    %229 = arith.subf %225, %228 : vector<2x8x8xf32>
    %230 = math.exp %229 : vector<2x8x8xf32>
    %cst_93 = arith.constant dense<0.000000e+00> : vector<2x8xf32>
    %231 = vector.multi_reduction <add>, %230, %cst_93 [2] : vector<2x8x8xf32> to vector<2x8xf32>
    %232 = vector.shape_cast %231 : vector<2x8xf32> to vector<2x8x1xf32>
    %233 = tpu.reciprocal %232 {approx = true} : vector<2x8x1xf32> -> vector<2x8x1xf32>
    %234 = vector.broadcast %233 : vector<2x8x1xf32> to vector<2x8x8xf32>
    %235 = arith.mulf %230, %234 : vector<2x8x8xf32>
    %236 = arith.truncf %235 : vector<2x8x8xf32> to vector<2x8x8xbf16>
    "tpu.trace_start"() <{level = 10 : i32, message = "bqk,bkd->bqd"}> : () -> ()
    %cst_94 = arith.constant dense<0.000000e+00> : vector<2x8x32xf32>
    %237 = tpu.matmul %236, %222, %cst_94 {dimension_numbers = #tpu.dot_dimension_numbers<[2], [1], [1], [2], [0, 0, 0, 1, 1, 2], [0], [0]>} : vector<2x8x8xbf16>, vector<2x8x32xbf16>, vector<2x8x32xf32> -> vector<2x8x32xf32>
    "tpu.trace_stop"() : () -> ()
    %238 = vector.shape_cast %237 : vector<2x8x32xf32> to vector<16x32xf32>
    %239 = arith.truncf %238 : vector<16x32xf32> to vector<16x32xbf16>
    %c1_95 = arith.constant 1 : index
    %c32_96 = arith.constant 32 : index
    %c384_97 = arith.constant 384 : index
    %240 = vector.load %arg1[%c1_95, %c32_96, %c384_97] : memref<2x128x768xbf16, #tpu.memory_space<vmem>>, vector<1x32x128xbf16>
    %241 = vector.shape_cast %240 : vector<1x32x128xbf16> to vector<32x128xbf16>
    %cst_98 = arith.constant dense<0.000000e+00> : vector<16x128xf32>
    %242 = tpu.matmul %239, %241, %cst_98 {dimension_numbers = #tpu.dot_dimension_numbers<[1], [0], [0], [1], [0, 0, 1, 1], [], []>} : vector<16x32xbf16>, vector<32x128xbf16>, vector<16x128xf32> -> vector<16x128xf32>
    %243 = arith.addf %219, %242 : vector<16x128xf32>
    %244 = vector.extract_strided_slice %194 {offsets = [0, 0, 64], sizes = [2, 8, 32], strides = [1, 1, 1]} : vector<2x8x384xbf16> to vector<2x8x32xbf16>
    %245 = vector.extract_strided_slice %194 {offsets = [0, 0, 192], sizes = [2, 8, 32], strides = [1, 1, 1]} : vector<2x8x384xbf16> to vector<2x8x32xbf16>
    %246 = vector.extract_strided_slice %194 {offsets = [0, 0, 320], sizes = [2, 8, 32], strides = [1, 1, 1]} : vector<2x8x384xbf16> to vector<2x8x32xbf16>
    "tpu.trace_start"() <{level = 10 : i32, message = "bqd,bkd->bqk"}> : () -> ()
    %cst_99 = arith.constant dense<0.000000e+00> : vector<2x8x8xf32>
    %247 = tpu.matmul %244, %245, %cst_99 {dimension_numbers = #tpu.dot_dimension_numbers<[2], [2], [1], [1], [0, 0, 0, 1, 1, 1], [0], [0]>} : vector<2x8x32xbf16>, vector<2x8x32xbf16>, vector<2x8x8xf32> -> vector<2x8x8xf32>
    "tpu.trace_stop"() : () -> ()
    %cst_100 = arith.constant 0.176776692 : f32
    %248 = vector.broadcast %cst_100 : f32 to vector<2x8x8xf32>
    %249 = arith.mulf %247, %248 : vector<2x8x8xf32>
    %cst_101 = arith.constant dense<0xFF800000> : vector<2x8xf32>
    %250 = vector.multi_reduction <maximumf>, %249, %cst_101 [2] : vector<2x8x8xf32> to vector<2x8xf32>
    %251 = vector.shape_cast %250 : vector<2x8xf32> to vector<2x8x1xf32>
    %252 = vector.broadcast %251 : vector<2x8x1xf32> to vector<2x8x8xf32>
    %253 = arith.subf %249, %252 : vector<2x8x8xf32>
    %254 = math.exp %253 : vector<2x8x8xf32>
    %cst_102 = arith.constant dense<0.000000e+00> : vector<2x8xf32>
    %255 = vector.multi_reduction <add>, %254, %cst_102 [2] : vector<2x8x8xf32> to vector<2x8xf32>
    %256 = vector.shape_cast %255 : vector<2x8xf32> to vector<2x8x1xf32>
    %257 = tpu.reciprocal %256 {approx = true} : vector<2x8x1xf32> -> vector<2x8x1xf32>
    %258 = vector.broadcast %257 : vector<2x8x1xf32> to vector<2x8x8xf32>
    %259 = arith.mulf %254, %258 : vector<2x8x8xf32>
    %260 = arith.truncf %259 : vector<2x8x8xf32> to vector<2x8x8xbf16>
    "tpu.trace_start"() <{level = 10 : i32, message = "bqk,bkd->bqd"}> : () -> ()
    %cst_103 = arith.constant dense<0.000000e+00> : vector<2x8x32xf32>
    %261 = tpu.matmul %260, %246, %cst_103 {dimension_numbers = #tpu.dot_dimension_numbers<[2], [1], [1], [2], [0, 0, 0, 1, 1, 2], [0], [0]>} : vector<2x8x8xbf16>, vector<2x8x32xbf16>, vector<2x8x32xf32> -> vector<2x8x32xf32>
    "tpu.trace_stop"() : () -> ()
    %262 = vector.shape_cast %261 : vector<2x8x32xf32> to vector<16x32xf32>
    %263 = arith.truncf %262 : vector<16x32xf32> to vector<16x32xbf16>
    %c1_104 = arith.constant 1 : index
    %c64_105 = arith.constant 64 : index
    %c384_106 = arith.constant 384 : index
    %264 = vector.load %arg1[%c1_104, %c64_105, %c384_106] : memref<2x128x768xbf16, #tpu.memory_space<vmem>>, vector<1x32x128xbf16>
    %265 = vector.shape_cast %264 : vector<1x32x128xbf16> to vector<32x128xbf16>
    %cst_107 = arith.constant dense<0.000000e+00> : vector<16x128xf32>
    %266 = tpu.matmul %263, %265, %cst_107 {dimension_numbers = #tpu.dot_dimension_numbers<[1], [0], [0], [1], [0, 0, 1, 1], [], []>} : vector<16x32xbf16>, vector<32x128xbf16>, vector<16x128xf32> -> vector<16x128xf32>
    %267 = arith.addf %243, %266 : vector<16x128xf32>
    %268 = vector.extract_strided_slice %194 {offsets = [0, 0, 96], sizes = [2, 8, 32], strides = [1, 1, 1]} : vector<2x8x384xbf16> to vector<2x8x32xbf16>
    %269 = vector.extract_strided_slice %194 {offsets = [0, 0, 224], sizes = [2, 8, 32], strides = [1, 1, 1]} : vector<2x8x384xbf16> to vector<2x8x32xbf16>
    %270 = vector.extract_strided_slice %194 {offsets = [0, 0, 352], sizes = [2, 8, 32], strides = [1, 1, 1]} : vector<2x8x384xbf16> to vector<2x8x32xbf16>
    "tpu.trace_start"() <{level = 10 : i32, message = "bqd,bkd->bqk"}> : () -> ()
    %cst_108 = arith.constant dense<0.000000e+00> : vector<2x8x8xf32>
    %271 = tpu.matmul %268, %269, %cst_108 {dimension_numbers = #tpu.dot_dimension_numbers<[2], [2], [1], [1], [0, 0, 0, 1, 1, 1], [0], [0]>} : vector<2x8x32xbf16>, vector<2x8x32xbf16>, vector<2x8x8xf32> -> vector<2x8x8xf32>
    "tpu.trace_stop"() : () -> ()
    %cst_109 = arith.constant 0.176776692 : f32
    %272 = vector.broadcast %cst_109 : f32 to vector<2x8x8xf32>
    %273 = arith.mulf %271, %272 : vector<2x8x8xf32>
    %cst_110 = arith.constant dense<0xFF800000> : vector<2x8xf32>
    %274 = vector.multi_reduction <maximumf>, %273, %cst_110 [2] : vector<2x8x8xf32> to vector<2x8xf32>
    %275 = vector.shape_cast %274 : vector<2x8xf32> to vector<2x8x1xf32>
    %276 = vector.broadcast %275 : vector<2x8x1xf32> to vector<2x8x8xf32>
    %277 = arith.subf %273, %276 : vector<2x8x8xf32>
    %278 = math.exp %277 : vector<2x8x8xf32>
    %cst_111 = arith.constant dense<0.000000e+00> : vector<2x8xf32>
    %279 = vector.multi_reduction <add>, %278, %cst_111 [2] : vector<2x8x8xf32> to vector<2x8xf32>
    %280 = vector.shape_cast %279 : vector<2x8xf32> to vector<2x8x1xf32>
    %281 = tpu.reciprocal %280 {approx = true} : vector<2x8x1xf32> -> vector<2x8x1xf32>
    %282 = vector.broadcast %281 : vector<2x8x1xf32> to vector<2x8x8xf32>
    %283 = arith.mulf %278, %282 : vector<2x8x8xf32>
    %284 = arith.truncf %283 : vector<2x8x8xf32> to vector<2x8x8xbf16>
    "tpu.trace_start"() <{level = 10 : i32, message = "bqk,bkd->bqd"}> : () -> ()
    %cst_112 = arith.constant dense<0.000000e+00> : vector<2x8x32xf32>
    %285 = tpu.matmul %284, %270, %cst_112 {dimension_numbers = #tpu.dot_dimension_numbers<[2], [1], [1], [2], [0, 0, 0, 1, 1, 2], [0], [0]>} : vector<2x8x8xbf16>, vector<2x8x32xbf16>, vector<2x8x32xf32> -> vector<2x8x32xf32>
    "tpu.trace_stop"() : () -> ()
    %286 = vector.shape_cast %285 : vector<2x8x32xf32> to vector<16x32xf32>
    %287 = arith.truncf %286 : vector<16x32xf32> to vector<16x32xbf16>
    %c1_113 = arith.constant 1 : index
    %c96_114 = arith.constant 96 : index
    %c384_115 = arith.constant 384 : index
    %288 = vector.load %arg1[%c1_113, %c96_114, %c384_115] : memref<2x128x768xbf16, #tpu.memory_space<vmem>>, vector<1x32x128xbf16>
    %289 = vector.shape_cast %288 : vector<1x32x128xbf16> to vector<32x128xbf16>
    %cst_116 = arith.constant dense<0.000000e+00> : vector<16x128xf32>
    %290 = tpu.matmul %287, %289, %cst_116 {dimension_numbers = #tpu.dot_dimension_numbers<[1], [0], [0], [1], [0, 0, 1, 1], [], []>} : vector<16x32xbf16>, vector<32x128xbf16>, vector<16x128xf32> -> vector<16x128xf32>
    %291 = arith.addf %267, %290 : vector<16x128xf32>
    %c1_117 = arith.constant 1 : index
    %c1_118 = arith.constant 1 : index
    %c0_119 = arith.constant 0 : index
    %292 = vector.load %arg4[%c1_117, %c1_118, %c0_119] : memref<3x8x384xf32, #tpu.memory_space<vmem>>, vector<1x1x128xf32>
    %293 = vector.shape_cast %292 : vector<1x1x128xf32> to vector<1x128xf32>
    %294 = vector.broadcast %293 : vector<1x128xf32> to vector<16x128xf32>
    %295 = arith.addf %291, %294 : vector<16x128xf32>
    %296 = arith.addf %184, %295 : vector<16x128xf32>
    %c1_120 = arith.constant 1 : index
    %c4_121 = arith.constant 4 : index
    %c0_122 = arith.constant 0 : index
    %297 = vector.load %arg4[%c1_120, %c4_121, %c0_122] : memref<3x8x384xf32, #tpu.memory_space<vmem>>, vector<1x1x128xf32>
    %298 = vector.shape_cast %297 : vector<1x1x128xf32> to vector<1x128xf32>
    %c1_123 = arith.constant 1 : index
    %c5_124 = arith.constant 5 : index
    %c0_125 = arith.constant 0 : index
    %299 = vector.load %arg4[%c1_123, %c5_124, %c0_125] : memref<3x8x384xf32, #tpu.memory_space<vmem>>, vector<1x1x128xf32>
    %300 = vector.shape_cast %299 : vector<1x1x128xf32> to vector<1x128xf32>
    %cst_126 = arith.constant dense<0.000000e+00> : vector<16xf32>
    %301 = vector.multi_reduction <add>, %296, %cst_126 [1] : vector<16x128xf32> to vector<16xf32>
    %302 = vector.shape_cast %301 : vector<16xf32> to vector<16x1xf32>
    %cst_127 = arith.constant 1.280000e+02 : f32
    %303 = vector.broadcast %cst_127 : f32 to vector<16x1xf32>
    %304 = arith.divf %302, %303 : vector<16x1xf32>
    %305 = vector.broadcast %304 : vector<16x1xf32> to vector<16x128xf32>
    %306 = arith.subf %296, %305 : vector<16x128xf32>
    %307 = arith.mulf %306, %306 : vector<16x128xf32>
    %cst_128 = arith.constant dense<0.000000e+00> : vector<16xf32>
    %308 = vector.multi_reduction <add>, %307, %cst_128 [1] : vector<16x128xf32> to vector<16xf32>
    %309 = vector.shape_cast %308 : vector<16xf32> to vector<16x1xf32>
    %cst_129 = arith.constant 1.280000e+02 : f32
    %310 = vector.broadcast %cst_129 : f32 to vector<16x1xf32>
    %311 = arith.divf %309, %310 : vector<16x1xf32>
    %312 = vector.broadcast %304 : vector<16x1xf32> to vector<16x128xf32>
    %313 = arith.subf %296, %312 : vector<16x128xf32>
    %cst_130 = arith.constant 9.99999974E-6 : f32
    %314 = vector.broadcast %cst_130 : f32 to vector<16x1xf32>
    %315 = arith.addf %311, %314 : vector<16x1xf32>
    %316 = math.rsqrt %315 : vector<16x1xf32>
    %317 = vector.broadcast %316 : vector<16x1xf32> to vector<16x128xf32>
    %318 = arith.mulf %313, %317 : vector<16x128xf32>
    %319 = vector.broadcast %298 : vector<1x128xf32> to vector<16x128xf32>
    %320 = arith.mulf %318, %319 : vector<16x128xf32>
    %321 = vector.broadcast %300 : vector<1x128xf32> to vector<16x128xf32>
    %322 = arith.addf %320, %321 : vector<16x128xf32>
    %323 = arith.truncf %322 : vector<16x128xf32> to vector<16x128xbf16>
    %c1_131 = arith.constant 1 : index
    %c0_132 = arith.constant 0 : index
    %c512_133 = arith.constant 512 : index
    %324 = vector.load %arg1[%c1_131, %c0_132, %c512_133] : memref<2x128x768xbf16, #tpu.memory_space<vmem>>, vector<1x128x256xbf16>
    %325 = vector.shape_cast %324 : vector<1x128x256xbf16> to vector<128x256xbf16>
    %cst_134 = arith.constant dense<0.000000e+00> : vector<16x256xf32>
    %326 = tpu.matmul %323, %325, %cst_134 {dimension_numbers = #tpu.dot_dimension_numbers<[1], [0], [0], [1], [0, 0, 1, 1], [], []>} : vector<16x128xbf16>, vector<128x256xbf16>, vector<16x256xf32> -> vector<16x256xf32>
    %c1_135 = arith.constant 1 : index
    %c2_136 = arith.constant 2 : index
    %c0_137 = arith.constant 0 : index
    %327 = vector.load %arg4[%c1_135, %c2_136, %c0_137] : memref<3x8x384xf32, #tpu.memory_space<vmem>>, vector<1x1x256xf32>
    %328 = vector.shape_cast %327 : vector<1x1x256xf32> to vector<1x256xf32>
    %329 = vector.broadcast %328 : vector<1x256xf32> to vector<16x256xf32>
    %330 = arith.addf %326, %329 : vector<16x256xf32>
    %cst_138 = arith.constant 0.000000e+00 : f32
    %331 = vector.broadcast %cst_138 : f32 to vector<16x256xf32>
    %332 = arith.maximumf %330, %331 : vector<16x256xf32>
    %333 = arith.truncf %332 : vector<16x256xf32> to vector<16x256xbf16>
    %c1_139 = arith.constant 1 : index
    %c0_140 = arith.constant 0 : index
    %c0_141 = arith.constant 0 : index
    %334 = vector.load %arg2[%c1_139, %c0_140, %c0_141] : memref<2x256x128xbf16, #tpu.memory_space<vmem>>, vector<1x256x128xbf16>
    %335 = vector.shape_cast %334 : vector<1x256x128xbf16> to vector<256x128xbf16>
    %cst_142 = arith.constant dense<0.000000e+00> : vector<16x128xf32>
    %336 = tpu.matmul %333, %335, %cst_142 {dimension_numbers = #tpu.dot_dimension_numbers<[1], [0], [0], [1], [0, 0, 1, 1], [], []>} : vector<16x256xbf16>, vector<256x128xbf16>, vector<16x128xf32> -> vector<16x128xf32>
    %c1_143 = arith.constant 1 : index
    %c3_144 = arith.constant 3 : index
    %c0_145 = arith.constant 0 : index
    %337 = vector.load %arg4[%c1_143, %c3_144, %c0_145] : memref<3x8x384xf32, #tpu.memory_space<vmem>>, vector<1x1x128xf32>
    %338 = vector.shape_cast %337 : vector<1x1x128xf32> to vector<1x128xf32>
    %339 = vector.broadcast %338 : vector<1x128xf32> to vector<16x128xf32>
    %340 = arith.addf %336, %339 : vector<16x128xf32>
    %341 = arith.addf %322, %340 : vector<16x128xf32>
    %c1_146 = arith.constant 1 : index
    %c6_147 = arith.constant 6 : index
    %c0_148 = arith.constant 0 : index
    %342 = vector.load %arg4[%c1_146, %c6_147, %c0_148] : memref<3x8x384xf32, #tpu.memory_space<vmem>>, vector<1x1x128xf32>
    %343 = vector.shape_cast %342 : vector<1x1x128xf32> to vector<1x128xf32>
    %c1_149 = arith.constant 1 : index
    %c7_150 = arith.constant 7 : index
    %c0_151 = arith.constant 0 : index
    %344 = vector.load %arg4[%c1_149, %c7_150, %c0_151] : memref<3x8x384xf32, #tpu.memory_space<vmem>>, vector<1x1x128xf32>
    %345 = vector.shape_cast %344 : vector<1x1x128xf32> to vector<1x128xf32>
    %cst_152 = arith.constant dense<0.000000e+00> : vector<16xf32>
    %346 = vector.multi_reduction <add>, %341, %cst_152 [1] : vector<16x128xf32> to vector<16xf32>
    %347 = vector.shape_cast %346 : vector<16xf32> to vector<16x1xf32>
    %cst_153 = arith.constant 1.280000e+02 : f32
    %348 = vector.broadcast %cst_153 : f32 to vector<16x1xf32>
    %349 = arith.divf %347, %348 : vector<16x1xf32>
    %350 = vector.broadcast %349 : vector<16x1xf32> to vector<16x128xf32>
    %351 = arith.subf %341, %350 : vector<16x128xf32>
    %352 = arith.mulf %351, %351 : vector<16x128xf32>
    %cst_154 = arith.constant dense<0.000000e+00> : vector<16xf32>
    %353 = vector.multi_reduction <add>, %352, %cst_154 [1] : vector<16x128xf32> to vector<16xf32>
    %354 = vector.shape_cast %353 : vector<16xf32> to vector<16x1xf32>
    %cst_155 = arith.constant 1.280000e+02 : f32
    %355 = vector.broadcast %cst_155 : f32 to vector<16x1xf32>
    %356 = arith.divf %354, %355 : vector<16x1xf32>
    %357 = vector.broadcast %349 : vector<16x1xf32> to vector<16x128xf32>
    %358 = arith.subf %341, %357 : vector<16x128xf32>
    %cst_156 = arith.constant 9.99999974E-6 : f32
    %359 = vector.broadcast %cst_156 : f32 to vector<16x1xf32>
    %360 = arith.addf %356, %359 : vector<16x1xf32>
    %361 = math.rsqrt %360 : vector<16x1xf32>
    %362 = vector.broadcast %361 : vector<16x1xf32> to vector<16x128xf32>
    %363 = arith.mulf %358, %362 : vector<16x128xf32>
    %364 = vector.broadcast %343 : vector<1x128xf32> to vector<16x128xf32>
    %365 = arith.mulf %363, %364 : vector<16x128xf32>
    %366 = vector.broadcast %345 : vector<1x128xf32> to vector<16x128xf32>
    %367 = arith.addf %365, %366 : vector<16x128xf32>
    %368 = arith.truncf %367 : vector<16x128xf32> to vector<16x128xbf16>
    %c0_157 = arith.constant 0 : index
    %c0_158 = arith.constant 0 : index
    %369 = vector.load %arg3[%c0_157, %c0_158] : memref<128x256xbf16, #tpu.memory_space<vmem>>, vector<128x128xbf16>
    %cst_159 = arith.constant dense<0.000000e+00> : vector<16x128xf32>
    %370 = tpu.matmul %368, %369, %cst_159 {dimension_numbers = #tpu.dot_dimension_numbers<[1], [0], [0], [1], [0, 0, 1, 1], [], []>} : vector<16x128xbf16>, vector<128x128xbf16>, vector<16x128xf32> -> vector<16x128xf32>
    %c2_160 = arith.constant 2 : index
    %c0_161 = arith.constant 0 : index
    %c0_162 = arith.constant 0 : index
    %371 = vector.load %arg4[%c2_160, %c0_161, %c0_162] : memref<3x8x384xf32, #tpu.memory_space<vmem>>, vector<1x1x128xf32>
    %372 = vector.shape_cast %371 : vector<1x1x128xf32> to vector<1x128xf32>
    %373 = vector.broadcast %372 : vector<1x128xf32> to vector<16x128xf32>
    %374 = arith.addf %370, %373 : vector<16x128xf32>
    %cst_163 = arith.constant 0.000000e+00 : f32
    %375 = vector.broadcast %cst_163 : f32 to vector<16x128xf32>
    %376 = arith.maximumf %374, %375 : vector<16x128xf32>
    %377 = vector.shape_cast %376 : vector<16x128xf32> to vector<2x8x128xf32>
    %cst_164 = arith.constant dense<0.000000e+00> : vector<2x128xf32>
    %378 = vector.multi_reduction <add>, %377, %cst_164 [1] : vector<2x8x128xf32> to vector<2x128xf32>
    %cst_165 = arith.constant 8.000000e+00 : f32
    %379 = vector.broadcast %cst_165 : f32 to vector<2x128xf32>
    %380 = arith.divf %378, %379 : vector<2x128xf32>
    %381 = arith.truncf %380 : vector<2x128xf32> to vector<2x128xbf16>
    %c0_166 = arith.constant 0 : index
    %c128 = arith.constant 128 : index
    %382 = vector.load %arg3[%c0_166, %c128] : memref<128x256xbf16, #tpu.memory_space<vmem>>, vector<128x128xbf16>
    %cst_167 = arith.constant dense<0.000000e+00> : vector<2x128xf32>
    %383 = tpu.matmul %381, %382, %cst_167 {dimension_numbers = #tpu.dot_dimension_numbers<[1], [0], [0], [1], [0, 0, 1, 1], [], []>} : vector<2x128xbf16>, vector<128x128xbf16>, vector<2x128xf32> -> vector<2x128xf32>
    %c2_168 = arith.constant 2 : index
    %c1_169 = arith.constant 1 : index
    %c0_170 = arith.constant 0 : index
    %384 = vector.load %arg4[%c2_168, %c1_169, %c0_170] : memref<3x8x384xf32, #tpu.memory_space<vmem>>, vector<1x1x128xf32>
    %385 = vector.shape_cast %384 : vector<1x1x128xf32> to vector<1x128xf32>
    %386 = vector.broadcast %385 : vector<1x128xf32> to vector<2x128xf32>
    %387 = arith.addf %383, %386 : vector<2x128xf32>
    %c0_171 = arith.constant 0 : index
    %c0_172 = arith.constant 0 : index
    %388 = vector.load %arg5[%c0_171, %c0_172] : memref<2x128xf32, #tpu.memory_space<vmem>>, vector<2x128xf32>
    tpu.vector_store %arg5[%c0_171, %c0_172], %387 {strides = array<i32>} : memref<2x128xf32, #tpu.memory_space<vmem>>, vector<2x128xf32>,
    return
  }
}

</mosaic_0001>

<bundles_post_ra>
// kernel: single_para_encoder.1
= control target key start
LH: loop header
LB: loop body
LE: loop exit
PB: predicated region body
PF: predicated region fallthrough
CT: control target
= control target key end

     0   :  { %10 = vsyncpa [#allocation3], 0  ;;  %s5698_s0 = inlined_call_operand.hbm [shape: f32[2,8,128], index: 0, kind: input, shape index: {}]   ;;  %s5699_s1 = inlined_call_operand.hbm [shape: bf16[2,128,768], index: 1, kind: input, shape index: {}]   ;;  %s5700_s2 = inlined_call_operand.hbm [shape: bf16[2,256,128], index: 2, kind: input, shape index: {}]   ;;  %s5701_s3 = inlined_call_operand.hbm [shape: bf16[128,256], index: 3, kind: input, shape index: {}]   ;;  %s5702_s4 = inlined_call_operand.hbm [shape: f32[3,8,384], index: 4, kind: input, shape index: {}]   ;;  %s5703_s5 = inlined_call_operand.hbm [shape: f32[2,128], index: 5, kind: output, shape index: {}]  }
   0x1   :  { %11 = vsyncpa [#allocation6], 0 }
   0x2   :  { %12 = vsyncpa [#allocation9], 0 }
   0x3   :  { %13 = vsyncpa [#allocation4], 0  ;;  %s5093_s18 = smov [#allocation5]   ;;  %s4953_s22 = scalar_lea.hbm %s5699_s1, 12288 }
   0x4   :  { %s31_s19 = sshll.u32 %s5093_s18, 4  ;;  %p4954_p0 = scmp.ne.s32.totalorder %s5699_s1, %s4953_s22  ;;  %s32_s19 = int_to_ptr.vmem [resolvable:$true] %s31_s19 }
   0x5   :  { %p4957_p1 = scmp.lt.u32.totalorder %s4953_s22, %s5699_s1 }
   0x7   :  { %p4959_p2 = pnand %p4957_p1, %p4954_p0 }
   0x9   :  { %4962 = shalt.err (!%p4959_p2)
}
   0xa   :  { %s4963_s27 = scalar_lea.vmem %s32_s19, 12288  ;;  %p4968_p4 = scmp.lt.s32.totalorder %s32_s19, %s32_s19 }
   0xb   :  { %p4964_p3 = scmp.ne.s32.totalorder %s32_s19, %s4963_s27  ;;  %p4969_p5 = scmp.lt.s32.totalorder %s4963_s27, %s4963_s27 }
   0xd   :  { %p4970_p6 = por %p4969_p5, %p4968_p4 }
   0xf   :  { %p4971_p7 = pnand %p4970_p6, %p4964_p3 }
  0x11   :  { %4974 = shalt.err (!%p4971_p7)
}
  0x12   :  { %s5094_s28 = smov 384   ;;  %s5095_s29 = smov 24  }
  0x13   :  { %37 = dma.hbm_to_vmem [thread:$0]  %s5699_s1, 12288, %s32_s19, [#allocation6], %s5094_s28, %s5094_s28, %s5095_s29  }
  0x14   :  { %s5096_s7 = smov [#allocation8]   ;;  %s5097_s9 = smov [#allocation2]  }
  0x15   :  { %s55_s8 = sshll.u32 %s5096_s7, 4  ;;  %s19_s10 = sshll.u32 %s5097_s9, 4  ;;  %s56_s8 = int_to_ptr.vmem [resolvable:$true] %s55_s8  ;;  %s20_s10 = int_to_ptr.vmem [resolvable:$true] %s19_s10 }
  0x16   :  { %s4975_s13 = scalar_lea.hbm %s5701_s3, 2048 }
  0x17   :  { %p4976_p8 = scmp.ne.s32.totalorder %s5701_s3, %s4975_s13  ;;  %p4979_p9 = scmp.lt.u32.totalorder %s4975_s13, %s5701_s3 }
  0x19   :  { %p4981_p10 = pnand %p4979_p9, %p4976_p8 }
  0x1b   :  { %4984 = shalt.err (!%p4981_p10)
}
  0x1c   :  { %s4985_s1 = scalar_lea.vmem %s56_s8, 2048  ;;  %p4990_p12 = scmp.lt.s32.totalorder %s56_s8, %s56_s8 }
  0x1d   :  { %p4986_p11 = scmp.ne.s32.totalorder %s56_s8, %s4985_s1  ;;  %p4991_p13 = scmp.lt.s32.totalorder %s4985_s1, %s4985_s1 }
  0x1f   :  { %p4992_p0 = por %p4991_p13, %p4990_p12 }
  0x21   :  { %p4993_p1 = pnand %p4992_p0, %p4986_p11 }
  0x23   :  { %4996 = shalt.err (!%p4993_p1)
}
  0x24   :  { %s5098_s18 = smov 128   ;;  %s5099_s19 = smov 8  }
  0x25   :  { %61 = dma.hbm_to_vmem [thread:$0]  %s5701_s3, 2048, %s56_s8, [#allocation9], %s5098_s18, %s5098_s18, %s5099_s19  }
  0x26   :  { %s4997_s24 = scalar_lea.hbm %s5698_s0, 256 }
  0x27   :  { %p4998_p2 = scmp.ne.s32.totalorder %s5698_s0, %s4997_s24  ;;  %p5001_p3 = scmp.lt.u32.totalorder %s4997_s24, %s5698_s0 }
  0x29   :  { %p5003_p4 = pnand %p5001_p3, %p4998_p2 }
  0x2b   :  { %5006 = shalt.err (!%p5003_p4)
}
  0x2c   :  { %s5007_s6 = scalar_lea.vmem %s20_s10, 256  ;;  %p5012_p6 = scmp.lt.s32.totalorder %s20_s10, %s20_s10 }
  0x2d   :  { %p5008_p5 = scmp.ne.s32.totalorder %s20_s10, %s5007_s6  ;;  %p5013_p7 = scmp.lt.s32.totalorder %s5007_s6, %s5007_s6 }
  0x2f   :  { %p5014_p8 = por %p5013_p7, %p5012_p6 }
  0x31   :  { %p5015_p9 = pnand %p5014_p8, %p5008_p5 }
  0x33   :  { %5018 = shalt.err (!%p5015_p9)
}
  0x34   :  { %25 = dma.hbm_to_vmem [thread:$0]  %s5698_s0, 256, %s20_s10, [#allocation3], %s5098_s18, %s5098_s18, %s5099_s19  }
  0x35   :  { %s5100_s8 = smov [#allocation7]   ;;  %s5019_s13 = scalar_lea.hbm %s5700_s2, 4096 }
  0x36   :  { %s43_s9 = sshll.u32 %s5100_s8, 4  ;;  %p5020_p10 = scmp.ne.s32.totalorder %s5700_s2, %s5019_s13  ;;  %s44_s9 = int_to_ptr.vmem [resolvable:$true] %s43_s9 }
  0x37   :  { %p5023_p11 = scmp.lt.u32.totalorder %s5019_s13, %s5700_s2 }
  0x39   :  { %p5025_p12 = pnand %p5023_p11, %p5020_p10 }
  0x3b   :  { %5028 = shalt.err (!%p5025_p12)
}
  0x3c   :  { %s5029_s1 = scalar_lea.vmem %s44_s9, 4096  ;;  %p5034_p0 = scmp.lt.s32.totalorder %s44_s9, %s44_s9 }
  0x3d   :  { %p5030_p13 = scmp.ne.s32.totalorder %s44_s9, %s5029_s1  ;;  %p5035_p1 = scmp.lt.s32.totalorder %s5029_s1, %s5029_s1 }
  0x3f   :  { %p5036_p2 = por %p5035_p1, %p5034_p0 }
  0x41   :  { %p5037_p3 = pnand %p5036_p2, %p5030_p13 }
  0x43   :  { %5040 = shalt.err (!%p5037_p3)
}
  0x44   :  { %s5101_s0 = smov 64   ;;  %s5102_s10 = smov 4  }
  0x45   :  { %49 = dma.hbm_to_vmem [thread:$0]  %s5700_s2, 4096, %s44_s9, [#allocation6], %s5101_s0, %s5101_s0, %s5102_s10  }
  0x46   :  { %s5103_s20 = smov [#allocation10]   ;;  %s5041_s24 = scalar_lea.hbm %s5702_s4, 1152 }
  0x47   :  { %s67_s21 = sshll.u32 %s5103_s20, 4  ;;  %p5042_p4 = scmp.ne.s32.totalorder %s5702_s4, %s5041_s24  ;;  %s68_s21 = int_to_ptr.vmem [resolvable:$true] %s67_s21 }
  0x48   :  { %p5045_p5 = scmp.lt.u32.totalorder %s5041_s24, %s5702_s4 }
  0x4a   :  { %p5047_p6 = pnand %p5045_p5, %p5042_p4 }
  0x4c   :  { %5050 = shalt.err (!%p5047_p6)
}
  0x4d   :  { %s5051_s6 = scalar_lea.vmem %s68_s21, 1152  ;;  %p5056_p8 = scmp.lt.s32.totalorder %s68_s21, %s68_s21 }
  0x4e   :  { %p5052_p7 = scmp.ne.s32.totalorder %s68_s21, %s5051_s6  ;;  %p5057_p9 = scmp.lt.s32.totalorder %s5051_s6, %s5051_s6 }
  0x50   :  { %p5058_p10 = por %p5057_p9, %p5056_p8 }
  0x52   :  { %p5059_p11 = pnand %p5058_p10, %p5052_p7 }
  0x54   :  { %5062 = shalt.err (!%p5059_p11)
}
  0x55   :  { %73 = dma.hbm_to_vmem [thread:$0]  %s5702_s4, 1152, %s68_s21, [#allocation9], %s5094_s28, %s5094_s28, %s5095_s29  }
  0x56   :  { %5085 = dma.done.wait [#allocation3], 256  }
  0x57   :  { %5086 = vsyncadd [#allocation3], 4294967040 }
  0x58   :  { %5087 = dma.done.wait [#allocation6], 16384  }
  0x59   :  { %5088 = vsyncadd [#allocation6], 4294950912 }
  0x5a   :  { %5089 = dma.done.wait [#allocation9], 3200  }
  0x5b   :  { %5090 = vsyncadd [#allocation9], 4294964096  ;;  %v5104_v0 = vmov 0   ;;  %v5105_v1 = vmov 0.0   ;;  %v4695_v2 = vld [vmem:[#allocation5 + $0x4] ss:$24 sps:$4 sm:$0xff]   ;;  %v127_v29 = vlaneseq }
  0x5c   :  { %302 = vmatprep.mubr.bf16.mxu0 %v5104_v0  ;;  %4342 = vmatprep.subr.bf16.mxu1 %v5105_v1  ;;  %v4697_v3 = vld [vmem:[#allocation5] ss:$24 sps:$4 sm:$0xff]   ;;  %v4698_v4 = vld [vmem:[#allocation5 + $0x34] ss:$24 sps:$4 sm:$0xff]   ;;  %v4700_v5 = vld [vmem:[#allocation5 + $0x30] ss:$24 sps:$4 sm:$0xff]  }
  0x5d   :  { %270 = vmatprep.subr.bf16.mxu0 %v4695_v2  ;;  %v4701_v6 = vld [vmem:[#allocation5 + $0x64] ss:$24 sps:$4 sm:$0xff]   ;;  %v4703_v7 = vld [vmem:[#allocation5 + $0x60] ss:$24 sps:$4 sm:$0xff]   ;;  %v4704_v8 = vld [vmem:[#allocation5 + $0x94] ss:$24 sps:$4 sm:$0xff]  }
  0x5e   :  { %271 = vmatpush1.bf16.msra.mxu0 %v4697_v3  ;;  %v4706_v9 = vld [vmem:[#allocation5 + $0x90] ss:$24 sps:$4 sm:$0xff]   ;;  %v4707_v10 = vld [vmem:[#allocation5 + $0xc4] ss:$24 sps:$4 sm:$0xff]   ;;  %v4709_v13 = vld [vmem:[#allocation5 + $0xc0] ss:$24 sps:$4 sm:$0xff]  }
  0x5f   :  { %272 = vmatprep.subr.bf16.mxu0 %v4698_v4  ;;  %v4719_v11 = vld [vmem:[#allocation5 + $0x8] ss:$24 sps:$4 sm:$0xff]   ;;  %v4720_v12 = vld [vmem:[#allocation5 + $0x38] ss:$24 sps:$4 sm:$0xff]   ;;  %v4710_v14 = vld [vmem:[#allocation5 + $0xf4] ss:$24 sps:$4 sm:$0xff]  }
  0x60   :  { %4343 = vmatpush3.bf16.msra.mxu1 %v4719_v11  ;;  %v4712_v15 = vld [vmem:[#allocation5 + $0xf0] ss:$24 sps:$4 sm:$0xff]   ;;  %v4713_v16 = vld [vmem:[#allocation5 + $0x124] ss:$24 sps:$4 sm:$0xff]   ;;  %v4715_v19 = vld [vmem:[#allocation5 + $0x120] ss:$24 sps:$4 sm:$0xff]  }
  0x61   :  { %4344 = vmatprep.subr.bf16.mxu1 %v5105_v1  ;;  %v4721_v17 = vld [vmem:[#allocation5 + $0x68] ss:$24 sps:$4 sm:$0xff]   ;;  %v4722_v18 = vld [vmem:[#allocation5 + $0x98] ss:$24 sps:$4 sm:$0xff]   ;;  %v4716_v20 = vld [vmem:[#allocation5 + $0x154] ss:$24 sps:$4 sm:$0xff]  }
  0x62   :  { %273 = vmatpush1.bf16.msra.mxu0 %v4700_v5  ;;  %v4723_v21 = vld [vmem:[#allocation5 + $0xc8] ss:$24 sps:$4 sm:$0xff]   ;;  %v90_v23 = vld [vmem:[#allocation2] sm:$0xff]  ;;  %v91_v24 = vld [vmem:[#allocation2 + $0x8] sm:$0xff]  ;;  %vm5106_vm0 = vmmov 0   ;;  %v5225_v30 = vshrl.u32 %v127_v29, 7 }
  0x63   :  { %274 = vmatprep.subr.bf16.mxu0 %v4701_v6  ;;  %v4718_v22 = vld [vmem:[#allocation5 + $0x150] ss:$24 sps:$4 sm:$0xff]   ;;  %v92_v26 = vpack.c.bf16 %v91_v24, %v90_v23  ;;  %4358 = vmatprep.mubr.msk.bf16.mxu1 %vm5106_vm0, %v5105_v1  ;;  %vm371_vm1 = vcmask 261120   ;;  %s5107_s4 = smov 96   ;;  %vm495_vm2 = vcmask 1043456   ;;  %vm467_vm3 = vcmask 64512  }
  0x64   :  { %4345 = vmatpush3.bf16.msra.mxu1 %v4720_v12  ;;  %v4724_v25 = vld [vmem:[#allocation5 + $0xf8] ss:$24 sps:$4 sm:$0xff]   ;;  %v4725_v27 = vld [vmem:[#allocation5 + $0x128] ss:$24 sps:$4 sm:$0xff]   ;;  %v5228_v31 = vsub.s32 0, %v5225_v30  ;;  %v5231_v33 = vsub.s32 1, %v5225_v30 }
  0x65   :  { %4346 = vmatprep.subr.bf16.mxu1 %v5105_v1  ;;  %v4726_v28 = vld [vmem:[#allocation5 + $0x158] ss:$24 sps:$4 sm:$0xff]   ;;  %v137_v50 = vsub.s32 2, %v5225_v30  ;;  %s5108_s28 = smov 32   ;;  %vm3855_vm4 = vcmask 1041409   ;;  %s5109_s29 = smov [#allocation11]  }
  0x66   :  { %275 = vmatpush1.bf16.msra.mxu0 %v4703_v7  ;;  %v125_v32 = vld [vmem:[#allocation10] ss:$8 sm:$0x7]  ;;  %s3954_s7 = sshll.u32 %s5109_s29, 4  ;;  %s3955_s7 = int_to_ptr.vmem [resolvable:$true] %s3954_s7 }
  0x67   :  { %276 = vmatprep.subr.bf16.mxu0 %v4704_v8  ;;  %v130_v34 = vrot.slane %v125_v32, %v5228_v31  ;;  %v134_v35 = vrot.slane %v125_v32, %v5231_v33  ;;  %v138_v51 = vrot.slane %v125_v32, %v137_v50  ;;  %s5063_s8 = scalar_lea.vmem %s3955_s7, 32  ;;  %p5068_p13 = scmp.lt.s32.totalorder %s3955_s7, %s3955_s7 }
  0x68   :  { %4347 = vmatpush3.bf16.msra.mxu1 %v4721_v17  ;;  %p5064_p12 = scmp.ne.s32.totalorder %s3955_s7, %s5063_s8  ;;  %p5069_p0 = scmp.lt.s32.totalorder %s5063_s8, %s5063_s8 }
  0x69   :  { %4348 = vmatprep.subr.bf16.mxu1 %v5105_v1 }
  0x6a   :  { %277 = vmatpush1.bf16.msra.mxu0 %v4706_v9  ;;  %p5070_p1 = por %p5069_p0, %p5068_p13 }
  0x6b   :  { %278 = vmatprep.subr.bf16.mxu0 %v4707_v10 }
  0x6c   :  { %4349 = vmatpush3.bf16.msra.mxu1 %v4722_v18  ;;  %p5071_p2 = pnand %p5070_p1, %p5064_p12 }
  0x6d   :  { %4350 = vmatprep.subr.bf16.mxu1 %v5105_v1 }
  0x6e   :  { %279 = vmatpush1.bf16.msra.mxu0 %v4709_v13 }
  0x6f   :  { %280 = vmatprep.subr.bf16.mxu0 %v4710_v14 }
  0x70   :  { %4351 = vmatpush3.bf16.msra.mxu1 %v4723_v21 }
  0x71   :  { %4352 = vmatprep.subr.bf16.mxu1 %v5105_v1 }
  0x72   :  { %281 = vmatpush1.bf16.msra.mxu0 %v4712_v15 }
  0x73   :  { %282 = vmatprep.subr.bf16.mxu0 %v4713_v16 }
  0x74   :  { %4353 = vmatpush3.bf16.msra.mxu1 %v4724_v25 }
  0x75   :  { %4354 = vmatprep.subr.bf16.mxu1 %v5105_v1 }
  0x76   :  { %283 = vmatpush1.bf16.msra.mxu0 %v4715_v19 }
  0x77   :  { %284 = vmatprep.subr.bf16.mxu0 %v4716_v20 }
  0x78   :  { %4355 = vmatpush3.bf16.msra.mxu1 %v4725_v27 }
  0x79   :  { %4356 = vmatprep.subr.bf16.mxu1 %v5105_v1 }
  0x7a   :  { %285 = vmatpush1.bf16.msra.mxu0 %v4718_v22 }
  0x7b   :  { %4362 = vmatprep.subr.bf16.mxu0 %v5105_v1 }
  0x7c   :  { %4357 = vmatpush3.bf16.msra.mxu1 %v4726_v28 }
  0x7d   :  { %303 = vmatmul.mubr.bf16.vlgmr.msra.gmra.mrb[0].mxu0 %v92_v26  ;;  %4368 = vmatprep.subr.bf16.mxu1 %v5105_v1 }
  0x7e   :  { %4364 = vmatprep.mubr.msk.bf16.mxu0 %vm5106_vm0, %v5105_v1 }
  0x7f   :  { %4359 = vmatmul.mubr.bf16.vlgmr.msra.gmra.mrb[0].mxu1 %v92_v26 }
  0x80   :  { %4370 = vmatprep.mubr.msk.bf16.mxu1 %vm5106_vm0, %v5105_v1 }
 0x150   :  { %v304_v36 = vpop.f32.mrb[0].mxu0 }
 0x151   :  { %v5235_v37 = vadd.f32 %v304_v36, %v130_v34  ;;  %v306_v38 = vpop.f32.mrb[1].mxu0 }
 0x152   :  { %v307_v39 = vadd.f32 %v306_v38, %v134_v35  ;;  %v308_v40 = vpop.f32.mrb[2].mxu0  ;;  %v347_v52 = vpop.f32.mrb[0].mxu1 }
 0x153   :  { %v5237_v41 = vadd.f32 %v308_v40, %v130_v34  ;;  %v310_v42 = vpop.f32.mrb[3].mxu0  ;;  %v348_v53 = vadd.f32 %v347_v52, %v138_v51  ;;  %v4360_v54 = vpop.f32.mrb[1].mxu1  ;;  %v5282_v22 = vpack.c.bf16 %v5235_v37, %v5235_v37 }
 0x154   :  { %v5240_v43 = vpack.c.bf16 %v307_v39, %v5235_v37  ;;  %v311_v44 = vadd.f32 %v310_v42, %v134_v35  ;;  %v350_v55 = vpop.f32.mrb[2].mxu1 }
 0x155   :  { %v351_v56 = vadd.f32 %v350_v55, %v138_v51  ;;  %v4361_v57 = vpop.f32.mrb[3].mxu1  ;;  %v5264_v58 = vpack.c.bf16 %v348_v53, %v348_v53  ;;  %v5288_v23 = vpack.c.bf16 %v5237_v41, %v5237_v41 }
 0x156   :  { %v5243_v45 = vpack.c.bf16 %v311_v44, %v5237_v41  ;;  %v370_v46 = vrot.slane %v5240_v43, 4 }
 0x157   :  { %v5266_v59 = vpack.c.bf16 %v351_v56, %v351_v56  ;;  %v497_v60 = vsel %vm495_vm2, %v5264_v58, 0 }
 0x158   :  { %642 = vrot.lane.b32.xlu1 %v5243_v45, %s5107_s4  ;;  %v376_v47 = vsel %vm371_vm1, %v370_v46, 0  ;;  %v418_v48 = vrot.slane %v5243_v45, 4 }
 0x159   :  { %4363 = vmatpush3.bf16.xpose.msra.mxu0 %v376_v47  ;;  %v543_v61 = vsel %vm495_vm2, %v5266_v59, 0 }
 0x15a   :  { %v423_v49 = vsel %vm371_vm1, %v418_v48, 0  ;;  %4374 = vmatprep.subr.bf16.mxu0 %v5105_v1 }
 0x15b   :  { %4369 = vmatpush3.bf16.xpose.msra.mxu1 %v423_v49 }
 0x15c   :  { %4380 = vmatprep.subr.bf16.mxu1 %v5105_v1 }
 0x160   :  { %4365 = vmatmul.mubr.msk.bf16.vlgmr.msra.gmra.mrb[4].mxu0 %vm371_vm1, %v5240_v43 }
 0x161   :  { %4376 = vmatprep.mubr.msk.bf16.mxu0 %vm5106_vm0, %v5105_v1  ;;  %4375 = vmatpush3.bf16.msra.mxu0 %v497_v60 }
 0x162   :  { %4371 = vmatmul.mubr.msk.bf16.vlgmr.msra.gmra.mrb[4].mxu1 %vm371_vm1, %v5243_v45  ;;  %4386 = vmatprep.subr.bf16.mxu0 %v5105_v1 }
 0x163   :  { %4382 = vmatprep.mubr.msk.bf16.mxu1 %vm5106_vm0, %v5105_v1  ;;  %4381 = vmatpush3.bf16.msra.mxu1 %v543_v61 }
 0x164   :  { %4392 = vmatprep.subr.bf16.mxu1 %v5105_v1 }
 0x1ca   :  { %v643_v24 = vpop.permute.xlu1 %642 }
 0x1cb   :  { %v644_v36 = vrot.slane %v643_v24, 4 }
 0x1cd   :  { %v652_v40 = vsel %vm371_vm1, %v644_v36, 0  ;;  %v4730_v36 = vld [vmem:[#allocation5 + $0x9c] ss:$24 sps:$4 sm:$0xff]  }
 0x233   :  { %v412_v62 = vpop.f32.mrb[4].mxu0 }
 0x234   :  { %v465_v63 = vmul.f32 0.17677669, %v412_v62  ;;  %v4366_v2 = vpop.f32.mrb[5].mxu0 }
 0x235   :  { %v415_v3 = vpop.f32.mrb[6].mxu0  ;;  %v459_v4 = vpop.f32.mrb[4].mxu1 }
 0x236   :  { %v466_v5 = vmul.f32 0.17677669, %v459_v4  ;;  %v4367_v6 = vpop.f32.mrb[7].mxu0  ;;  %v4372_v7 = vpop.f32.mrb[5].mxu1  ;;  %v468_v8 = vsel %vm467_vm3, %v465_v63, -inf }
 0x237   :  { %v462_v9 = vpop.f32.mrb[6].mxu1  ;;  %469 = vmax.xlane.f32.xlu0 %v468_v8 }
 0x238   :  { %v4373_v10 = vpop.f32.mrb[7].mxu1  ;;  %v471_v11 = vsel %vm467_vm3, %v466_v5, -inf }
 0x23b   :  { %472 = vmax.xlane.f32.xlu0 %v471_v11 }
 0x251   :  { %590 = vrot.lane.b32.xlu0 %v5240_v43, %s5107_s4 }
 0x2c4   :  { %v470_v12 = vpop.xlane.xlu0 %469 }
 0x2c5   :  { %v474_v13 = vsub.f32 %v465_v63, %v470_v12 }
 0x2c7   :  { %v476_v14 = vmul.f32 1.442695, %v474_v13 }
 0x2c8   :  { %v473_v15 = vpop.xlane.xlu0 %472 }
 0x2c9   :  { %4871 = vpow2.f32 %v476_v14  ;;  %v475_v16 = vsub.f32 %v466_v5, %v473_v15 }
 0x2cb   :  { %v478_v17 = vmul.f32 1.442695, %v475_v16 }
 0x2cc   :  { %v591_v27 = vpop.permute.xlu0 %590 }
 0x2cd   :  { %4873 = vpow2.f32 %v478_v17  ;;  %v592_v29 = vrot.slane %v591_v27, 4  ;;  %v4729_v27 = vld [vmem:[#allocation5 + $0x6c] ss:$24 sps:$4 sm:$0xff]  }
 0x2cf   :  { %v600_v37 = vsel %vm371_vm1, %v592_v29, 0 }
 0x2d3   :  { %v4872_v18 = vpop.eup %4871 }
 0x2d4   :  { %v480_v19 = vsel %vm467_vm3, %v4872_v18, 0.0 }
 0x2d5   :  { %481 = vadd.xlane.f32.xlu1 %v480_v19 }
 0x2d7   :  { %v4874_v20 = vpop.eup %4873 }
 0x2d8   :  { %v483_v21 = vsel %vm467_vm3, %v4874_v20, 0.0 }
 0x2d9   :  { %484 = vadd.xlane.f32.xlu1 %v483_v21 }
 0x2ea   :  { %594 = vrot.lane.b32.xlu1 %v5282_v22, %s5107_s4 }
 0x2ee   :  { %646 = vrot.lane.b32.xlu1 %v5288_v23, %s5107_s4 }
 0x362   :  { %v482_v25 = vpop.xlane.xlu1 %481 }
 0x363   :  { %4875 = vrcp.f32 %v482_v25 }
 0x366   :  { %v485_v26 = vpop.xlane.xlu1 %484 }
 0x367   :  { %4877 = vrcp.f32 %v485_v26 }
 0x36a   :  { %v595_v41 = vpop.permute.xlu1 %594 }
 0x36d   :  { %v4876_v28 = vpop.eup %4875 }
 0x36e   :  { %v488_v32 = vmul.f32 %v4876_v28, %v4872_v18  ;;  %v647_v42 = vpop.permute.xlu1 %646 }
 0x370   :  { %v490_v34 = vpack.c.bf16 %v488_v32, %v488_v32 }
 0x371   :  { %v4878_v35 = vpop.eup %4877 }
 0x372   :  { %v489_v38 = vmul.f32 %v4878_v35, %v4874_v20  ;;  %4377 = vmatmul.mubr.msk.bf16.vlgmr.msra.gmra.mrb[8].mxu0 %vm467_vm3, %v490_v34  ;;  %v4727_v34 = vld [vmem:[#allocation5 + $0xc] ss:$24 sps:$4 sm:$0xff]  }
 0x373   :  { %4387 = vmatpush3.bf16.xpose.msra.mxu0 %v600_v37  ;;  %4388 = vmatprep.mubr.msk.bf16.mxu0 %vm5106_vm0, %v5105_v1 }
 0x374   :  { %v491_v39 = vpack.c.bf16 %v489_v38, %v489_v38  ;;  %4398 = vmatprep.subr.bf16.mxu0 %v5105_v1  ;;  %v4728_v38 = vld [vmem:[#allocation5 + $0x3c] ss:$24 sps:$4 sm:$0xff]  }
 0x376   :  { %4383 = vmatmul.mubr.msk.bf16.vlgmr.msra.gmra.mrb[8].mxu1 %vm467_vm3, %v491_v39 }
 0x377   :  { %4393 = vmatpush3.bf16.xpose.msra.mxu1 %v652_v40  ;;  %4394 = vmatprep.mubr.msk.bf16.mxu1 %vm5106_vm0, %v5105_v1 }
 0x378   :  { %4404 = vmatprep.subr.bf16.mxu1 %v5105_v1 }
 0x37a   :  { %4389 = vmatmul.mubr.msk.bf16.vlgmr.msra.gmra.mrb[12].mxu0 %vm371_vm1, %v595_v41 }
 0x37b   :  { %4400 = vmatprep.mubr.msk.bf16.mxu0 %vm5106_vm0, %v5105_v1 }
 0x37e   :  { %4395 = vmatmul.mubr.msk.bf16.vlgmr.msra.gmra.mrb[12].mxu1 %vm371_vm1, %v647_v42 }
 0x37f   :  { %4406 = vmatprep.mubr.msk.bf16.mxu1 %vm5106_vm0, %v5105_v1 }
 0x445   :  { %v5308_v44 = vpop.f32.mrb[8].mxu0 }
 0x446   :  { %v4378_v46 = vpop.f32.mrb[9].mxu0 }
 0x447   :  { %v536_v47 = vpop.f32.mrb[10].mxu0 }
 0x448   :  { %v4379_v48 = vpop.f32.mrb[11].mxu0 }
 0x449   :  { %v5310_v49 = vpop.f32.mrb[8].mxu1 }
 0x44a   :  { %v585_v51 = vpack.c.bf16 %v5310_v49, %v5308_v44  ;;  %v4384_v52 = vpop.f32.mrb[9].mxu1 }
 0x44b   :  { %v582_v53 = vpop.f32.mrb[10].mxu1 }
 0x44c   :  { %v4385_v54 = vpop.f32.mrb[11].mxu1 }
 0x44d   :  { %v636_v55 = vpop.f32.mrb[12].mxu0 }
 0x44e   :  { %v694_v56 = vmul.f32 0.17677669, %v636_v55  ;;  %v4390_v57 = vpop.f32.mrb[13].mxu0 }
 0x44f   :  { %v639_v60 = vpop.f32.mrb[14].mxu0 }
 0x450   :  { %v4391_v61 = vpop.f32.mrb[15].mxu0  ;;  %v696_v62 = vsel %vm467_vm3, %v694_v56, -inf }
 0x451   :  { %v688_v63 = vpop.f32.mrb[12].mxu1  ;;  %697 = vmax.xlane.f32.xlu0 %v696_v62 }
 0x452   :  { %v695_v2 = vmul.f32 0.17677669, %v688_v63  ;;  %v4396_v3 = vpop.f32.mrb[13].mxu1 }
 0x453   :  { %v691_v4 = vpop.f32.mrb[14].mxu1 }
 0x454   :  { %v4397_v5 = vpop.f32.mrb[15].mxu1  ;;  %v699_v6 = vsel %vm467_vm3, %v695_v2, -inf }
 0x455   :  { %700 = vmax.xlane.f32.xlu1 %v699_v6 }
 0x466   :  { %768 = vrot.lane.b32.xlu1 %v5266_v59, %s5107_s4 }
 0x46a   :  { %933 = vrot.lane.b32.xlu1 %v5240_v43, %s5101_s0 }
 0x46e   :  { %984 = vrot.lane.b32.xlu1 %v5243_v45, %s5101_s0 }
 0x472   :  { %987 = vrot.lane.b32.xlu1 %v5288_v23, %s5101_s0 }
 0x4de   :  { %v698_v7 = vpop.xlane.xlu0 %697 }
 0x4df   :  { %v702_v8 = vsub.f32 %v694_v56, %v698_v7 }
 0x4e1   :  { %v704_v9 = vmul.f32 1.442695, %v702_v8 }
 0x4e2   :  { %v701_v10 = vpop.xlane.xlu1 %700 }
 0x4e3   :  { %4879 = vpow2.f32 %v704_v9  ;;  %v703_v11 = vsub.f32 %v695_v2, %v701_v10 }
 0x4e5   :  { %v706_v12 = vmul.f32 1.442695, %v703_v11 }
 0x4e6   :  { %v769_v13 = vpop.permute.xlu1 %768 }
 0x4e7   :  { %4881 = vpow2.f32 %v706_v12  ;;  %v774_v14 = vsel %vm495_vm2, %v769_v13, 0 }
 0x4e8   :  { %4405 = vmatpush3.bf16.msra.mxu1 %v774_v14 }
 0x4e9   :  { %4418 = vmatprep.subr.bf16.mxu1 %v5105_v1 }
 0x4ea   :  { %v934_v37 = vpop.permute.xlu1 %933 }
 0x4eb   :  { %v935_v48 = vrot.slane %v934_v37, 4 }
 0x4ed   :  { %v4880_v15 = vpop.eup %4879  ;;  %v942_v55 = vsel %vm371_vm1, %v935_v48, 0 }
 0x4ee   :  { %v708_v16 = vsel %vm467_vm3, %v4880_v15, 0.0  ;;  %v985_v39 = vpop.permute.xlu1 %984 }
 0x4ef   :  { %709 = vadd.xlane.f32.xlu0 %v708_v16  ;;  %v986_v40 = vrot.slane %v985_v39, 4 }
 0x4f1   :  { %v4882_v17 = vpop.eup %4881  ;;  %v993_v41 = vsel %vm371_vm1, %v986_v40, 0 }
 0x4f2   :  { %v711_v18 = vsel %vm467_vm3, %v4882_v17, 0.0  ;;  %v988_v42 = vpop.permute.xlu1 %987 }
 0x4f3   :  { %712 = vadd.xlane.f32.xlu0 %v711_v18 }
 0x509   :  { %720 = vrot.lane.b32.xlu0 %v5264_v58, %s5107_s4 }
 0x50d   :  { %936 = vrot.lane.b32.xlu0 %v5282_v22, %s5101_s0 }
 0x57c   :  { %v710_v19 = vpop.xlane.xlu0 %709 }
 0x57d   :  { %4883 = vrcp.f32 %v710_v19 }
 0x580   :  { %v713_v20 = vpop.xlane.xlu0 %712 }
 0x581   :  { %4885 = vrcp.f32 %v713_v20 }
 0x584   :  { %v721_v21 = vpop.permute.xlu0 %720 }
 0x585   :  { %v726_v24 = vsel %vm495_vm2, %v721_v21, 0 }
 0x586   :  { %4399 = vmatpush3.bf16.msra.mxu0 %v726_v24 }
 0x587   :  { %v4884_v25 = vpop.eup %4883  ;;  %4410 = vmatprep.subr.bf16.mxu0 %v5105_v1 }
 0x588   :  { %v716_v26 = vmul.f32 %v4884_v25, %v4880_v15  ;;  %v937_v61 = vpop.permute.xlu0 %936 }
 0x58a   :  { %v718_v28 = vpack.c.bf16 %v716_v26, %v716_v26 }
 0x58b   :  { %v4886_v29 = vpop.eup %4885 }
 0x58c   :  { %v717_v32 = vmul.f32 %v4886_v29, %v4882_v17  ;;  %4401 = vmatmul.mubr.msk.bf16.vlgmr.msra.gmra.mrb[16].mxu0 %vm467_vm3, %v718_v28 }
 0x58d   :  { %4411 = vmatpush3.bf16.msra.mxu0 %v4729_v27  ;;  %4414 = vmatprep.mubr.msk.bf16.mxu0 %vm5106_vm0, %v5105_v1 }
 0x58e   :  { %v719_v35 = vpack.c.bf16 %v717_v32, %v717_v32  ;;  %4412 = vmatprep.subr.bf16.mxu0 %v5105_v1 }
 0x590   :  { %4407 = vmatmul.mubr.msk.bf16.vlgmr.msra.gmra.mrb[16].mxu1 %vm467_vm3, %v719_v35 }
 0x591   :  { %4419 = vmatpush3.bf16.msra.mxu1 %v4727_v34  ;;  %4422 = vmatprep.mubr.msk.bf16.mxu1 %vm5106_vm0, %v5105_v1 }
 0x592   :  { %4420 = vmatprep.subr.bf16.mxu1 %v5105_v1  ;;  %4413 = vmatpush3.bf16.msra.mxu0 %v4730_v36 }
 0x593   :  { %4426 = vmatprep.subr.bf16.mxu0 %v5105_v1 }
 0x595   :  { %4421 = vmatpush3.bf16.msra.mxu1 %v4728_v38 }
 0x596   :  { %4432 = vmatprep.subr.bf16.mxu1 %v5105_v1 }
 0x598   :  { %4423 = vmatmul.mubr.msk.bf16.vlgmr.msra.gmra.mrb[20].mxu1 %vm371_vm1, %v585_v51 }
 0x599   :  { %4434 = vmatprep.mubr.msk.bf16.mxu1 %vm5106_vm0, %v5105_v1 }
 0x59e   :  { %4433 = vmatpush3.bf16.xpose.msra.mxu1 %v993_v41 }
 0x59f   :  { %4444 = vmatprep.subr.bf16.mxu1 %v5105_v1 }
 0x5a5   :  { %4435 = vmatmul.mubr.msk.bf16.vlgmr.msra.gmra.mrb[24].mxu1 %vm371_vm1, %v988_v42 }
 0x5a6   :  { %4446 = vmatprep.mubr.msk.bf16.mxu1 %vm5106_vm0, %v5105_v1 }
 0x65f   :  { %v762_v46 = vpop.f32.mrb[16].mxu0 }
 0x660   :  { %v4402_v47 = vpop.f32.mrb[17].mxu0 }
 0x661   :  { %v765_v44 = vpop.f32.mrb[18].mxu0 }
 0x662   :  { %v4403_v49 = vpop.f32.mrb[19].mxu0 }
 0x663   :  { %v810_v51 = vpop.f32.mrb[16].mxu1  ;;  %v4731_v49 = vld [vmem:[#allocation5 + $0xcc] ss:$24 sps:$4 sm:$0xff]  }
 0x664   :  { %v816_v52 = vpack.c.bf16 %v810_v51, %v762_v46  ;;  %v4408_v53 = vpop.f32.mrb[17].mxu1 }
 0x665   :  { %v813_v54 = vpop.f32.mrb[18].mxu1 }
 0x666   :  { %v4409_v56 = vpop.f32.mrb[19].mxu1  ;;  %4415 = vmatmul.mubr.msk.bf16.vlgmr.msra.gmra.mrb[20].mxu0 %vm371_vm1, %v816_v52 }
 0x667   :  { %4427 = vmatpush3.bf16.xpose.msra.mxu0 %v942_v55  ;;  %4428 = vmatprep.mubr.msk.bf16.mxu0 %vm5106_vm0, %v5105_v1  ;;  %v4732_v55 = vld [vmem:[#allocation5 + $0xfc] ss:$24 sps:$4 sm:$0xff]  }
 0x668   :  { %4438 = vmatprep.subr.bf16.mxu0 %v5105_v1 }
 0x66b   :  { %v926_v57 = vpop.f32.mrb[20].mxu1 }
 0x66c   :  { %v4424_v60 = vpop.f32.mrb[21].mxu1 }
 0x66d   :  { %v929_v62 = vpop.f32.mrb[22].mxu1 }
 0x66e   :  { %v4425_v63 = vpop.f32.mrb[23].mxu1  ;;  %4429 = vmatmul.mubr.msk.bf16.vlgmr.msra.gmra.mrb[24].mxu0 %vm371_vm1, %v937_v61 }
 0x66f   :  { %4440 = vmatprep.mubr.msk.bf16.mxu0 %vm5106_vm0, %v5105_v1 }
 0x678   :  { %v1029_v2 = vpop.f32.mrb[24].mxu1 }
 0x679   :  { %v1036_v3 = vmul.f32 0.17677669, %v1029_v2  ;;  %v4436_v4 = vpop.f32.mrb[25].mxu1 }
 0x67a   :  { %v1032_v5 = vpop.f32.mrb[26].mxu1 }
 0x67b   :  { %v4437_v6 = vpop.f32.mrb[27].mxu1  ;;  %v1040_v7 = vsel %vm467_vm3, %v1036_v3, -inf }
 0x67c   :  { %1041 = vmax.xlane.f32.xlu1 %v1040_v7 }
 0x68d   :  { %1109 = vrot.lane.b32.xlu1 %v5266_v59, %s5101_s0 }
 0x691   :  { %1220 = vrot.lane.b32.xlu1 %v5240_v43, %s5108_s28 }
 0x695   :  { %1271 = vrot.lane.b32.xlu1 %v5243_v45, %s5108_s28 }
 0x699   :  { %1274 = vrot.lane.b32.xlu1 %v5288_v23, %s5108_s28 }
 0x709   :  { %v1042_v8 = vpop.xlane.xlu1 %1041 }
 0x70a   :  { %v1044_v11 = vsub.f32 %v1036_v3, %v1042_v8 }
 0x70c   :  { %v1047_v12 = vmul.f32 1.442695, %v1044_v11 }
 0x70d   :  { %v1110_v9 = vpop.permute.xlu1 %1109 }
 0x70e   :  { %v1115_v10 = vsel %vm495_vm2, %v1110_v9, 0  ;;  %4887 = vpow2.f32 %v1047_v12 }
 0x70f   :  { %4445 = vmatpush3.bf16.msra.mxu1 %v1115_v10 }
 0x710   :  { %4458 = vmatprep.subr.bf16.mxu1 %v5105_v1 }
 0x711   :  { %v1221_v32 = vpop.permute.xlu1 %1220 }
 0x712   :  { %v1222_v37 = vrot.slane %v1221_v32, 4 }
 0x714   :  { %v1229_v40 = vsel %vm371_vm1, %v1222_v37, 0 }
 0x718   :  { %v4888_v24 = vpop.eup %4887 }
 0x719   :  { %v1052_v25 = vsel %vm467_vm3, %v4888_v24, 0.0 }
 0x739   :  { %v870_v13 = vpop.f32.mrb[20].mxu0 }
 0x73a   :  { %v5374_v14 = vadd.f32 %v926_v57, %v870_v13  ;;  %v4416_v15 = vpop.f32.mrb[21].mxu0 }
 0x73b   :  { %v873_v43 = vpop.f32.mrb[22].mxu0 }
 0x73c   :  { %v5376_v16 = vadd.f32 %v929_v62, %v873_v43  ;;  %v4417_v45 = vpop.f32.mrb[23].mxu0  ;;  %v1272_v62 = vpop.permute.xlu1 %1271 }
 0x73d   :  { %v1273_v3 = vrot.slane %v1272_v62, 4 }
 0x73f   :  { %v1280_v8 = vsel %vm371_vm1, %v1273_v3, 0 }
 0x740   :  { %v1275_v10 = vpop.permute.xlu1 %1274 }
 0x741   :  { %v978_v17 = vpop.f32.mrb[24].mxu0 }
 0x742   :  { %v1035_v23 = vmul.f32 0.17677669, %v978_v17  ;;  %v4430_v18 = vpop.f32.mrb[25].mxu0 }
 0x743   :  { %v981_v19 = vpop.f32.mrb[26].mxu0 }
 0x744   :  { %v4431_v20 = vpop.f32.mrb[27].mxu0  ;;  %v1037_v21 = vsel %vm467_vm3, %v1035_v23, -inf }
 0x745   :  { %1038 = vmax.xlane.f32.xlu0 %v1037_v21 }
 0x749   :  { %1053 = vadd.xlane.f32.xlu0 %v1052_v25 }
 0x7d2   :  { %v1039_v26 = vpop.xlane.xlu0 %1038 }
 0x7d3   :  { %v1043_v27 = vsub.f32 %v1035_v23, %v1039_v26 }
 0x7d5   :  { %v1045_v28 = vmul.f32 1.442695, %v1043_v27 }
 0x7d6   :  { %v1054_v29 = vpop.xlane.xlu0 %1053 }
 0x7d7   :  { %4889 = vpow2.f32 %v1045_v28 }
 0x7d8   :  { %4891 = vrcp.f32 %v1054_v29 }
 0x7e1   :  { %v4890_v34 = vpop.eup %4889 }
 0x7e2   :  { %v4892_v35 = vpop.eup %4891  ;;  %v1049_v36 = vsel %vm467_vm3, %v4890_v34, 0.0 }
 0x7e3   :  { %v1058_v38 = vmul.f32 %v4892_v35, %v4888_v24  ;;  %1050 = vadd.xlane.f32.xlu0 %v1049_v36 }
 0x7e5   :  { %v1060_v39 = vpack.c.bf16 %v1058_v38, %v1058_v38 }
 0x7e7   :  { %4447 = vmatmul.mubr.msk.bf16.vlgmr.msra.gmra.mrb[28].mxu1 %vm467_vm3, %v1060_v39 }
 0x7e8   :  { %4459 = vmatpush3.bf16.xpose.msra.mxu1 %v1229_v40  ;;  %4460 = vmatprep.mubr.msk.bf16.mxu1 %vm5106_vm0, %v5105_v1 }
 0x7e9   :  { %4470 = vmatprep.subr.bf16.mxu1 %v5105_v1 }
 0x7f9   :  { %1061 = vrot.lane.b32.xlu0 %v5264_v58, %s5101_s0 }
 0x7fd   :  { %1223 = vrot.lane.b32.xlu0 %v5282_v22, %s5108_s28 }
 0x870   :  { %v1051_v41 = vpop.xlane.xlu0 %1050 }
 0x871   :  { %4893 = vrcp.f32 %v1051_v41 }
 0x874   :  { %v1062_v42 = vpop.permute.xlu0 %1061 }
 0x875   :  { %v1067_v46 = vsel %vm495_vm2, %v1062_v42, 0 }
 0x876   :  { %4439 = vmatpush3.bf16.msra.mxu0 %v1067_v46 }
 0x877   :  { %4450 = vmatprep.subr.bf16.mxu0 %v5105_v1 }
 0x878   :  { %v1224_v47 = vpop.permute.xlu0 %1223 }
 0x879   :  { %4461 = vmatmul.mubr.msk.bf16.vlgmr.msra.gmra.mrb[32].mxu1 %vm371_vm1, %v1224_v47 }
 0x87a   :  { %4472 = vmatprep.mubr.msk.bf16.mxu1 %vm5106_vm0, %v5105_v1 }
 0x87b   :  { %v4894_v44 = vpop.eup %4893 }
 0x87c   :  { %v1057_v48 = vmul.f32 %v4894_v44, %v4890_v34  ;;  %v4733_v44 = vld [vmem:[#allocation5 + $0x12c] ss:$24 sps:$4 sm:$0xff]  }
 0x87e   :  { %v1059_v51 = vpack.c.bf16 %v1057_v48, %v1057_v48  ;;  %v4734_v48 = vld [vmem:[#allocation5 + $0x15c] ss:$24 sps:$4 sm:$0xff]  }
 0x880   :  { %4441 = vmatmul.mubr.msk.bf16.vlgmr.msra.gmra.mrb[28].mxu0 %vm467_vm3, %v1059_v51 }
 0x881   :  { %4451 = vmatpush3.bf16.msra.mxu0 %v4731_v49  ;;  %4454 = vmatprep.mubr.msk.bf16.mxu0 %vm5106_vm0, %v5105_v1 }
 0x882   :  { %4452 = vmatprep.subr.bf16.mxu0 %v5105_v1 }
 0x885   :  { %4453 = vmatpush3.bf16.msra.mxu0 %v4732_v55 }
 0x886   :  { %4464 = vmatprep.subr.bf16.mxu0 %v5105_v1 }
 0x8ba   :  { %v1151_v22 = vpop.f32.mrb[28].mxu1 }
 0x8bb   :  { %v4448_v52 = vpop.f32.mrb[29].mxu1 }
 0x8bc   :  { %v1154_v53 = vpop.f32.mrb[30].mxu1 }
 0x8bd   :  { %v4449_v54 = vpop.f32.mrb[31].mxu1 }
 0x94c   :  { %v1265_v56 = vpop.f32.mrb[32].mxu1 }
 0x94d   :  { %v1322_v57 = vmul.f32 0.17677669, %v1265_v56  ;;  %v4462_v60 = vpop.f32.mrb[33].mxu1 }
 0x94e   :  { %v1268_v61 = vpop.f32.mrb[34].mxu1 }
 0x94f   :  { %v4463_v63 = vpop.f32.mrb[35].mxu1  ;;  %v1324_v2 = vsel %vm467_vm3, %v1322_v57, -inf  ;;  %v1507_v61 = vld [vmem:[#allocation10 + $0x1] ss:$0 sm:$0xff] }
 0x950   :  { %1325 = vmax.xlane.f32.xlu0 %v1324_v2 }
 0x953   :  { %v1103_v4 = vpop.f32.mrb[28].mxu0 }
 0x954   :  { %v1157_v5 = vpack.c.bf16 %v1151_v22, %v1103_v4  ;;  %v4442_v6 = vpop.f32.mrb[29].mxu0 }
 0x955   :  { %v1106_v7 = vpop.f32.mrb[30].mxu0 }
 0x956   :  { %v4443_v9 = vpop.f32.mrb[31].mxu0  ;;  %4455 = vmatmul.mubr.msk.bf16.vlgmr.msra.gmra.mrb[32].mxu0 %vm371_vm1, %v1157_v5  ;;  %v4951_v7 = vld [vmem:[#allocation2] sm:$0xff] }
 0x957   :  { %4465 = vmatpush3.bf16.xpose.msra.mxu0 %v1280_v8  ;;  %4466 = vmatprep.mubr.msk.bf16.mxu0 %vm5106_vm0, %v5105_v1  ;;  %v4952_v9 = vld [vmem:[#allocation2 + $0x8] sm:$0xff] }
 0x958   :  { %4476 = vmatprep.subr.bf16.mxu0 %v5105_v1 }
 0x95e   :  { %4467 = vmatmul.mubr.msk.bf16.vlgmr.msra.gmra.mrb[36].mxu0 %vm371_vm1, %v1275_v10 }
 0x95f   :  { %4478 = vmatprep.mubr.msk.bf16.mxu0 %vm5106_vm0, %v5105_v1 }
 0x9dd   :  { %v1326_v11 = vpop.xlane.xlu0 %1325 }
 0x9de   :  { %v1330_v12 = vsub.f32 %v1322_v57, %v1326_v11  ;;  %v4735_v11 = vld [vmem:[#allocation5 + $0x10] ss:$24 sps:$4 sm:$0xff]  }
 0x9e0   :  { %v1332_v13 = vmul.f32 1.442695, %v1330_v12  ;;  %v4737_v12 = vld [vmem:[#allocation5 + $0x14] ss:$24 sps:$4 sm:$0xff]  }
 0x9e2   :  { %4895 = vpow2.f32 %v1332_v13  ;;  %v4740_v13 = vld [vmem:[#allocation5 + $0x44] ss:$24 sps:$4 sm:$0xff]  }
 0x9ec   :  { %v4896_v15 = vpop.eup %4895 }
 0x9ed   :  { %v1336_v43 = vsel %vm467_vm3, %v4896_v15, 0.0 }
 0x9ee   :  { %1337 = vadd.xlane.f32.xlu0 %v1336_v43 }
 0xa29   :  { %v1211_v45 = vpop.f32.mrb[32].mxu0 }
 0xa2a   :  { %v1218_v17 = vadd.f32 %v1211_v45, %v5374_v14  ;;  %v4456_v23 = vpop.f32.mrb[33].mxu0 }
 0xa2b   :  { %v1214_v18 = vpop.f32.mrb[34].mxu0 }
 0xa2c   :  { %v1219_v19 = vadd.f32 %v1214_v18, %v5376_v16  ;;  %v4457_v20 = vpop.f32.mrb[35].mxu0 }
 0xa31   :  { %v1316_v21 = vpop.f32.mrb[36].mxu0 }
 0xa32   :  { %v1323_v24 = vmul.f32 0.17677669, %v1316_v21  ;;  %v4468_v25 = vpop.f32.mrb[37].mxu0 }
 0xa33   :  { %v1319_v26 = vpop.f32.mrb[38].mxu0  ;;  %v4741_v25 = vld [vmem:[#allocation5 + $0x70] ss:$24 sps:$4 sm:$0xff]  }
 0xa34   :  { %v4469_v27 = vpop.f32.mrb[39].mxu0  ;;  %v1327_v28 = vsel %vm467_vm3, %v1323_v24, -inf  ;;  %v4746_v26 = vld [vmem:[#allocation5 + $0xa4] ss:$24 sps:$4 sm:$0xff]  }
 0xa35   :  { %1328 = vmax.xlane.f32.xlu1 %v1327_v28  ;;  %v4744_v27 = vld [vmem:[#allocation5 + $0xa0] ss:$24 sps:$4 sm:$0xff]   ;;  %v4749_v28 = vld [vmem:[#allocation5 + $0xd4] ss:$24 sps:$4 sm:$0xff]  }
 0xa46   :  { %1396 = vrot.lane.b32.xlu1 %v5266_v59, %s5108_s28 }
 0xa7b   :  { %v1338_v37 = vpop.xlane.xlu0 %1337 }
 0xac2   :  { %v1329_v29 = vpop.xlane.xlu1 %1328 }
 0xac3   :  { %v1331_v32 = vsub.f32 %v1323_v24, %v1329_v29  ;;  %v4743_v24 = vld [vmem:[#allocation5 + $0x74] ss:$24 sps:$4 sm:$0xff]   ;;  %v4747_v29 = vld [vmem:[#allocation5 + $0xd0] ss:$24 sps:$4 sm:$0xff]  }
 0xac5   :  { %v1334_v34 = vmul.f32 1.442695, %v1331_v32  ;;  %v4752_v32 = vld [vmem:[#allocation5 + $0x104] ss:$24 sps:$4 sm:$0xff]  }
 0xac6   :  { %v1397_v14 = vpop.permute.xlu1 %1396 }
 0xac7   :  { %4897 = vpow2.f32 %v1334_v34  ;;  %v1402_v35 = vsel %vm495_vm2, %v1397_v14, 0  ;;  %v4750_v34 = vld [vmem:[#allocation5 + $0x100] ss:$24 sps:$4 sm:$0xff]   ;;  %v4753_v14 = vld [vmem:[#allocation5 + $0x130] ss:$24 sps:$4 sm:$0xff]  }
 0xac8   :  { %4477 = vmatpush3.bf16.msra.mxu0 %v1402_v35  ;;  %4899 = vrcp.f32 %v1338_v37  ;;  %v4755_v35 = vld [vmem:[#allocation5 + $0x134] ss:$24 sps:$4 sm:$0xff]   ;;  %v4759_v37 = vld [vmem:[#allocation7 + $0x40] sm:$0xff]  }
 0xac9   :  { %1651 = vmatprep.subr.bf16.mxu0 %v4737_v12 }
 0xad1   :  { %v4898_v16 = vpop.eup %4897 }
 0xad2   :  { %v1339_v36 = vsel %vm467_vm3, %v4898_v16, 0.0  ;;  %v4900_v38 = vpop.eup %4899 }
 0xad3   :  { %1340 = vadd.xlane.f32.xlu0 %v1339_v36  ;;  %v1344_v59 = vmul.f32 %v4900_v38, %v4896_v15  ;;  %v4738_v15 = vld [vmem:[#allocation5 + $0x40] ss:$24 sps:$4 sm:$0xff]  }
 0xad4   :  { %v4756_v36 = vld [vmem:[#allocation5 + $0x160] ss:$24 sps:$4 sm:$0xff]  }
 0xad5   :  { %v1346_v42 = vpack.c.bf16 %v1344_v59, %v1344_v59  ;;  %v4760_v38 = vld [vmem:[#allocation7] sm:$0xff]   ;;  %v4762_v59 = vld [vmem:[#allocation7 + $0x8] sm:$0xff]  }
 0xae9   :  { %1348 = vrot.lane.b32.xlu0 %v5264_v58, %s5108_s28 }
 0xb60   :  { %v1341_v39 = vpop.xlane.xlu0 %1340 }
 0xb61   :  { %4901 = vrcp.f32 %v1341_v39  ;;  %v4761_v39 = vld [vmem:[#allocation7 + $0x48] sm:$0xff]  }
 0xb64   :  { %v1349_v40 = vpop.permute.xlu0 %1348 }
 0xb65   :  { %v1354_v41 = vsel %vm495_vm2, %v1349_v40, 0  ;;  %v4763_v40 = vld [vmem:[#allocation7 + $0x50] sm:$0xff]  }
 0xb66   :  { %4471 = vmatpush3.bf16.msra.mxu1 %v1354_v41  ;;  %v4764_v41 = vld [vmem:[#allocation7 + $0x10] sm:$0xff]  }
 0xb67   :  { %4482 = vmatprep.subr.bf16.mxu1 %v5105_v1 }
 0xb69   :  { %4473 = vmatmul.mubr.msk.bf16.vlgmr.msra.gmra.mrb[36].mxu1 %vm467_vm3, %v1346_v42  ;;  %v4765_v42 = vld [vmem:[#allocation7 + $0x58] sm:$0xff]  }
 0xb6a   :  { %4486 = vmatprep.mubr.msk.bf16.mxu1 %vm5106_vm0, %v5105_v1  ;;  %4483 = vmatpush3.bf16.msra.mxu1 %v4733_v44  ;;  %v4769_v44 = vld [vmem:[#allocation7 + $0x68] sm:$0xff]  }
 0xb6b   :  { %v4902_v46 = vpop.eup %4901  ;;  %4484 = vmatprep.subr.bf16.mxu1 %v5105_v1 }
 0xb6c   :  { %v1345_v58 = vmul.f32 %v4902_v46, %v4898_v16  ;;  %v4758_v16 = vld [vmem:[#allocation5 + $0x164] ss:$24 sps:$4 sm:$0xff]  }
 0xb6d   :  { %v4766_v46 = vld [vmem:[#allocation7 + $0x18] sm:$0xff]  }
 0xb6e   :  { %v1347_v47 = vpack.c.bf16 %v1345_v58, %v1345_v58  ;;  %4485 = vmatpush3.bf16.msra.mxu1 %v4734_v48  ;;  %v4767_v58 = vld [vmem:[#allocation7 + $0x60] sm:$0xff]  }
 0xb6f   :  { %4227 = vmatprep.subr.bf16.mxu1 %v4759_v37 }
 0xb70   :  { %4479 = vmatmul.mubr.msk.bf16.vlgmr.msra.gmra.mrb[40].mxu0 %vm467_vm3, %v1347_v47  ;;  %v4768_v47 = vld [vmem:[#allocation7 + $0x20] sm:$0xff]  }
 0xb71   :  { %1683 = vmatprep.mubr.bf16.mxu0 %v5104_v0  ;;  %1652 = vmatpush1.bf16.msra.mxu0 %v4735_v11 }
 0xb72   :  { %1653 = vmatprep.subr.bf16.mxu0 %v4740_v13 }
 0xb75   :  { %1654 = vmatpush1.bf16.msra.mxu0 %v4738_v15 }
 0xb76   :  { %1655 = vmatprep.subr.bf16.mxu0 %v4743_v24 }
 0xb79   :  { %1656 = vmatpush1.bf16.msra.mxu0 %v4741_v25 }
 0xb7a   :  { %1657 = vmatprep.subr.bf16.mxu0 %v4746_v26 }
 0xb7d   :  { %1658 = vmatpush1.bf16.msra.mxu0 %v4744_v27 }
 0xb7e   :  { %1659 = vmatprep.subr.bf16.mxu0 %v4749_v28 }
 0xb81   :  { %1660 = vmatpush1.bf16.msra.mxu0 %v4747_v29  ;;  %v1732_v29 = vld [vmem:[#allocation10 + $0x3] ss:$0 sm:$0xff] }
 0xb82   :  { %1661 = vmatprep.subr.bf16.mxu0 %v4752_v32 }
 0xb85   :  { %1662 = vmatpush1.bf16.msra.mxu0 %v4750_v34 }
 0xb86   :  { %1663 = vmatprep.subr.bf16.mxu0 %v4755_v35 }
 0xb89   :  { %1664 = vmatpush1.bf16.msra.mxu0 %v4753_v14 }
 0xb8a   :  { %1665 = vmatprep.subr.bf16.mxu0 %v4758_v16 }
 0xb8d   :  { %1666 = vmatpush1.bf16.msra.mxu0 %v4756_v36 }
 0xc3c   :  { %v1390_v49 = vpop.f32.mrb[36].mxu1 }
 0xc3d   :  { %v4474_v51 = vpop.f32.mrb[37].mxu1 }
 0xc3e   :  { %v1393_v22 = vpop.f32.mrb[38].mxu1 }
 0xc3f   :  { %v4475_v52 = vpop.f32.mrb[39].mxu1 }
 0xc43   :  { %v1438_v53 = vpop.f32.mrb[40].mxu0 }
 0xc44   :  { %v1444_v54 = vpack.c.bf16 %v1438_v53, %v1390_v49  ;;  %v4480_v55 = vpop.f32.mrb[41].mxu0 }
 0xc45   :  { %v1441_v56 = vpop.f32.mrb[42].mxu0  ;;  %v1512_v55 = vld [vmem:[#allocation10 + $0x4] ss:$0 sm:$0xff] }
 0xc46   :  { %v4481_v57 = vpop.f32.mrb[43].mxu0  ;;  %4487 = vmatmul.mubr.msk.bf16.vlgmr.msra.gmra.mrb[40].mxu1 %vm371_vm1, %v1444_v54 }
 0xc47   :  { %4228 = vmatpush3.bf16.msra.mxu1 %v4760_v38 }
 0xc48   :  { %4229 = vmatprep.subr.bf16.mxu1 %v4761_v39 }
 0xc4b   :  { %4230 = vmatpush3.bf16.msra.mxu1 %v4762_v59  ;;  %v4775_v59 = vld [vmem:[#allocation5 + $0x180] ss:$24 sps:$4 sm:$0xff]  }
 0xc4c   :  { %4231 = vmatprep.subr.bf16.mxu1 %v4763_v40  ;;  %v4777_v40 = vld [vmem:[#allocation5 + $0x184] ss:$24 sps:$4 sm:$0xff]  }
 0xc4d   :  { %2080 = vmatprep.subr.bf16.mxu0 %v4777_v40 }
 0xc4f   :  { %4232 = vmatpush3.bf16.msra.mxu1 %v4764_v41  ;;  %v4778_v41 = vld [vmem:[#allocation5 + $0x188] ss:$24 sps:$4 sm:$0xff]  }
 0xc50   :  { %4233 = vmatprep.subr.bf16.mxu1 %v4765_v42  ;;  %v4781_v42 = vld [vmem:[#allocation5 + $0x1b4] ss:$24 sps:$4 sm:$0xff]  }
 0xc53   :  { %4234 = vmatpush3.bf16.msra.mxu1 %v4766_v46  ;;  %v4782_v46 = vld [vmem:[#allocation5 + $0x1b8] ss:$24 sps:$4 sm:$0xff]  }
 0xc54   :  { %4235 = vmatprep.subr.bf16.mxu1 %v4767_v58  ;;  %v4779_v58 = vld [vmem:[#allocation5 + $0x1b0] ss:$24 sps:$4 sm:$0xff]  }
 0xc57   :  { %4236 = vmatpush3.bf16.msra.mxu1 %v4768_v47 }
 0xc58   :  { %4237 = vmatprep.subr.bf16.mxu1 %v4769_v44 }
 0xd19   :  { %v1498_v60 = vpop.f32.mrb[40].mxu1 }
 0xd1a   :  { %v1505_v62 = vadd.f32 %v1498_v60, %v1218_v17  ;;  %v4488_v63 = vpop.f32.mrb[41].mxu1 }
 0xd1b   :  { %v1501_v2 = vpop.f32.mrb[42].mxu1 }
 0xd1c   :  { %v1508_v3 = vadd.f32 %v1507_v61, %v1505_v62  ;;  %v1506_v4 = vadd.f32 %v1501_v2, %v1219_v19  ;;  %v4489_v5 = vpop.f32.mrb[43].mxu1  ;;  %v1513_v62 = vld [vmem:[#allocation10 + $0x5] ss:$0 sm:$0xff] }
 0xd1d   :  { %v4770_v5 = vld [vmem:[#allocation7 + $0x28] sm:$0xff]  }
 0xd1e   :  { %v1509_v6 = vadd.f32 %v1507_v61, %v1506_v4  ;;  %v1510_v8 = vadd.f32 %v4951_v7, %v1508_v3  ;;  %4238 = vmatpush3.bf16.msra.mxu1 %v4770_v5  ;;  %v4772_v7 = vld [vmem:[#allocation7 + $0x30] sm:$0xff]  }
 0xd1f   :  { %v4798_v5 = vld [vmem:[#allocation5 + $0x278] ss:$24 sps:$4 sm:$0xff]  }
 0xd20   :  { %1514 = vadd.xlane.f32.xlu1 %v1510_v8  ;;  %v1511_v10 = vadd.f32 %v4952_v9, %v1509_v6  ;;  %v4771_v6 = vld [vmem:[#allocation7 + $0x70] sm:$0xff]   ;;  %v4774_v9 = vld [vmem:[#allocation7 + $0x38] sm:$0xff]  }
 0xd21   :  { %4239 = vmatprep.subr.bf16.mxu1 %v4771_v6  ;;  %v4799_v6 = vld [vmem:[#allocation5 + $0x2a0] ss:$24 sps:$4 sm:$0xff]  }
 0xd22   :  { %1516 = vadd.xlane.f32.xlu0 %v1511_v10  ;;  %4240 = vmatpush3.bf16.msra.mxu1 %v4772_v7  ;;  %v4801_v7 = vld [vmem:[#allocation5 + $0x2a4] ss:$24 sps:$4 sm:$0xff]  }
 0xdad   :  { %v1515_v43 = vpop.xlane.xlu1 %1514 }
 0xdae   :  { %v1519_v45 = vmul.f32 0.0078125, %v1515_v43 }
 0xdaf   :  { %v1517_v17 = vpop.xlane.xlu0 %1516 }
 0xdb0   :  { %v5428_v23 = vsub.f32 %v1510_v8, %v1519_v45  ;;  %v1520_v18 = vmul.f32 0.0078125, %v1517_v17  ;;  %v4773_v8 = vld [vmem:[#allocation7 + $0x78] sm:$0xff]  }
 0xdb1   :  { %4241 = vmatprep.subr.bf16.mxu1 %v4773_v8  ;;  %v4802_v8 = vld [vmem:[#allocation5 + $0x2a8] ss:$24 sps:$4 sm:$0xff]  }
 0xdb2   :  { %v5430_v19 = vsub.f32 %v1511_v10, %v1520_v18  ;;  %v1523_v20 = vmul.f32 %v5428_v23, %v5428_v23  ;;  %4242 = vmatpush3.bf16.msra.mxu1 %v4774_v9  ;;  %v1559_v10 = vld [vmem:[#allocation10 + $0x2] ss:$8 sm:$0x3]  ;;  %v4805_v9 = vld [vmem:[#allocation5 + $0x2d4] ss:$24 sps:$4 sm:$0xff]  }
 0xdb3   :  { %4490 = vmatprep.subr.bf16.mxu1 %v5105_v1  ;;  %v1564_v11 = vrot.slane %v1559_v10, %v5228_v31  ;;  %v1568_v12 = vrot.slane %v1559_v10, %v5231_v33  ;;  %v4803_v10 = vld [vmem:[#allocation5 + $0x2d0] ss:$24 sps:$4 sm:$0xff]  }
 0xdb4   :  { %1525 = vadd.xlane.f32.xlu0 %v1523_v20  ;;  %v1524_v21 = vmul.f32 %v5430_v19, %v5430_v19 }
 0xdb6   :  { %1527 = vadd.xlane.f32.xlu1 %v1524_v21 }
 0xe41   :  { %v1526_v48 = vpop.xlane.xlu0 %1525 }
 0xe42   :  { %v1529_v49 = vmul.f32 0.0078125, %v1526_v48 }
 0xe43   :  { %v1528_v51 = vpop.xlane.xlu1 %1527 }
 0xe44   :  { %v1531_v22 = vadd.f32 1e-05, %v1529_v49  ;;  %v1530_v52 = vmul.f32 0.0078125, %v1528_v51 }
 0xe46   :  { %4903 = vrsqrt.f32 %v1531_v22  ;;  %v1532_v53 = vadd.f32 1e-05, %v1530_v52 }
 0xe48   :  { %4905 = vrsqrt.f32 %v1532_v53 }
 0xe50   :  { %v4904_v54 = vpop.eup %4903 }
 0xe51   :  { %v1535_v56 = vmul.f32 %v4904_v54, %v5428_v23  ;;  %v4785_v54 = vld [vmem:[#allocation5 + $0x1e4] ss:$24 sps:$4 sm:$0xff]  }
 0xe52   :  { %v4906_v57 = vpop.eup %4905 }
 0xe53   :  { %v1536_v60 = vmul.f32 %v4906_v57, %v5430_v19  ;;  %v1537_v61 = vmul.f32 %v1535_v56, %v1512_v55  ;;  %v4786_v56 = vld [vmem:[#allocation5 + $0x1e8] ss:$24 sps:$4 sm:$0xff]   ;;  %v4789_v57 = vld [vmem:[#allocation5 + $0x214] ss:$24 sps:$4 sm:$0xff]  }
 0xe55   :  { %v1538_v63 = vmul.f32 %v1536_v60, %v1512_v55  ;;  %v1539_v2 = vadd.f32 %v1537_v61, %v1513_v62  ;;  %v4783_v55 = vld [vmem:[#allocation5 + $0x1e0] ss:$24 sps:$4 sm:$0xff]   ;;  %v4787_v60 = vld [vmem:[#allocation5 + $0x210] ss:$24 sps:$4 sm:$0xff]  }
 0xe56   :  { %v4790_v61 = vld [vmem:[#allocation5 + $0x218] ss:$24 sps:$4 sm:$0xff]  }
 0xe57   :  { %v1540_v3 = vadd.f32 %v1538_v63, %v1513_v62  ;;  %v4793_v62 = vld [vmem:[#allocation5 + $0x244] ss:$24 sps:$4 sm:$0xff]   ;;  %v4791_v63 = vld [vmem:[#allocation5 + $0x240] ss:$24 sps:$4 sm:$0xff]  }
 0xe59   :  { %v1541_v4 = vpack.c.bf16 %v1540_v3, %v1539_v2 }
 0xe5b   :  { %1684 = vmatmul.mubr.bf16.vlgmr.msra.gmra.mrb[44].mxu0 %v1541_v4  ;;  %v4795_v4 = vld [vmem:[#allocation5 + $0x270] ss:$24 sps:$4 sm:$0xff]  }
 0xe5c   :  { %2112 = vmatprep.mubr.bf16.mxu0 %v5104_v0  ;;  %2081 = vmatpush1.bf16.msra.mxu0 %v4775_v59 }
 0xe5d   :  { %2082 = vmatprep.subr.bf16.mxu0 %v4781_v42 }
 0xe60   :  { %2083 = vmatpush1.bf16.msra.mxu0 %v4779_v58 }
 0xe61   :  { %2084 = vmatprep.subr.bf16.mxu0 %v4785_v54 }
 0xe64   :  { %2085 = vmatpush1.bf16.msra.mxu0 %v4783_v55 }
 0xe65   :  { %2086 = vmatprep.subr.bf16.mxu0 %v4789_v57 }
 0xe68   :  { %2087 = vmatpush1.bf16.msra.mxu0 %v4787_v60 }
 0xe69   :  { %2088 = vmatprep.subr.bf16.mxu0 %v4793_v62 }
 0xe6c   :  { %2089 = vmatpush1.bf16.msra.mxu0 %v4791_v63 }
 0xf2e   :  { %v1685_v13 = vpop.f32.mrb[44].mxu0 }
 0xf2f   :  { %v1686_v15 = vadd.f32 %v1685_v13, %v1564_v11  ;;  %v1687_v43 = vpop.f32.mrb[45].mxu0 }
 0xf30   :  { %v1688_v45 = vadd.f32 %v1687_v43, %v1568_v12  ;;  %v1689_v17 = vpop.f32.mrb[46].mxu0 }
 0xf31   :  { %v1690_v23 = vadd.f32 %v1689_v17, %v1564_v11  ;;  %v1691_v18 = vpop.f32.mrb[47].mxu0  ;;  %v1694_v20 = vmax.f32 %v1686_v15, 0.0  ;;  %v4806_v11 = vld [vmem:[#allocation5 + $0x2d8] ss:$24 sps:$4 sm:$0xff]  }
 0xf32   :  { %v1692_v19 = vadd.f32 %v1691_v18, %v1568_v12  ;;  %v1695_v24 = vmax.f32 %v1688_v45, 0.0  ;;  %v1872_v18 = vld [vmem:[#allocation10 + $0x6] ss:$0 sm:$0xff] }
 0xf33   :  { %v1696_v21 = vmax.f32 %v1690_v23, 0.0 }
 0xf34   :  { %v1697_v25 = vmax.f32 %v1692_v19, 0.0 }
 0xf35   :  { %v1698_v26 = vpack.c.bf16 %v1696_v21, %v1694_v20 }
 0xf36   :  { %v1699_v27 = vpack.c.bf16 %v1697_v25, %v1695_v24  ;;  %v1873_v25 = vld [vmem:[#allocation10 + $0x7] ss:$0 sm:$0xff] }
 0xf38   :  { %1861 = vmatprep.mubr.bf16.mxu1 %v1699_v27 }
 0xf39   :  { %1862 = vmatmul.mubr.bf16.vlgmr.msra.gmra.mrb[44].mxu1 %v1698_v26 }
 0xf3a   :  { %4506 = vmatprep.mubr.msk.bf16.mxu1 %vm5106_vm0, %v5105_v1  ;;  %4491 = vmatpush3.bf16.msra.mxu1 %v4778_v41 }
 0xf3b   :  { %4492 = vmatprep.subr.bf16.mxu1 %v5105_v1 }
 0xf3e   :  { %4493 = vmatpush3.bf16.msra.mxu1 %v4782_v46 }
 0xf3f   :  { %4494 = vmatprep.subr.bf16.mxu1 %v5105_v1 }
 0xf42   :  { %4495 = vmatpush3.bf16.msra.mxu1 %v4786_v56 }
 0xf43   :  { %4496 = vmatprep.subr.bf16.mxu1 %v5105_v1 }
 0xf46   :  { %4497 = vmatpush3.bf16.msra.mxu1 %v4790_v61 }
 0xf47   :  { %4498 = vmatprep.subr.bf16.mxu1 %v5105_v1 }
0x100c   :  { %v4243_v28 = vpop.f32.mrb[44].mxu1 }
0x100d   :  { %v4244_v32 = vpop.f32.mrb[45].mxu1 }
0x100e   :  { %v4245_v34 = vadd.f32 %v4244_v32, %v4243_v28  ;;  %v4246_v14 = vpop.f32.mrb[46].mxu1  ;;  %v1935_v32 = vld [vmem:[#allocation10 + $0x18] ss:$8 sm:$0x7] }
0x100f   :  { %v4247_v35 = vpop.f32.mrb[47].mxu1  ;;  %v1948_v58 = vrot.slane %v1935_v32, %v137_v50 }
0x1010   :  { %v1864_v16 = vadd.f32 %v4245_v34, %v1732_v29  ;;  %v4248_v36 = vadd.f32 %v4247_v35, %v4246_v14  ;;  %v1940_v34 = vrot.slane %v1935_v32, %v5228_v31  ;;  %v1944_v14 = vrot.slane %v1935_v32, %v5231_v33 }
0x1012   :  { %v1867_v37 = vadd.f32 %v4248_v36, %v1732_v29  ;;  %v1870_v38 = vadd.f32 %v1864_v16, %v1539_v2  ;;  %v4794_v2 = vld [vmem:[#allocation5 + $0x248] ss:$24 sps:$4 sm:$0xff]  }
0x1013   :  { %4499 = vmatpush3.bf16.msra.mxu1 %v4794_v2 }
0x1014   :  { %1874 = vadd.xlane.f32.xlu0 %v1870_v38  ;;  %v1871_v39 = vadd.f32 %v1867_v37, %v1540_v3  ;;  %v4797_v3 = vld [vmem:[#allocation5 + $0x274] ss:$24 sps:$4 sm:$0xff]   ;;  %4500 = vmatprep.subr.bf16.mxu1 %v5105_v1 }
0x1015   :  { %2090 = vmatprep.subr.bf16.mxu0 %v4797_v3 }
0x1016   :  { %1876 = vadd.xlane.f32.xlu1 %v1871_v39  ;;  %2091 = vmatpush1.bf16.msra.mxu0 %v4795_v4 }
0x1017   :  { %4501 = vmatpush3.bf16.msra.mxu1 %v4798_v5  ;;  %2092 = vmatprep.subr.bf16.mxu0 %v4801_v7 }
0x1018   :  { %4502 = vmatprep.subr.bf16.mxu1 %v5105_v1 }
0x101a   :  { %2093 = vmatpush1.bf16.msra.mxu0 %v4799_v6 }
0x101b   :  { %4503 = vmatpush3.bf16.msra.mxu1 %v4802_v8  ;;  %2094 = vmatprep.subr.bf16.mxu0 %v4805_v9 }
0x101c   :  { %4504 = vmatprep.subr.bf16.mxu1 %v5105_v1 }
0x101e   :  { %2095 = vmatpush1.bf16.msra.mxu0 %v4803_v10 }
0x101f   :  { %4505 = vmatpush3.bf16.msra.mxu1 %v4806_v11  ;;  %4510 = vmatprep.subr.bf16.mxu0 %v5105_v1 }
0x1020   :  { %4516 = vmatprep.subr.bf16.mxu1 %v5105_v1 }
0x10a1   :  { %v1875_v47 = vpop.xlane.xlu0 %1874 }
0x10a2   :  { %v1878_v44 = vmul.f32 0.0078125, %v1875_v47 }
0x10a3   :  { %v1877_v48 = vpop.xlane.xlu1 %1876 }
0x10a4   :  { %v1880_v49 = vsub.f32 %v1870_v38, %v1878_v44  ;;  %v1879_v51 = vmul.f32 0.0078125, %v1877_v48 }
0x10a6   :  { %v1881_v22 = vsub.f32 %v1871_v39, %v1879_v51  ;;  %v1882_v52 = vmul.f32 %v1880_v49, %v1880_v49 }
0x10a8   :  { %1884 = vadd.xlane.f32.xlu0 %v1882_v52  ;;  %v1883_v53 = vmul.f32 %v1881_v22, %v1881_v22 }
0x10aa   :  { %1886 = vadd.xlane.f32.xlu1 %v1883_v53 }
0x1135   :  { %v1885_v12 = vpop.xlane.xlu0 %1884 }
0x1136   :  { %v1888_v13 = vmul.f32 0.0078125, %v1885_v12 }
0x1137   :  { %v1887_v15 = vpop.xlane.xlu1 %1886 }
0x1138   :  { %v1890_v43 = vadd.f32 1e-05, %v1888_v13  ;;  %v1889_v45 = vmul.f32 0.0078125, %v1887_v15 }
0x113a   :  { %4907 = vrsqrt.f32 %v1890_v43  ;;  %v1891_v17 = vadd.f32 1e-05, %v1889_v45 }
0x113c   :  { %4909 = vrsqrt.f32 %v1891_v17 }
0x1144   :  { %v4908_v23 = vpop.eup %4907 }
0x1145   :  { %v1894_v19 = vmul.f32 %v4908_v23, %v1880_v49 }
0x1146   :  { %v4910_v20 = vpop.eup %4909 }
0x1147   :  { %v1895_v21 = vmul.f32 %v4910_v20, %v1881_v22  ;;  %v1896_v24 = vmul.f32 %v1894_v19, %v1872_v18 }
0x1149   :  { %v1897_v26 = vmul.f32 %v1895_v21, %v1872_v18  ;;  %v5453_v27 = vadd.f32 %v1896_v24, %v1873_v25 }
0x114b   :  { %v5455_v28 = vadd.f32 %v1897_v26, %v1873_v25 }
0x114d   :  { %v1900_v29 = vpack.c.bf16 %v5455_v28, %v5453_v27 }
0x114f   :  { %2113 = vmatmul.mubr.bf16.vlgmr.msra.gmra.mrb[48].mxu0 %v1900_v29  ;;  %4507 = vmatmul.mubr.bf16.vlgmr.msra.gmra.mrb[48].mxu1 %v1900_v29 }
0x1150   :  { %4512 = vmatprep.mubr.msk.bf16.mxu0 %vm5106_vm0, %v5105_v1  ;;  %4518 = vmatprep.mubr.msk.bf16.mxu1 %vm5106_vm0, %v5105_v1 }
0x1222   :  { %v2114_v35 = vpop.f32.mrb[48].mxu0  ;;  %v2157_v16 = vpop.f32.mrb[48].mxu1 }
0x1223   :  { %v5465_v36 = vadd.f32 %v2114_v35, %v1940_v34  ;;  %v2116_v37 = vpop.f32.mrb[49].mxu0  ;;  %v4508_v38 = vpop.f32.mrb[49].mxu1  ;;  %v2158_v51 = vadd.f32 %v2157_v16, %v1948_v58 }
0x1224   :  { %v2117_v39 = vadd.f32 %v2116_v37, %v1944_v14  ;;  %v2118_v59 = vpop.f32.mrb[50].mxu0  ;;  %v2160_v40 = vpop.f32.mrb[50].mxu1 }
0x1225   :  { %v2119_v41 = vadd.f32 %v2118_v59, %v1940_v34  ;;  %v2120_v42 = vpop.f32.mrb[51].mxu0  ;;  %v4509_v46 = vpop.f32.mrb[51].mxu1  ;;  %v2161_v53 = vadd.f32 %v2160_v40, %v1948_v58  ;;  %v5479_v30 = vpack.c.bf16 %v2158_v51, %v2158_v51  ;;  %v5506_v18 = vpack.c.bf16 %v5465_v36, %v5465_v36 }
0x1226   :  { %v5470_v47 = vpack.c.bf16 %v2117_v39, %v5465_v36  ;;  %v2121_v44 = vadd.f32 %v2120_v42, %v1944_v14 }
0x1227   :  { %v5482_v50 = vpack.c.bf16 %v2161_v53, %v2161_v53  ;;  %v2304_v55 = vsel %vm495_vm2, %v5479_v30, 0  ;;  %v5510_v19 = vpack.c.bf16 %v2119_v41, %v2119_v41 }
0x1228   :  { %v5472_v48 = vpack.c.bf16 %v2121_v44, %v2119_v41  ;;  %v2180_v49 = vrot.slane %v5470_v47, 4 }
0x1229   :  { %v2350_v56 = vsel %vm495_vm2, %v5482_v50, 0 }
0x122a   :  { %v2185_v22 = vsel %vm371_vm1, %v2180_v49, 0  ;;  %v2227_v52 = vrot.slane %v5472_v48, 4 }
0x122b   :  { %4511 = vmatpush3.bf16.xpose.msra.mxu0 %v2185_v22 }
0x122c   :  { %v2232_v54 = vsel %vm371_vm1, %v2227_v52, 0  ;;  %4522 = vmatprep.subr.bf16.mxu0 %v5105_v1 }
0x122d   :  { %4517 = vmatpush3.bf16.xpose.msra.mxu1 %v2232_v54 }
0x122e   :  { %4528 = vmatprep.subr.bf16.mxu1 %v5105_v1 }
0x1232   :  { %4513 = vmatmul.mubr.msk.bf16.vlgmr.msra.gmra.mrb[52].mxu0 %vm371_vm1, %v5470_v47 }
0x1233   :  { %4523 = vmatpush3.bf16.msra.mxu0 %v2304_v55  ;;  %4524 = vmatprep.mubr.msk.bf16.mxu0 %vm5106_vm0, %v5105_v1 }
0x1234   :  { %4519 = vmatmul.mubr.msk.bf16.vlgmr.msra.gmra.mrb[52].mxu1 %vm371_vm1, %v5472_v48  ;;  %4534 = vmatprep.subr.bf16.mxu0 %v5105_v1 }
0x1235   :  { %4529 = vmatpush3.bf16.msra.mxu1 %v2350_v56  ;;  %4530 = vmatprep.mubr.msk.bf16.mxu1 %vm5106_vm0, %v5105_v1 }
0x1236   :  { %4540 = vmatprep.subr.bf16.mxu1 %v5105_v1 }
0x1305   :  { %v2221_v57 = vpop.f32.mrb[52].mxu0 }
0x1306   :  { %v2274_v60 = vmul.f32 0.17677669, %v2221_v57  ;;  %v4514_v61 = vpop.f32.mrb[53].mxu0 }
0x1307   :  { %v2224_v62 = vpop.f32.mrb[54].mxu0  ;;  %v2268_v63 = vpop.f32.mrb[52].mxu1 }
0x1308   :  { %v2275_v2 = vmul.f32 0.17677669, %v2268_v63  ;;  %v4515_v3 = vpop.f32.mrb[55].mxu0  ;;  %v4520_v4 = vpop.f32.mrb[53].mxu1  ;;  %v2276_v5 = vsel %vm467_vm3, %v2274_v60, -inf }
0x1309   :  { %v2271_v6 = vpop.f32.mrb[54].mxu1  ;;  %2277 = vmax.xlane.f32.xlu0 %v2276_v5 }
0x130a   :  { %v4521_v7 = vpop.f32.mrb[55].mxu1  ;;  %v2279_v8 = vsel %vm467_vm3, %v2275_v2, -inf }
0x130b   :  { %2280 = vmax.xlane.f32.xlu1 %v2279_v8 }
0x131c   :  { %2449 = vrot.lane.b32.xlu1 %v5472_v48, %s5107_s4 }
0x1396   :  { %v2278_v9 = vpop.xlane.xlu0 %2277 }
0x1397   :  { %v2282_v10 = vsub.f32 %v2274_v60, %v2278_v9 }
0x1398   :  { %v2281_v11 = vpop.xlane.xlu1 %2280 }
0x1399   :  { %v2284_v12 = vmul.f32 1.442695, %v2282_v10  ;;  %v2283_v13 = vsub.f32 %v2275_v2, %v2281_v11 }
0x139b   :  { %4911 = vpow2.f32 %v2284_v12  ;;  %v2286_v15 = vmul.f32 1.442695, %v2283_v13 }
0x139c   :  { %v2450_v20 = vpop.permute.xlu1 %2449 }
0x139d   :  { %4913 = vpow2.f32 %v2286_v15  ;;  %v2451_v14 = vrot.slane %v2450_v20, 4 }
0x139f   :  { %v2459_v38 = vsel %vm371_vm1, %v2451_v14, 0 }
0x13a5   :  { %v4912_v43 = vpop.eup %4911 }
0x13a6   :  { %v2288_v45 = vsel %vm467_vm3, %v4912_v43, 0.0 }
0x13a7   :  { %v4914_v17 = vpop.eup %4913  ;;  %2289 = vadd.xlane.f32.xlu0 %v2288_v45 }
0x13a8   :  { %v2291_v23 = vsel %vm467_vm3, %v4914_v17, 0.0 }
0x13a9   :  { %2292 = vadd.xlane.f32.xlu1 %v2291_v23 }
0x13ba   :  { %2401 = vrot.lane.b32.xlu1 %v5506_v18, %s5107_s4 }
0x13bd   :  { %2397 = vrot.lane.b32.xlu0 %v5470_v47, %s5107_s4 }
0x13be   :  { %2453 = vrot.lane.b32.xlu1 %v5510_v19, %s5107_s4 }
0x1434   :  { %v2290_v21 = vpop.xlane.xlu0 %2289 }
0x1435   :  { %4915 = vrcp.f32 %v2290_v21 }
0x1436   :  { %v2293_v24 = vpop.xlane.xlu1 %2292 }
0x1437   :  { %4917 = vrcp.f32 %v2293_v24 }
0x1438   :  { %v2398_v25 = vpop.permute.xlu0 %2397 }
0x1439   :  { %v2399_v32 = vrot.slane %v2398_v25, 4  ;;  %v4809_v25 = vld [vmem:[#allocation5 + $0x1ec] ss:$24 sps:$4 sm:$0xff]  }
0x143a   :  { %v2402_v39 = vpop.permute.xlu1 %2401 }
0x143b   :  { %v2407_v36 = vsel %vm371_vm1, %v2399_v32, 0 }
0x143e   :  { %v2454_v59 = vpop.permute.xlu1 %2453 }
0x143f   :  { %v4916_v26 = vpop.eup %4915 }
0x1440   :  { %v2296_v29 = vmul.f32 %v4916_v26, %v4912_v43 }
0x1441   :  { %v4918_v34 = vpop.eup %4917 }
0x1442   :  { %v2297_v35 = vmul.f32 %v4918_v34, %v4914_v17  ;;  %v2298_v16 = vpack.c.bf16 %v2296_v29, %v2296_v29  ;;  %v4807_v34 = vld [vmem:[#allocation5 + $0x18c] ss:$24 sps:$4 sm:$0xff]  }
0x1444   :  { %4525 = vmatmul.mubr.msk.bf16.vlgmr.msra.gmra.mrb[56].mxu0 %vm467_vm3, %v2298_v16  ;;  %v2299_v37 = vpack.c.bf16 %v2297_v35, %v2297_v35  ;;  %v4810_v35 = vld [vmem:[#allocation5 + $0x21c] ss:$24 sps:$4 sm:$0xff]  }
0x1445   :  { %4535 = vmatpush3.bf16.xpose.msra.mxu0 %v2407_v36  ;;  %4536 = vmatprep.mubr.msk.bf16.mxu0 %vm5106_vm0, %v5105_v1  ;;  %v4808_v36 = vld [vmem:[#allocation5 + $0x1bc] ss:$24 sps:$4 sm:$0xff]  }
0x1446   :  { %4531 = vmatmul.mubr.msk.bf16.vlgmr.msra.gmra.mrb[56].mxu1 %vm467_vm3, %v2299_v37  ;;  %4546 = vmatprep.subr.bf16.mxu0 %v5105_v1 }
0x1447   :  { %4541 = vmatpush3.bf16.xpose.msra.mxu1 %v2459_v38  ;;  %4542 = vmatprep.mubr.msk.bf16.mxu1 %vm5106_vm0, %v5105_v1 }
0x1448   :  { %4552 = vmatprep.subr.bf16.mxu1 %v5105_v1 }
0x144c   :  { %4537 = vmatmul.mubr.msk.bf16.vlgmr.msra.gmra.mrb[60].mxu0 %vm371_vm1, %v2402_v39 }
0x144d   :  { %4548 = vmatprep.mubr.msk.bf16.mxu0 %vm5106_vm0, %v5105_v1 }
0x144e   :  { %4543 = vmatmul.mubr.msk.bf16.vlgmr.msra.gmra.mrb[60].mxu1 %vm371_vm1, %v2454_v59 }
0x144f   :  { %4554 = vmatprep.mubr.msk.bf16.mxu1 %vm5106_vm0, %v5105_v1 }
0x1517   :  { %v5532_v40 = vpop.f32.mrb[56].mxu0 }
0x1518   :  { %v4526_v41 = vpop.f32.mrb[57].mxu0 }
0x1519   :  { %v2343_v42 = vpop.f32.mrb[58].mxu0  ;;  %v5534_v46 = vpop.f32.mrb[56].mxu1 }
0x151a   :  { %v2392_v58 = vpack.c.bf16 %v5534_v46, %v5532_v40  ;;  %v4527_v44 = vpop.f32.mrb[59].mxu0  ;;  %v4532_v49 = vpop.f32.mrb[57].mxu1 }
0x151b   :  { %v2389_v51 = vpop.f32.mrb[58].mxu1 }
0x151c   :  { %v4533_v22 = vpop.f32.mrb[59].mxu1 }
0x151f   :  { %v2443_v52 = vpop.f32.mrb[60].mxu0 }
0x1520   :  { %v2501_v53 = vmul.f32 0.17677669, %v2443_v52  ;;  %v4538_v54 = vpop.f32.mrb[61].mxu0 }
0x1521   :  { %v2446_v55 = vpop.f32.mrb[62].mxu0  ;;  %v2495_v56 = vpop.f32.mrb[60].mxu1 }
0x1522   :  { %v2502_v57 = vmul.f32 0.17677669, %v2495_v56  ;;  %v4539_v60 = vpop.f32.mrb[63].mxu0  ;;  %v4544_v61 = vpop.f32.mrb[61].mxu1  ;;  %v2503_v62 = vsel %vm467_vm3, %v2501_v53, -inf }
0x1523   :  { %v2498_v63 = vpop.f32.mrb[62].mxu1  ;;  %2504 = vmax.xlane.f32.xlu0 %v2503_v62 }
0x1524   :  { %v4545_v2 = vpop.f32.mrb[63].mxu1  ;;  %v2506_v3 = vsel %vm467_vm3, %v2502_v57, -inf }
0x1525   :  { %2507 = vmax.xlane.f32.xlu1 %v2506_v3 }
0x1536   :  { %2575 = vrot.lane.b32.xlu1 %v5482_v50, %s5107_s4 }
0x153a   :  { %2740 = vrot.lane.b32.xlu1 %v5470_v47, %s5101_s0 }
0x153e   :  { %2791 = vrot.lane.b32.xlu1 %v5472_v48, %s5101_s0 }
0x1542   :  { %2794 = vrot.lane.b32.xlu1 %v5510_v19, %s5101_s0 }
0x15b0   :  { %v2505_v4 = vpop.xlane.xlu0 %2504 }
0x15b1   :  { %v2509_v5 = vsub.f32 %v2501_v53, %v2505_v4 }
0x15b2   :  { %v2508_v6 = vpop.xlane.xlu1 %2507 }
0x15b3   :  { %v2511_v7 = vmul.f32 1.442695, %v2509_v5  ;;  %v2510_v8 = vsub.f32 %v2502_v57, %v2508_v6 }
0x15b5   :  { %4919 = vpow2.f32 %v2511_v7  ;;  %v2513_v9 = vmul.f32 1.442695, %v2510_v8 }
0x15b6   :  { %v2576_v10 = vpop.permute.xlu1 %2575 }
0x15b7   :  { %4921 = vpow2.f32 %v2513_v9  ;;  %v2581_v11 = vsel %vm495_vm2, %v2576_v10, 0 }
0x15b8   :  { %4553 = vmatpush3.bf16.msra.mxu1 %v2581_v11 }
0x15b9   :  { %4566 = vmatprep.subr.bf16.mxu1 %v5105_v1 }
0x15ba   :  { %v2741_v16 = vpop.permute.xlu1 %2740 }
0x15bb   :  { %v2742_v46 = vrot.slane %v2741_v16, 4 }
0x15bd   :  { %v2749_v52 = vsel %vm371_vm1, %v2742_v46, 0 }
0x15be   :  { %v2792_v37 = vpop.permute.xlu1 %2791 }
0x15bf   :  { %v4920_v12 = vpop.eup %4919  ;;  %v2793_v38 = vrot.slane %v2792_v37, 4 }
0x15c0   :  { %v2515_v13 = vsel %vm467_vm3, %v4920_v12, 0.0 }
0x15c1   :  { %v4922_v15 = vpop.eup %4921  ;;  %2516 = vadd.xlane.f32.xlu0 %v2515_v13  ;;  %v2800_v39 = vsel %vm371_vm1, %v2793_v38, 0 }
0x15c2   :  { %v2518_v43 = vsel %vm467_vm3, %v4922_v15, 0.0  ;;  %v2795_v59 = vpop.permute.xlu1 %2794 }
0x15c5   :  { %2519 = vadd.xlane.f32.xlu0 %v2518_v43 }
0x15db   :  { %2527 = vrot.lane.b32.xlu0 %v5479_v30, %s5107_s4 }
0x15df   :  { %2743 = vrot.lane.b32.xlu0 %v5506_v18, %s5101_s0 }
0x164e   :  { %v2517_v45 = vpop.xlane.xlu0 %2516 }
0x164f   :  { %4923 = vrcp.f32 %v2517_v45 }
0x1652   :  { %v2520_v17 = vpop.xlane.xlu0 %2519 }
0x1653   :  { %4925 = vrcp.f32 %v2520_v17 }
0x1656   :  { %v2528_v23 = vpop.permute.xlu0 %2527 }
0x1657   :  { %v2533_v20 = vsel %vm495_vm2, %v2528_v23, 0 }
0x1658   :  { %4547 = vmatpush3.bf16.msra.mxu0 %v2533_v20 }
0x1659   :  { %v4924_v21 = vpop.eup %4923  ;;  %4558 = vmatprep.subr.bf16.mxu0 %v5105_v1 }
0x165a   :  { %v2523_v24 = vmul.f32 %v4924_v21, %v4920_v12  ;;  %v2744_v56 = vpop.permute.xlu0 %2743 }
0x165c   :  { %v2525_v26 = vpack.c.bf16 %v2523_v24, %v2523_v24 }
0x165d   :  { %v4926_v29 = vpop.eup %4925 }
0x165e   :  { %v2524_v32 = vmul.f32 %v4926_v29, %v4922_v15  ;;  %4549 = vmatmul.mubr.msk.bf16.vlgmr.msra.gmra.mrb[64].mxu0 %vm467_vm3, %v2525_v26 }
0x165f   :  { %4559 = vmatpush3.bf16.msra.mxu0 %v4809_v25  ;;  %4562 = vmatprep.mubr.msk.bf16.mxu0 %vm5106_vm0, %v5105_v1 }
0x1660   :  { %v2526_v14 = vpack.c.bf16 %v2524_v32, %v2524_v32  ;;  %4560 = vmatprep.subr.bf16.mxu0 %v5105_v1 }
0x1662   :  { %4555 = vmatmul.mubr.msk.bf16.vlgmr.msra.gmra.mrb[64].mxu1 %vm467_vm3, %v2526_v14 }
0x1663   :  { %4567 = vmatpush3.bf16.msra.mxu1 %v4807_v34  ;;  %4570 = vmatprep.mubr.msk.bf16.mxu1 %vm5106_vm0, %v5105_v1 }
0x1664   :  { %4568 = vmatprep.subr.bf16.mxu1 %v5105_v1  ;;  %4561 = vmatpush3.bf16.msra.mxu0 %v4810_v35 }
0x1665   :  { %4574 = vmatprep.subr.bf16.mxu0 %v5105_v1 }
0x1667   :  { %4569 = vmatpush3.bf16.msra.mxu1 %v4808_v36 }
0x1668   :  { %4580 = vmatprep.subr.bf16.mxu1 %v5105_v1 }
0x166a   :  { %4571 = vmatmul.mubr.msk.bf16.vlgmr.msra.gmra.mrb[68].mxu1 %vm371_vm1, %v2392_v58 }
0x166b   :  { %4582 = vmatprep.mubr.msk.bf16.mxu1 %vm5106_vm0, %v5105_v1 }
0x1670   :  { %4581 = vmatpush3.bf16.xpose.msra.mxu1 %v2800_v39 }
0x1671   :  { %4592 = vmatprep.subr.bf16.mxu1 %v5105_v1 }
0x1677   :  { %4583 = vmatmul.mubr.msk.bf16.vlgmr.msra.gmra.mrb[72].mxu1 %vm371_vm1, %v2795_v59 }
0x1678   :  { %4594 = vmatprep.mubr.msk.bf16.mxu1 %vm5106_vm0, %v5105_v1 }
0x1731   :  { %v2569_v41 = vpop.f32.mrb[64].mxu0 }
0x1732   :  { %v4550_v42 = vpop.f32.mrb[65].mxu0 }
0x1733   :  { %v2572_v40 = vpop.f32.mrb[66].mxu0 }
0x1734   :  { %v4551_v58 = vpop.f32.mrb[67].mxu0 }
0x1735   :  { %v2617_v44 = vpop.f32.mrb[64].mxu1  ;;  %v4811_v58 = vld [vmem:[#allocation5 + $0x24c] ss:$24 sps:$4 sm:$0xff]  }
0x1736   :  { %v2623_v49 = vpack.c.bf16 %v2617_v44, %v2569_v41  ;;  %v4556_v51 = vpop.f32.mrb[65].mxu1 }
0x1737   :  { %v2620_v22 = vpop.f32.mrb[66].mxu1 }
0x1738   :  { %v4557_v53 = vpop.f32.mrb[67].mxu1  ;;  %4563 = vmatmul.mubr.msk.bf16.vlgmr.msra.gmra.mrb[68].mxu0 %vm371_vm1, %v2623_v49 }
0x1739   :  { %4575 = vmatpush3.bf16.xpose.msra.mxu0 %v2749_v52  ;;  %4576 = vmatprep.mubr.msk.bf16.mxu0 %vm5106_vm0, %v5105_v1  ;;  %v4812_v52 = vld [vmem:[#allocation5 + $0x27c] ss:$24 sps:$4 sm:$0xff]  }
0x173a   :  { %4586 = vmatprep.subr.bf16.mxu0 %v5105_v1 }
0x173d   :  { %v2733_v54 = vpop.f32.mrb[68].mxu1 }
0x173e   :  { %v4572_v55 = vpop.f32.mrb[69].mxu1 }
0x173f   :  { %v2736_v57 = vpop.f32.mrb[70].mxu1 }
0x1740   :  { %v4573_v60 = vpop.f32.mrb[71].mxu1  ;;  %4577 = vmatmul.mubr.msk.bf16.vlgmr.msra.gmra.mrb[72].mxu0 %vm371_vm1, %v2744_v56 }
0x1741   :  { %4588 = vmatprep.mubr.msk.bf16.mxu0 %vm5106_vm0, %v5105_v1 }
0x174a   :  { %v2836_v61 = vpop.f32.mrb[72].mxu1 }
0x174b   :  { %v2843_v62 = vmul.f32 0.17677669, %v2836_v61  ;;  %v4584_v63 = vpop.f32.mrb[73].mxu1 }
0x174c   :  { %v2839_v2 = vpop.f32.mrb[74].mxu1 }
0x174d   :  { %v4585_v3 = vpop.f32.mrb[75].mxu1  ;;  %v2847_v4 = vsel %vm467_vm3, %v2843_v62, -inf }
0x174e   :  { %2848 = vmax.xlane.f32.xlu1 %v2847_v4 }
0x175f   :  { %2916 = vrot.lane.b32.xlu1 %v5482_v50, %s5101_s0 }
0x1763   :  { %3027 = vrot.lane.b32.xlu1 %v5470_v47, %s5108_s28 }
0x1767   :  { %3078 = vrot.lane.b32.xlu1 %v5472_v48, %s5108_s28 }
0x176b   :  { %3081 = vrot.lane.b32.xlu1 %v5510_v19, %s5108_s28 }
0x17db   :  { %v2849_v5 = vpop.xlane.xlu1 %2848 }
0x17dc   :  { %v2851_v8 = vsub.f32 %v2843_v62, %v2849_v5 }
0x17de   :  { %v2854_v9 = vmul.f32 1.442695, %v2851_v8 }
0x17df   :  { %v2917_v6 = vpop.permute.xlu1 %2916 }
0x17e0   :  { %v2922_v7 = vsel %vm495_vm2, %v2917_v6, 0  ;;  %4927 = vpow2.f32 %v2854_v9 }
0x17e1   :  { %4593 = vmatpush3.bf16.msra.mxu1 %v2922_v7 }
0x17e2   :  { %4606 = vmatprep.subr.bf16.mxu1 %v5105_v1 }
0x17e3   :  { %v3028_v32 = vpop.permute.xlu1 %3027 }
0x17e4   :  { %v3029_v16 = vrot.slane %v3028_v32, 4 }
0x17e6   :  { %v3036_v38 = vsel %vm371_vm1, %v3029_v16, 0 }
0x17ea   :  { %v4928_v20 = vpop.eup %4927 }
0x17eb   :  { %v2859_v21 = vsel %vm467_vm3, %v4928_v20, 0.0 }
0x180b   :  { %v2677_v10 = vpop.f32.mrb[68].mxu0 }
0x180c   :  { %v5598_v11 = vadd.f32 %v2733_v54, %v2677_v10  ;;  %v4564_v12 = vpop.f32.mrb[69].mxu0 }
0x180d   :  { %v2680_v47 = vpop.f32.mrb[70].mxu0 }
0x180e   :  { %v5600_v13 = vadd.f32 %v2736_v57, %v2680_v47  ;;  %v4565_v48 = vpop.f32.mrb[71].mxu0  ;;  %v3079_v57 = vpop.permute.xlu1 %3078 }
0x180f   :  { %v3080_v62 = vrot.slane %v3079_v57, 4 }
0x1811   :  { %v3087_v5 = vsel %vm371_vm1, %v3080_v62, 0 }
0x1812   :  { %v3082_v7 = vpop.permute.xlu1 %3081 }
0x1813   :  { %v2785_v15 = vpop.f32.mrb[72].mxu0 }
0x1814   :  { %v2842_v19 = vmul.f32 0.17677669, %v2785_v15  ;;  %v4578_v43 = vpop.f32.mrb[73].mxu0 }
0x1815   :  { %v2788_v45 = vpop.f32.mrb[74].mxu0 }
0x1816   :  { %v4579_v17 = vpop.f32.mrb[75].mxu0  ;;  %v2844_v23 = vsel %vm467_vm3, %v2842_v19, -inf }
0x1817   :  { %2845 = vmax.xlane.f32.xlu0 %v2844_v23 }
0x181b   :  { %2860 = vadd.xlane.f32.xlu0 %v2859_v21 }
0x18a4   :  { %v2846_v24 = vpop.xlane.xlu0 %2845 }
0x18a5   :  { %v2850_v25 = vsub.f32 %v2842_v19, %v2846_v24 }
0x18a7   :  { %v2852_v26 = vmul.f32 1.442695, %v2850_v25 }
0x18a8   :  { %v2861_v29 = vpop.xlane.xlu0 %2860 }
0x18a9   :  { %4929 = vpow2.f32 %v2852_v26 }
0x18aa   :  { %4931 = vrcp.f32 %v2861_v29 }
0x18b3   :  { %v4930_v34 = vpop.eup %4929 }
0x18b4   :  { %v4932_v14 = vpop.eup %4931  ;;  %v2856_v35 = vsel %vm467_vm3, %v4930_v34, 0.0 }
0x18b5   :  { %v2865_v36 = vmul.f32 %v4932_v14, %v4928_v20  ;;  %2857 = vadd.xlane.f32.xlu0 %v2856_v35 }
0x18b7   :  { %v2867_v37 = vpack.c.bf16 %v2865_v36, %v2865_v36 }
0x18b9   :  { %4595 = vmatmul.mubr.msk.bf16.vlgmr.msra.gmra.mrb[76].mxu1 %vm467_vm3, %v2867_v37 }
0x18ba   :  { %4607 = vmatpush3.bf16.xpose.msra.mxu1 %v3036_v38  ;;  %4608 = vmatprep.mubr.msk.bf16.mxu1 %vm5106_vm0, %v5105_v1 }
0x18bb   :  { %4618 = vmatprep.subr.bf16.mxu1 %v5105_v1 }
0x18cb   :  { %2868 = vrot.lane.b32.xlu0 %v5479_v30, %s5101_s0 }
0x18cf   :  { %3030 = vrot.lane.b32.xlu0 %v5506_v18, %s5108_s28 }
0x1942   :  { %v2858_v39 = vpop.xlane.xlu0 %2857 }
0x1943   :  { %4933 = vrcp.f32 %v2858_v39 }
0x1946   :  { %v2869_v59 = vpop.permute.xlu0 %2868 }
0x1947   :  { %v2874_v41 = vsel %vm495_vm2, %v2869_v59, 0 }
0x1948   :  { %4587 = vmatpush3.bf16.msra.mxu0 %v2874_v41 }
0x1949   :  { %4598 = vmatprep.subr.bf16.mxu0 %v5105_v1 }
0x194a   :  { %v3031_v42 = vpop.permute.xlu0 %3030 }
0x194b   :  { %4609 = vmatmul.mubr.msk.bf16.vlgmr.msra.gmra.mrb[80].mxu1 %vm371_vm1, %v3031_v42 }
0x194c   :  { %4620 = vmatprep.mubr.msk.bf16.mxu1 %vm5106_vm0, %v5105_v1 }
0x194d   :  { %v4934_v40 = vpop.eup %4933 }
0x194e   :  { %v2864_v46 = vmul.f32 %v4934_v40, %v4930_v34  ;;  %v4813_v40 = vld [vmem:[#allocation5 + $0x2ac] ss:$24 sps:$4 sm:$0xff]  }
0x1950   :  { %v2866_v44 = vpack.c.bf16 %v2864_v46, %v2864_v46  ;;  %v4814_v46 = vld [vmem:[#allocation5 + $0x2dc] ss:$24 sps:$4 sm:$0xff]  }
0x1952   :  { %4589 = vmatmul.mubr.msk.bf16.vlgmr.msra.gmra.mrb[76].mxu0 %vm467_vm3, %v2866_v44 }
0x1953   :  { %4599 = vmatpush3.bf16.msra.mxu0 %v4811_v58  ;;  %4602 = vmatprep.mubr.msk.bf16.mxu0 %vm5106_vm0, %v5105_v1 }
0x1954   :  { %4600 = vmatprep.subr.bf16.mxu0 %v5105_v1 }
0x1957   :  { %4601 = vmatpush3.bf16.msra.mxu0 %v4812_v52 }
0x1958   :  { %4612 = vmatprep.subr.bf16.mxu0 %v5105_v1 }
0x198c   :  { %v2958_v18 = vpop.f32.mrb[76].mxu1 }
0x198d   :  { %v4596_v49 = vpop.f32.mrb[77].mxu1 }
0x198e   :  { %v2961_v51 = vpop.f32.mrb[78].mxu1 }
0x198f   :  { %v4597_v22 = vpop.f32.mrb[79].mxu1 }
0x1a1e   :  { %v3072_v53 = vpop.f32.mrb[80].mxu1 }
0x1a1f   :  { %v3129_v54 = vmul.f32 0.17677669, %v3072_v53  ;;  %v4610_v55 = vpop.f32.mrb[81].mxu1 }
0x1a20   :  { %v3075_v56 = vpop.f32.mrb[82].mxu1 }
0x1a21   :  { %v4611_v60 = vpop.f32.mrb[83].mxu1  ;;  %v3131_v61 = vsel %vm467_vm3, %v3129_v54, -inf  ;;  %v3314_v56 = vld [vmem:[#allocation10 + $0x19] ss:$0 sm:$0xff] }
0x1a22   :  { %3132 = vmax.xlane.f32.xlu0 %v3131_v61 }
0x1a25   :  { %v2910_v63 = vpop.f32.mrb[76].mxu0 }
0x1a26   :  { %v2964_v2 = vpack.c.bf16 %v2958_v18, %v2910_v63  ;;  %v4590_v3 = vpop.f32.mrb[77].mxu0 }
0x1a27   :  { %v2913_v4 = vpop.f32.mrb[78].mxu0 }
0x1a28   :  { %v4591_v6 = vpop.f32.mrb[79].mxu0  ;;  %4603 = vmatmul.mubr.msk.bf16.vlgmr.msra.gmra.mrb[80].mxu0 %vm371_vm1, %v2964_v2 }
0x1a29   :  { %4613 = vmatpush3.bf16.xpose.msra.mxu0 %v3087_v5  ;;  %4614 = vmatprep.mubr.msk.bf16.mxu0 %vm5106_vm0, %v5105_v1  ;;  %v4815_v5 = vld [vmem:[#allocation5 + $0x190] ss:$24 sps:$4 sm:$0xff]   ;;  %v4817_v6 = vld [vmem:[#allocation5 + $0x194] ss:$24 sps:$4 sm:$0xff]  }
0x1a2a   :  { %4624 = vmatprep.subr.bf16.mxu0 %v5105_v1 }
0x1a30   :  { %4615 = vmatmul.mubr.msk.bf16.vlgmr.msra.gmra.mrb[84].mxu0 %vm371_vm1, %v3082_v7  ;;  %v4820_v7 = vld [vmem:[#allocation5 + $0x1c4] ss:$24 sps:$4 sm:$0xff]  }
0x1a31   :  { %4626 = vmatprep.mubr.msk.bf16.mxu0 %vm5106_vm0, %v5105_v1 }
0x1aaf   :  { %v3133_v8 = vpop.xlane.xlu0 %3132 }
0x1ab0   :  { %v3137_v9 = vsub.f32 %v3129_v54, %v3133_v8  ;;  %v4818_v8 = vld [vmem:[#allocation5 + $0x1c0] ss:$24 sps:$4 sm:$0xff]  }
0x1ab2   :  { %v3139_v10 = vmul.f32 1.442695, %v3137_v9 }
0x1ab4   :  { %4935 = vpow2.f32 %v3139_v10 }
0x1abe   :  { %v4936_v12 = vpop.eup %4935 }
0x1abf   :  { %v3143_v47 = vsel %vm467_vm3, %v4936_v12, 0.0 }
0x1ac0   :  { %3144 = vadd.xlane.f32.xlu0 %v3143_v47 }
0x1afb   :  { %v3018_v48 = vpop.f32.mrb[80].mxu0 }
0x1afc   :  { %v3025_v15 = vadd.f32 %v3018_v48, %v5598_v11  ;;  %v4604_v19 = vpop.f32.mrb[81].mxu0 }
0x1afd   :  { %v3021_v43 = vpop.f32.mrb[82].mxu0  ;;  %v4823_v19 = vld [vmem:[#allocation5 + $0x1f4] ss:$24 sps:$4 sm:$0xff]  }
0x1afe   :  { %v3026_v45 = vadd.f32 %v3021_v43, %v5600_v13  ;;  %v4605_v17 = vpop.f32.mrb[83].mxu0  ;;  %v4821_v43 = vld [vmem:[#allocation5 + $0x1f0] ss:$24 sps:$4 sm:$0xff]  }
0x1aff   :  { %v4824_v17 = vld [vmem:[#allocation5 + $0x220] ss:$24 sps:$4 sm:$0xff]  }
0x1b03   :  { %v3123_v23 = vpop.f32.mrb[84].mxu0 }
0x1b04   :  { %v3130_v20 = vmul.f32 0.17677669, %v3123_v23  ;;  %v4616_v21 = vpop.f32.mrb[85].mxu0  ;;  %v4829_v23 = vld [vmem:[#allocation5 + $0x254] ss:$24 sps:$4 sm:$0xff]  }
0x1b05   :  { %v3126_v24 = vpop.f32.mrb[86].mxu0  ;;  %v4832_v21 = vld [vmem:[#allocation5 + $0x284] ss:$24 sps:$4 sm:$0xff]  }
0x1b06   :  { %v4617_v25 = vpop.f32.mrb[87].mxu0  ;;  %v3134_v26 = vsel %vm467_vm3, %v3130_v20, -inf  ;;  %v4830_v24 = vld [vmem:[#allocation5 + $0x280] ss:$24 sps:$4 sm:$0xff]  }
0x1b07   :  { %3135 = vmax.xlane.f32.xlu1 %v3134_v26  ;;  %v4833_v25 = vld [vmem:[#allocation5 + $0x2b0] ss:$24 sps:$4 sm:$0xff]   ;;  %v4835_v26 = vld [vmem:[#allocation5 + $0x2b4] ss:$24 sps:$4 sm:$0xff]  }
0x1b18   :  { %3203 = vrot.lane.b32.xlu1 %v5482_v50, %s5108_s28 }
0x1b4d   :  { %v3145_v16 = vpop.xlane.xlu0 %3144 }
0x1b94   :  { %v3136_v29 = vpop.xlane.xlu1 %3135 }
0x1b95   :  { %v3138_v32 = vsub.f32 %v3130_v20, %v3136_v29  ;;  %v4827_v20 = vld [vmem:[#allocation5 + $0x250] ss:$24 sps:$4 sm:$0xff]   ;;  %v4838_v29 = vld [vmem:[#allocation5 + $0x2e4] ss:$24 sps:$4 sm:$0xff]  }
0x1b97   :  { %v3141_v34 = vmul.f32 1.442695, %v3138_v32  ;;  %v4836_v32 = vld [vmem:[#allocation5 + $0x2e0] ss:$24 sps:$4 sm:$0xff]  }
0x1b98   :  { %v3204_v11 = vpop.permute.xlu1 %3203 }
0x1b99   :  { %4937 = vpow2.f32 %v3141_v34  ;;  %v3209_v14 = vsel %vm495_vm2, %v3204_v11, 0  ;;  %v4839_v34 = vld [vmem:[#allocation7 + $0xc0] sm:$0xff]  }
0x1b9a   :  { %4625 = vmatpush3.bf16.msra.mxu0 %v3209_v14  ;;  %4939 = vrcp.f32 %v3145_v16  ;;  %v4840_v11 = vld [vmem:[#allocation7 + $0x80] sm:$0xff]   ;;  %v4841_v14 = vld [vmem:[#allocation7 + $0xc8] sm:$0xff]   ;;  %v4844_v16 = vld [vmem:[#allocation7 + $0x90] sm:$0xff]  }
0x1b9b   :  { %3457 = vmatprep.subr.bf16.mxu0 %v4817_v6 }
0x1ba3   :  { %v4938_v13 = vpop.eup %4937 }
0x1ba4   :  { %v3146_v35 = vsel %vm467_vm3, %v4938_v13, 0.0  ;;  %v4940_v36 = vpop.eup %4939 }
0x1ba5   :  { %3147 = vadd.xlane.f32.xlu0 %v3146_v35  ;;  %v3151_v50 = vmul.f32 %v4940_v36, %v4936_v12  ;;  %v4843_v35 = vld [vmem:[#allocation7 + $0xd0] sm:$0xff]   ;;  %v4845_v36 = vld [vmem:[#allocation7 + $0xd8] sm:$0xff]  }
0x1ba7   :  { %v3153_v59 = vpack.c.bf16 %v3151_v50, %v3151_v50  ;;  %v4847_v50 = vld [vmem:[#allocation7 + $0xe0] sm:$0xff]  }
0x1bbb   :  { %3155 = vrot.lane.b32.xlu0 %v5479_v30, %s5108_s28 }
0x1c32   :  { %v3148_v37 = vpop.xlane.xlu0 %3147 }
0x1c33   :  { %4941 = vrcp.f32 %v3148_v37  ;;  %v4846_v37 = vld [vmem:[#allocation7 + $0x98] sm:$0xff]  }
0x1c36   :  { %v3156_v38 = vpop.permute.xlu0 %3155 }
0x1c37   :  { %v3161_v39 = vsel %vm495_vm2, %v3156_v38, 0  ;;  %v4848_v38 = vld [vmem:[#allocation7 + $0xa0] sm:$0xff]  }
0x1c38   :  { %4619 = vmatpush3.bf16.msra.mxu1 %v3161_v39  ;;  %v4849_v39 = vld [vmem:[#allocation7 + $0xe8] sm:$0xff]  }
0x1c39   :  { %4630 = vmatprep.subr.bf16.mxu1 %v5105_v1 }
0x1c3b   :  { %4621 = vmatmul.mubr.msk.bf16.vlgmr.msra.gmra.mrb[84].mxu1 %vm467_vm3, %v3153_v59 }
0x1c3c   :  { %4634 = vmatprep.mubr.msk.bf16.mxu1 %vm5106_vm0, %v5105_v1  ;;  %4631 = vmatpush3.bf16.msra.mxu1 %v4813_v40 }
0x1c3d   :  { %v4942_v41 = vpop.eup %4941  ;;  %4632 = vmatprep.subr.bf16.mxu1 %v5105_v1 }
0x1c3e   :  { %v3152_v30 = vmul.f32 %v4942_v41, %v4938_v13  ;;  %v4842_v13 = vld [vmem:[#allocation7 + $0x88] sm:$0xff]  }
0x1c40   :  { %v3154_v42 = vpack.c.bf16 %v3152_v30, %v3152_v30  ;;  %4633 = vmatpush3.bf16.msra.mxu1 %v4814_v46 }
0x1c41   :  { %4302 = vmatprep.subr.bf16.mxu1 %v4839_v34 }
0x1c42   :  { %4627 = vmatmul.mubr.msk.bf16.vlgmr.msra.gmra.mrb[88].mxu0 %vm467_vm3, %v3154_v42 }
0x1c43   :  { %3489 = vmatprep.mubr.bf16.mxu0 %v5104_v0  ;;  %3458 = vmatpush1.bf16.msra.mxu0 %v4815_v5 }
0x1c44   :  { %3459 = vmatprep.subr.bf16.mxu0 %v4820_v7 }
0x1c47   :  { %3460 = vmatpush1.bf16.msra.mxu0 %v4818_v8 }
0x1c48   :  { %3461 = vmatprep.subr.bf16.mxu0 %v4823_v19 }
0x1c4b   :  { %3462 = vmatpush1.bf16.msra.mxu0 %v4821_v43 }
0x1d0e   :  { %v3197_v58 = vpop.f32.mrb[84].mxu1 }
0x1d0f   :  { %v4622_v44 = vpop.f32.mrb[85].mxu1 }
0x1d10   :  { %v3200_v18 = vpop.f32.mrb[86].mxu1  ;;  %v3319_v44 = vld [vmem:[#allocation10 + $0x1c] ss:$0 sm:$0xff] }
0x1d11   :  { %v4623_v49 = vpop.f32.mrb[87].mxu1 }
0x1d15   :  { %v3245_v51 = vpop.f32.mrb[88].mxu0 }
0x1d16   :  { %v3251_v22 = vpack.c.bf16 %v3245_v51, %v3197_v58  ;;  %v4628_v52 = vpop.f32.mrb[89].mxu0 }
0x1d17   :  { %v3248_v53 = vpop.f32.mrb[90].mxu0  ;;  %v3320_v52 = vld [vmem:[#allocation10 + $0x1d] ss:$0 sm:$0xff] }
0x1d18   :  { %v4629_v54 = vpop.f32.mrb[91].mxu0  ;;  %4635 = vmatmul.mubr.msk.bf16.vlgmr.msra.gmra.mrb[88].mxu1 %vm371_vm1, %v3251_v22 }
0x1d19   :  { %4303 = vmatpush3.bf16.msra.mxu1 %v4840_v11 }
0x1d1a   :  { %4304 = vmatprep.subr.bf16.mxu1 %v4841_v14 }
0x1d1d   :  { %4305 = vmatpush3.bf16.msra.mxu1 %v4842_v13 }
0x1d1e   :  { %4306 = vmatprep.subr.bf16.mxu1 %v4843_v35 }
0x1d21   :  { %4307 = vmatpush3.bf16.msra.mxu1 %v4844_v16 }
0x1d22   :  { %4308 = vmatprep.subr.bf16.mxu1 %v4845_v36 }
0x1d25   :  { %4309 = vmatpush3.bf16.msra.mxu1 %v4846_v37 }
0x1d26   :  { %4310 = vmatprep.subr.bf16.mxu1 %v4847_v50  ;;  %v4857_v50 = vld [vmem:[#allocation8 + $0x20] ss:$8 sps:$4 sm:$0xff]  }
0x1d29   :  { %4311 = vmatpush3.bf16.msra.mxu1 %v4848_v38  ;;  %v4858_v38 = vld [vmem:[#allocation8 + $0x30] ss:$8 sps:$4 sm:$0xff]  }
0x1d2a   :  { %4312 = vmatprep.subr.bf16.mxu1 %v4849_v39  ;;  %v4859_v39 = vld [vmem:[#allocation8 + $0x40] ss:$8 sps:$4 sm:$0xff]  }
0x1deb   :  { %v3305_v55 = vpop.f32.mrb[88].mxu1 }
0x1dec   :  { %v3312_v0 = vadd.f32 %v3305_v55, %v3025_v15  ;;  %v4636_v57 = vpop.f32.mrb[89].mxu1 }
0x1ded   :  { %v3308_v60 = vpop.f32.mrb[90].mxu1  ;;  %v4851_v57 = vld [vmem:[#allocation7 + $0xf0] sm:$0xff]  }
0x1dee   :  { %v3315_v61 = vadd.f32 %v3314_v56, %v3312_v0  ;;  %v3313_v62 = vadd.f32 %v3308_v60, %v3026_v45  ;;  %v4637_v63 = vpop.f32.mrb[91].mxu1  ;;  %v4826_v45 = vld [vmem:[#allocation5 + $0x224] ss:$24 sps:$4 sm:$0xff]   ;;  %v4850_v0 = vld [vmem:[#allocation7 + $0xa8] sm:$0xff]   ;;  %v4852_v60 = vld [vmem:[#allocation7 + $0xb0] sm:$0xff]  }
0x1def   :  { %3463 = vmatprep.subr.bf16.mxu0 %v4826_v45  ;;  %4313 = vmatpush3.bf16.msra.mxu1 %v4850_v0  ;;  %v3365_v63 = vld [vmem:[#allocation10 + $0x1a] ss:$8 sm:$0x3] }
0x1df0   :  { %v3316_v2 = vadd.f32 %v3314_v56, %v3313_v62  ;;  %v3317_v3 = vadd.f32 %v3315_v61, %v5453_v27  ;;  %3464 = vmatpush1.bf16.msra.mxu0 %v4824_v17  ;;  %4314 = vmatprep.subr.bf16.mxu1 %v4851_v57  ;;  %v4853_v61 = vld [vmem:[#allocation7 + $0xf8] sm:$0xff]  }
0x1df1   :  { %3465 = vmatprep.subr.bf16.mxu0 %v4829_v23  ;;  %v4854_v62 = vld [vmem:[#allocation7 + $0xb8] sm:$0xff]  }
0x1df2   :  { %3321 = vadd.xlane.f32.xlu1 %v3317_v3  ;;  %v3318_v4 = vadd.f32 %v3316_v2, %v5455_v28  ;;  %v3370_v2 = vrot.slane %v3365_v63, %v5228_v31 }
0x1df3   :  { %4315 = vmatpush3.bf16.msra.mxu1 %v4852_v60 }
0x1df4   :  { %3323 = vadd.xlane.f32.xlu0 %v3318_v4  ;;  %3466 = vmatpush1.bf16.msra.mxu0 %v4827_v20 }
0x1df5   :  { %3467 = vmatprep.subr.bf16.mxu0 %v4832_v21  ;;  %4316 = vmatprep.subr.bf16.mxu1 %v4853_v61 }
0x1df7   :  { %4317 = vmatpush3.bf16.msra.mxu1 %v4854_v62  ;;  %v4864_v62 = vld [vmem:[#allocation8 + $0x14] ss:$8 sps:$4 sm:$0xff]  }
0x1df8   :  { %3468 = vmatpush1.bf16.msra.mxu0 %v4830_v24  ;;  %4658 = vmatprep.subr.bf16.mxu1 %v5105_v1 }
0x1df9   :  { %3469 = vmatprep.subr.bf16.mxu0 %v4835_v26 }
0x1dfc   :  { %3470 = vmatpush1.bf16.msra.mxu0 %v4833_v25 }
0x1dfd   :  { %3471 = vmatprep.subr.bf16.mxu0 %v4838_v29  ;;  %v4855_v29 = vld [vmem:[#allocation8] ss:$8 sps:$4 sm:$0xff]  }
0x1e00   :  { %3472 = vmatpush1.bf16.msra.mxu0 %v4836_v32  ;;  %v4856_v32 = vld [vmem:[#allocation8 + $0x10] ss:$8 sps:$4 sm:$0xff]  }
0x1e01   :  { %4638 = vmatprep.subr.bf16.mxu0 %v5105_v1 }
0x1e7f   :  { %v3322_v9 = vpop.xlane.xlu1 %3321 }
0x1e80   :  { %v3325_v10 = vmul.f32 0.0078125, %v3322_v9 }
0x1e81   :  { %v3324_v12 = vpop.xlane.xlu0 %3323 }
0x1e82   :  { %v5654_v47 = vsub.f32 %v3317_v3, %v3325_v10  ;;  %v3326_v48 = vmul.f32 0.0078125, %v3324_v12  ;;  %v3374_v3 = vrot.slane %v3365_v63, %v5231_v33  ;;  %v3539_v33 = vld [vmem:[#allocation10 + $0x1b] ss:$0 sm:$0xff]  ;;  %v4865_v63 = vld [vmem:[#allocation8 + $0x24] ss:$8 sps:$4 sm:$0xff]  }
0x1e84   :  { %v5656_v15 = vsub.f32 %v3318_v4, %v3326_v48  ;;  %v3329_v27 = vmul.f32 %v5654_v47, %v5654_v47 }
0x1e86   :  { %3331 = vadd.xlane.f32.xlu0 %v3329_v27  ;;  %v3330_v28 = vmul.f32 %v5656_v15, %v5656_v15 }
0x1e88   :  { %3333 = vadd.xlane.f32.xlu1 %v3330_v28 }
0x1f13   :  { %v3332_v59 = vpop.xlane.xlu0 %3331 }
0x1f14   :  { %v3335_v41 = vmul.f32 0.0078125, %v3332_v59  ;;  %v4860_v59 = vld [vmem:[#allocation8 + $0x50] ss:$8 sps:$4 sm:$0xff]  }
0x1f15   :  { %v3334_v30 = vpop.xlane.xlu1 %3333 }
0x1f16   :  { %v3337_v42 = vadd.f32 1e-05, %v3335_v41  ;;  %v3336_v40 = vmul.f32 0.0078125, %v3334_v30  ;;  %v4861_v41 = vld [vmem:[#allocation8 + $0x60] ss:$8 sps:$4 sm:$0xff]  }
0x1f17   :  { %v4862_v30 = vld [vmem:[#allocation8 + $0x70] ss:$8 sps:$4 sm:$0xff]  }
0x1f18   :  { %4943 = vrsqrt.f32 %v3337_v42  ;;  %v3338_v46 = vadd.f32 1e-05, %v3336_v40  ;;  %v4863_v42 = vld [vmem:[#allocation8 + $0x4] ss:$8 sps:$4 sm:$0xff]  }
0x1f1a   :  { %4945 = vrsqrt.f32 %v3338_v46 }
0x1f22   :  { %v4944_v58 = vpop.eup %4943 }
0x1f23   :  { %v3341_v18 = vmul.f32 %v4944_v58, %v5654_v47 }
0x1f24   :  { %v4946_v49 = vpop.eup %4945 }
0x1f25   :  { %v3342_v51 = vmul.f32 %v4946_v49, %v5656_v15  ;;  %v3343_v22 = vmul.f32 %v3341_v18, %v3319_v44 }
0x1f27   :  { %v3344_v53 = vmul.f32 %v3342_v51, %v3319_v44  ;;  %v3345_v54 = vadd.f32 %v3343_v22, %v3320_v52  ;;  %v3679_v22 = vld [vmem:[#allocation10 + $0x1e] ss:$0 sm:$0xff] }
0x1f29   :  { %v3346_v55 = vadd.f32 %v3344_v53, %v3320_v52 }
0x1f2b   :  { %v3347_v56 = vpack.c.bf16 %v3346_v55, %v3345_v54 }
0x1f2d   :  { %3490 = vmatmul.mubr.bf16.vlgmr.msra.gmra.mrb[92].mxu0 %v3347_v56  ;;  %v3680_v56 = vld [vmem:[#allocation10 + $0x1f] ss:$0 sm:$0xff] }
0x1f2e   :  { %4654 = vmatprep.mubr.msk.bf16.mxu0 %vm5106_vm0, %v5105_v1  ;;  %4639 = vmatpush3.bf16.msra.mxu0 %v4855_v29 }
0x1f2f   :  { %4640 = vmatprep.subr.bf16.mxu0 %v5105_v1 }
0x1f32   :  { %4641 = vmatpush3.bf16.msra.mxu0 %v4856_v32 }
0x1f33   :  { %4642 = vmatprep.subr.bf16.mxu0 %v5105_v1 }
0x1f36   :  { %4643 = vmatpush3.bf16.msra.mxu0 %v4857_v50 }
0x1f37   :  { %4644 = vmatprep.subr.bf16.mxu0 %v5105_v1 }
0x1f3a   :  { %4645 = vmatpush3.bf16.msra.mxu0 %v4858_v38 }
0x1f3b   :  { %4646 = vmatprep.subr.bf16.mxu0 %v5105_v1 }
0x1f3e   :  { %4647 = vmatpush3.bf16.msra.mxu0 %v4859_v39 }
0x1f3f   :  { %4648 = vmatprep.subr.bf16.mxu0 %v5105_v1 }
0x1f42   :  { %4649 = vmatpush3.bf16.msra.mxu0 %v4860_v59 }
0x1f43   :  { %4650 = vmatprep.subr.bf16.mxu0 %v5105_v1 }
0x1f46   :  { %4651 = vmatpush3.bf16.msra.mxu0 %v4861_v41 }
0x1f47   :  { %4652 = vmatprep.subr.bf16.mxu0 %v5105_v1 }
0x1f4a   :  { %4653 = vmatpush3.bf16.msra.mxu0 %v4862_v30 }
0x2000   :  { %v3491_v4 = vpop.f32.mrb[92].mxu0 }
0x2001   :  { %v3492_v5 = vadd.f32 %v3491_v4, %v3370_v2  ;;  %v3493_v6 = vpop.f32.mrb[93].mxu0  ;;  %v4868_v4 = vld [vmem:[#allocation8 + $0x54] ss:$8 sps:$4 sm:$0xff]  }
0x2002   :  { %v3494_v7 = vadd.f32 %v3493_v6, %v3374_v3  ;;  %v3495_v8 = vpop.f32.mrb[94].mxu0  ;;  %v4870_v6 = vld [vmem:[#allocation8 + $0x74] ss:$8 sps:$4 sm:$0xff]  }
0x2003   :  { %v3496_v9 = vadd.f32 %v3495_v8, %v3370_v2  ;;  %v3497_v10 = vpop.f32.mrb[95].mxu0  ;;  %v3500_v47 = vmax.f32 %v3492_v5, 0.0  ;;  %v4866_v2 = vld [vmem:[#allocation8 + $0x34] ss:$8 sps:$4 sm:$0xff]   ;;  %v4869_v5 = vld [vmem:[#allocation8 + $0x64] ss:$8 sps:$4 sm:$0xff]  }
0x2004   :  { %v3498_v12 = vadd.f32 %v3497_v10, %v3374_v3  ;;  %v3501_v15 = vmax.f32 %v3494_v7, 0.0  ;;  %v4867_v3 = vld [vmem:[#allocation8 + $0x44] ss:$8 sps:$4 sm:$0xff]   ;;  %v3725_v7 = vld [vmem:[#allocation10 + $0x30] ss:$0 sm:$0xff] }
0x2005   :  { %v3502_v48 = vmax.f32 %v3496_v9, 0.0 }
0x2006   :  { %v3503_v27 = vmax.f32 %v3498_v12, 0.0 }
0x2007   :  { %v3504_v28 = vpack.c.bf16 %v3502_v48, %v3500_v47 }
0x2008   :  { %v3505_v19 = vpack.c.bf16 %v3503_v27, %v3501_v15 }
0x200a   :  { %3668 = vmatprep.mubr.bf16.mxu1 %v3505_v19 }
0x200b   :  { %3669 = vmatmul.mubr.bf16.vlgmr.msra.gmra.mrb[92].mxu1 %v3504_v28 }
0x200c   :  { %4674 = vmatprep.mubr.msk.bf16.mxu1 %vm5106_vm0, %v5105_v1  ;;  %4659 = vmatpush3.bf16.msra.mxu1 %v4863_v42 }
0x200d   :  { %4660 = vmatprep.subr.bf16.mxu1 %v5105_v1 }
0x2010   :  { %4661 = vmatpush3.bf16.msra.mxu1 %v4864_v62 }
0x2011   :  { %4662 = vmatprep.subr.bf16.mxu1 %v5105_v1 }
0x2014   :  { %4663 = vmatpush3.bf16.msra.mxu1 %v4865_v63 }
0x2015   :  { %4664 = vmatprep.subr.bf16.mxu1 %v5105_v1 }
0x2018   :  { %4665 = vmatpush3.bf16.msra.mxu1 %v4866_v2 }
0x2019   :  { %4666 = vmatprep.subr.bf16.mxu1 %v5105_v1 }
0x201c   :  { %4667 = vmatpush3.bf16.msra.mxu1 %v4867_v3 }
0x201d   :  { %4668 = vmatprep.subr.bf16.mxu1 %v5105_v1 }
0x2020   :  { %4669 = vmatpush3.bf16.msra.mxu1 %v4868_v4 }
0x2021   :  { %4670 = vmatprep.subr.bf16.mxu1 %v5105_v1 }
0x2024   :  { %4671 = vmatpush3.bf16.msra.mxu1 %v4869_v5 }
0x2025   :  { %4672 = vmatprep.subr.bf16.mxu1 %v5105_v1 }
0x2028   :  { %4673 = vmatpush3.bf16.msra.mxu1 %v4870_v6 }
0x20de   :  { %v4318_v31 = vpop.f32.mrb[92].mxu1 }
0x20df   :  { %v4319_v43 = vpop.f32.mrb[93].mxu1 }
0x20e0   :  { %v4320_v45 = vadd.f32 %v4319_v43, %v4318_v31  ;;  %v4321_v17 = vpop.f32.mrb[94].mxu1 }
0x20e1   :  { %v4322_v23 = vpop.f32.mrb[95].mxu1 }
0x20e2   :  { %v3671_v20 = vadd.f32 %v4320_v45, %v3539_v33  ;;  %v4323_v21 = vadd.f32 %v4322_v23, %v4321_v17 }
0x20e4   :  { %v3674_v24 = vadd.f32 %v4323_v21, %v3539_v33  ;;  %v3677_v25 = vadd.f32 %v3671_v20, %v3345_v54 }
0x20e6   :  { %3681 = vadd.xlane.f32.xlu0 %v3677_v25  ;;  %v3678_v26 = vadd.f32 %v3674_v24, %v3346_v55 }
0x20e8   :  { %3683 = vadd.xlane.f32.xlu1 %v3678_v26 }
0x2173   :  { %v3682_v34 = vpop.xlane.xlu0 %3681 }
0x2174   :  { %v3685_v11 = vmul.f32 0.0078125, %v3682_v34 }
0x2175   :  { %v3684_v14 = vpop.xlane.xlu1 %3683 }
0x2176   :  { %v3687_v13 = vsub.f32 %v3677_v25, %v3685_v11  ;;  %v3686_v35 = vmul.f32 0.0078125, %v3684_v14 }
0x2178   :  { %v3688_v16 = vsub.f32 %v3678_v26, %v3686_v35  ;;  %v3689_v36 = vmul.f32 %v3687_v13, %v3687_v13  ;;  %v3850_v35 = vld [vmem:[#allocation10 + $0x31] ss:$0 sm:$0xff] }
0x217a   :  { %3691 = vadd.xlane.f32.xlu0 %v3689_v36  ;;  %v3690_v37 = vmul.f32 %v3688_v16, %v3688_v16 }
0x217c   :  { %3693 = vadd.xlane.f32.xlu1 %v3690_v37 }
0x2207   :  { %v3692_v40 = vpop.xlane.xlu0 %3691 }
0x2208   :  { %v3695_v46 = vmul.f32 0.0078125, %v3692_v40 }
0x2209   :  { %v3694_v58 = vpop.xlane.xlu1 %3693 }
0x220a   :  { %v3697_v44 = vadd.f32 1e-05, %v3695_v46  ;;  %v3696_v18 = vmul.f32 0.0078125, %v3694_v58 }
0x220c   :  { %4947 = vrsqrt.f32 %v3697_v44  ;;  %v3698_v49 = vadd.f32 1e-05, %v3696_v18 }
0x220e   :  { %4949 = vrsqrt.f32 %v3698_v49 }
0x2216   :  { %v4948_v51 = vpop.eup %4947 }
0x2217   :  { %v3701_v52 = vmul.f32 %v4948_v51, %v3687_v13 }
0x2218   :  { %v4950_v53 = vpop.eup %4949 }
0x2219   :  { %v3702_v54 = vmul.f32 %v4950_v53, %v3688_v16  ;;  %v3703_v55 = vmul.f32 %v3701_v52, %v3679_v22 }
0x221b   :  { %v3704_v0 = vmul.f32 %v3702_v54, %v3679_v22  ;;  %v3705_v57 = vadd.f32 %v3703_v55, %v3680_v56 }
0x221d   :  { %v3706_v60 = vadd.f32 %v3704_v0, %v3680_v56 }
0x221f   :  { %v3707_v61 = vpack.c.bf16 %v3706_v60, %v3705_v57 }
0x2221   :  { %4655 = vmatmul.mubr.bf16.vlgmr.msra.gmra.mrb[96].mxu0 %v3707_v61 }
0x22f4   :  { %v3808_v8 = vpop.f32.mrb[96].mxu0 }
0x22f5   :  { %v3809_v9 = vadd.f32 %v3808_v8, %v3725_v7  ;;  %v4656_v10 = vpop.f32.mrb[97].mxu0 }
0x22f6   :  { %v3811_v12 = vpop.f32.mrb[98].mxu0 }
0x22f7   :  { %v3815_v47 = vmax.f32 %v3809_v9, 0.0  ;;  %v3812_v48 = vadd.f32 %v3811_v12, %v3725_v7  ;;  %v4657_v15 = vpop.f32.mrb[99].mxu0 }
0x22f9   :  { %v3817_v27 = vrot.slane %v3815_v47, 4  ;;  %v3816_v28 = vmax.f32 %v3812_v48, 0.0 }
0x22fb   :  { %v3818_v19 = vadd.f32 %v3817_v27, %v3815_v47  ;;  %v3823_v31 = vrot.slane %v3816_v28, 4 }
0x22fd   :  { %v3819_v33 = vrot.slane %v3818_v19, 2  ;;  %v3824_v43 = vadd.f32 %v3823_v31, %v3816_v28 }
0x22ff   :  { %v3820_v45 = vadd.f32 %v3819_v33, %v3818_v19  ;;  %v3825_v17 = vrot.slane %v3824_v43, 2 }
0x2301   :  { %v3821_v23 = vrot.slane %v3820_v45, 1  ;;  %v3826_v20 = vadd.f32 %v3825_v17, %v3824_v43 }
0x2303   :  { %v3822_v1 = vadd.f32 %v3821_v23, %v3820_v45  ;;  %v3827_v21 = vrot.slane %v3826_v20, 1 }
0x2305   :  { %v3830_v24 = vmul.f32 0.125, %v3822_v1  ;;  %v3828_v25 = vadd.f32 %v3827_v21, %v3826_v20 }
0x2307   :  { %v3832_v26 = vpack.c.bf16 %v3830_v24, %v3830_v24  ;;  %v3831_v29 = vmul.f32 0.125, %v3828_v25 }
0x2309   :  { %v3833_v32 = vpack.c.bf16 %v3831_v29, %v3831_v29  ;;  %v3853_v34 = vunpack.c.l.b16 %v3832_v26 }
0x230b   :  { %v3854_v11 = vunpack.c.l.b16 %v3833_v32 }
0x230d   :  { %v3856_v14 = vsel %vm3855_vm4, %v3854_v11, %v3853_v34 }
0x230e   :  { %v3857_v13 = vpack.c.b16 %v3856_v14, %v3856_v14 }
0x2310   :  { %4675 = vmatmul.mubr.bf16.vlgmr.msra.gmra.mrb[96].mxu1 %v3857_v13 }
0x23e3   :  { %v3941_v16 = vpop.f32.mrb[96].mxu1 }
0x23e4   :  { %v3942_v36 = vadd.f32 %v3941_v16, %v3850_v35  ;;  %v4676_v37 = vpop.f32.mrb[97].mxu1 }
0x23e5   :  { %v3944_v50 = vpop.f32.mrb[98].mxu1 }
0x23e6   :  { %3947 = vst [vmem:[#allocation11] sm:$0x3] %v3942_v36  ;;  %v4677_v38 = vpop.f32.mrb[99].mxu1 }
0x23e7   :  { %5074 = shalt.err (!%p5071_p2)
}
0x23e8   :  { %s5075_s12 = scalar_lea.hbm %s5703_s5, 32 }
0x23e9   :  { %p5076_p3 = scmp.ne.s32.totalorder %s5703_s5, %s5075_s12  ;;  %p5079_p4 = scmp.lt.u32.totalorder %s5075_s12, %s5703_s5 }
0x23eb   :  { %p5081_p5 = pnand %p5079_p4, %p5076_p3 }
0x23ed   :  { %5084 = shalt.err (!%p5081_p5)
}
0x23ee   :  { %3957 = dma.vmem_to_hbm [thread:$0]  %s3955_s7, 32, %s5703_s5, [#allocation4]  }
0x23ef   :  { %5091 = dma.done.wait [#allocation4], 32  }
0x23f0   :  { %5092 = vsyncadd [#allocation4], 4294967264 }
0x23f1   :  { %3961 = vsyncpa [#allocation3], 1 }
0x23f2   :  { %3962 = vsyncpa [#allocation6], 1 }
0x23f3   :  { %3963 = vsyncpa [#allocation9], 1 }
0x23f4   :  { %3964 = vsyncpa [#allocation4], 1 }

</bundles_post_ra>
